<compile_context>
chip_gen: v5e
topology: v5e:2x2
jax: 0.10.0
libtpu: 0.0.40
codegen_flags: <defaults>
</compile_context>

<pallas_src>
import math

import jax
import jax.numpy as jnp
from jax.experimental import pallas as pl
from jax.experimental.pallas import tpu as pltpu


def _round_up(x: int, m: int) -> int:
    return int(math.ceil(x / m) * m)


# ----------------------------- Pallas kernel ------------------------------- #

def _ttl_mlp_kernel(x_ref, w1_ref, b1_ref, w2_ref, b2_ref, w3_ref, b3_ref,
                    out_ref):
    """Fused 3-layer MLP for one row-tile.

    x_ref:   (TN, F_in)   bfloat16
    w1_ref:  (F_in, H2)   bfloat16   b1_ref: (1, H2) float32
    w2_ref:  (H2,  H)     bfloat16   b2_ref: (1, H)  float32
    w3_ref:  (H,   E)     bfloat16   b3_ref: (1, E)  float32
    out_ref: (TN, E)      float32
    """
    x = x_ref[...]                                          # bf16 MXU operand

    # Layer 1: Linear + ReLU (f32 accumulate, f32 elementwise).
    h = jnp.dot(x, w1_ref[...], preferred_element_type=jnp.float32)
    h = jnp.maximum(h + b1_ref[...], 0.0)
    # Dropout(0.4): identity in eval mode.

    # Layer 2: Linear + ReLU.
    h = jnp.dot(h.astype(jnp.bfloat16), w2_ref[...],
                preferred_element_type=jnp.float32)
    h = jnp.maximum(h + b2_ref[...], 0.0)
    # Dropout(0.4): identity in eval mode.

    # Layer 3: Linear (no activation).
    out_ref[...] = (
        jnp.dot(h.astype(jnp.bfloat16), w3_ref[...],
                preferred_element_type=jnp.float32)
        + b3_ref[...]
    )


def ttl_mlp_forward(x, w1, b1, w2, b2, w3, b3):
    """Run the fused MLP kernel on x of shape (N, F_in) -> (N, E) float32.

    Weights w1/w2/w3 are expected in bf16 (converted once, in the wrapper);
    biases are f32 with shape (1, H).
    """
    n, f_in = x.shape
    h2 = w1.shape[1]
    h = w2.shape[1]
    e = w3.shape[1]

    # Row tile: big enough to amortize per-step overhead, small enough to fit
    # VMEM comfortably, exact-fit (rounded to the 8-row sublane) for tiny
    # batches so we don't pad 8 rows up to 128.
    tile_n = min(512, max(8, _round_up(n, 8)))
    n_pad = _round_up(n, tile_n)

    # Cast activations to bf16 at the boundary (halves the per-tile x DMA),
    # then pad the row dim only if needed.
    x_bf16 = x.astype(jnp.bfloat16)
    if n_pad != n:
        x_bf16 = jnp.pad(x_bf16, ((0, n_pad - n), (0, 0)))

    grid = (n_pad // tile_n,)

    flops = 2 * n_pad * (f_in * h2 + h2 * h + h * e)
    bytes_accessed = (
        n_pad * f_in * 2                       # x (bf16)
        + n_pad * e * 4                        # out (f32)
        + (f_in * h2 + h2 * h + h * e) * 2     # weights (bf16)
        + (h2 + h + e) * 4                     # biases (f32)
    )

    out = pl.pallas_call(
        _ttl_mlp_kernel,
        out_shape=jax.ShapeDtypeStruct((n_pad, e), jnp.float32),
        grid_spec=pltpu.PrefetchScalarGridSpec(
            num_scalar_prefetch=0,
            grid=grid,
            in_specs=[
                pl.BlockSpec((tile_n, f_in), lambda i: (i, 0)),  # x tile
                # Constant index_maps -> weights/biases stay resident in VMEM
                # across grid steps (no re-DMA per step).
                pl.BlockSpec((f_in, h2),     lambda i: (0, 0)),  # W1
                pl.BlockSpec((1, h2),        lambda i: (0, 0)),  # b1
                pl.BlockSpec((h2, h),        lambda i: (0, 0)),  # W2
                pl.BlockSpec((1, h),         lambda i: (0, 0)),  # b2
                pl.BlockSpec((h, e),         lambda i: (0, 0)),  # W3
                pl.BlockSpec((1, e),         lambda i: (0, 0)),  # b3
            ],
            out_specs=pl.BlockSpec((tile_n, e), lambda i: (i, 0)),
        ),
        compiler_params=pltpu.CompilerParams(
            dimension_semantics=("parallel",)),
        cost_estimate=pl.CostEstimate(
            flops=flops, transcendentals=0, bytes_accessed=bytes_accessed),
    )(x_bf16, w1, b1, w2, b2, w3, b3)

    if n_pad != n:
        out = out[:n]
    return out


# ------------------------- Module-equivalent wrapper ------------------------ #

class TTLembModelPallas:
    """JAX/Pallas re-implementation of TTLembModel (eval-mode forward)."""

    def __init__(self, in_embedding_size: int = 1536, hidden_size: int = 256,
                 emb_size: int = 256, key: jax.Array = None):
        if key is None:
            key = jax.random.PRNGKey(0)

        def linear_params(key, fan_in, fan_out):
            kw, kb = jax.random.split(key)
            bound = 1.0 / math.sqrt(fan_in)
            # Stored as (in, out) so the kernel computes x @ W + b directly.
            w = jax.random.uniform(kw, (fan_in, fan_out), jnp.float32,
                                   -bound, bound)
            b = jax.random.uniform(kb, (1, fan_out), jnp.float32,
                                   -bound, bound)
            return w, b

        k1, k2, k3 = jax.random.split(key, 3)
        # f32 master copies (used by the pure-JAX reference).
        self.w1_f32, self.b1 = linear_params(k1, in_embedding_size,
                                             hidden_size * 2)
        self.w2_f32, self.b2 = linear_params(k2, hidden_size * 2, hidden_size)
        self.w3_f32, self.b3 = linear_params(k3, hidden_size, emb_size)
        # bf16 copies stored in HBM (converted once, not per kernel step).
        self.w1 = self.w1_f32.astype(jnp.bfloat16)
        self.w2 = self.w2_f32.astype(jnp.bfloat16)
        self.w3 = self.w3_f32.astype(jnp.bfloat16)

    def __call__(self, x: jax.Array) -> jax.Array:
        # x: (N, in_embedding_size) float32
        return ttl_mlp_forward(x, self.w1, self.b1, self.w2, self.b2,
                               self.w3, self.b3)

    def reference(self, x: jax.Array) -> jax.Array:
        """Pure-JAX f32 reference forward (eval mode, dropout = identity)."""
        h = jnp.maximum(x @ self.w1_f32 + self.b1, 0.0)
        h = jnp.maximum(h @ self.w2_f32 + self.b2, 0.0)
        return h @ self.w3_f32 + self.b3


# ---------------------------------- main ----------------------------------- #

if __name__ == "__main__":
    in_embedding_size, hidden_size, emb_size = 1536, 256, 256
    N = 8  # small batch of feature rows

    key = jax.random.PRNGKey(0)
    key_params, key_x = jax.random.split(key)

    model = TTLembModelPallas(in_embedding_size, hidden_size, emb_size,
                              key_params)

    x = jax.random.normal(key_x, (N, in_embedding_size), dtype=jnp.float32)

    out = model(x)
    out = jax.block_until_ready(out)

    assert out.shape == (N, emb_size), out.shape
    assert out.dtype == jnp.float32, out.dtype

    # bf16 MXU operands with f32 accumulation -> loosened tolerance vs the
    # pure-f32 reference.
    ref = model.reference(x)
    assert jnp.allclose(out, ref, atol=5e-2, rtol=5e-2), (
        "mismatch vs pure-JAX reference forward")

    print("KERNEL_OK")
</pallas_src>

<mosaic_0001>
module attributes {stable_mosaic.version = 11 : i64} {
  func.func @_ttl_mlp_kernel(%arg0: i32, %arg1: memref<8x1536xbf16, #tpu.memory_space<vmem>>, %arg2: memref<1536x512xbf16, #tpu.memory_space<vmem>>, %arg3: memref<1x512xf32, #tpu.memory_space<vmem>>, %arg4: memref<512x256xbf16, #tpu.memory_space<vmem>>, %arg5: memref<1x256xf32, #tpu.memory_space<vmem>>, %arg6: memref<256x256xbf16, #tpu.memory_space<vmem>>, %arg7: memref<1x256xf32, #tpu.memory_space<vmem>>, %arg8: memref<8x256xf32, #tpu.memory_space<vmem>>) attributes {dimension_semantics = [#tpu.dimension_semantics<parallel>], iteration_bounds = array<i64: 1>, scalar_prefetch = 0 : i64, scratch_operands = 0 : i64, tpu.core_type = #tpu.core_type<tc>, window_params = [{transform_indices = @transform_0, window_bounds = array<i64: 8, 1536>}, {pipeline_mode = #tpu.pipeline_mode<synchronous>, transform_indices = @transform_1, window_bounds = array<i64: 1536, 512>}, {pipeline_mode = #tpu.pipeline_mode<synchronous>, transform_indices = @transform_2, window_bounds = array<i64: 1, 512>}, {pipeline_mode = #tpu.pipeline_mode<synchronous>, transform_indices = @transform_3, window_bounds = array<i64: 512, 256>}, {pipeline_mode = #tpu.pipeline_mode<synchronous>, transform_indices = @transform_4, window_bounds = array<i64: 1, 256>}, {pipeline_mode = #tpu.pipeline_mode<synchronous>, transform_indices = @transform_5, window_bounds = array<i64: 256, 256>}, {pipeline_mode = #tpu.pipeline_mode<synchronous>, transform_indices = @transform_6, window_bounds = array<i64: 1, 256>}, {transform_indices = @transform_7, window_bounds = array<i64: 8, 256>}]} {
    %c0 = arith.constant 0 : index
    %c0_0 = arith.constant 0 : index
    %0 = vector.load %arg1[%c0, %c0_0] : memref<8x1536xbf16, #tpu.memory_space<vmem>>, vector<8x1536xbf16>
    %c0_1 = arith.constant 0 : index
    %c0_2 = arith.constant 0 : index
    %1 = vector.load %arg2[%c0_1, %c0_2] : memref<1536x512xbf16, #tpu.memory_space<vmem>>, vector<1536x512xbf16>
    %cst = arith.constant dense<0.000000e+00> : vector<8x512xf32>
    %2 = tpu.matmul %0, %1, %cst {dimension_numbers = #tpu.dot_dimension_numbers<[1], [0], [0], [1], [0, 0, 1, 1], [], []>} : vector<8x1536xbf16>, vector<1536x512xbf16>, vector<8x512xf32> -> vector<8x512xf32>
    %c0_3 = arith.constant 0 : index
    %c0_4 = arith.constant 0 : index
    %3 = vector.load %arg3[%c0_3, %c0_4] : memref<1x512xf32, #tpu.memory_space<vmem>>, vector<1x512xf32>
    %4 = vector.broadcast %3 : vector<1x512xf32> to vector<8x512xf32>
    %5 = arith.addf %2, %4 : vector<8x512xf32>
    %cst_5 = arith.constant 0.000000e+00 : f32
    %6 = vector.broadcast %cst_5 : f32 to vector<8x512xf32>
    %7 = arith.maximumf %5, %6 : vector<8x512xf32>
    %8 = arith.truncf %7 : vector<8x512xf32> to vector<8x512xbf16>
    %c0_6 = arith.constant 0 : index
    %c0_7 = arith.constant 0 : index
    %9 = vector.load %arg4[%c0_6, %c0_7] : memref<512x256xbf16, #tpu.memory_space<vmem>>, vector<512x256xbf16>
    %cst_8 = arith.constant dense<0.000000e+00> : vector<8x256xf32>
    %10 = tpu.matmul %8, %9, %cst_8 {dimension_numbers = #tpu.dot_dimension_numbers<[1], [0], [0], [1], [0, 0, 1, 1], [], []>} : vector<8x512xbf16>, vector<512x256xbf16>, vector<8x256xf32> -> vector<8x256xf32>
    %c0_9 = arith.constant 0 : index
    %c0_10 = arith.constant 0 : index
    %11 = vector.load %arg5[%c0_9, %c0_10] : memref<1x256xf32, #tpu.memory_space<vmem>>, vector<1x256xf32>
    %12 = vector.broadcast %11 : vector<1x256xf32> to vector<8x256xf32>
    %13 = arith.addf %10, %12 : vector<8x256xf32>
    %cst_11 = arith.constant 0.000000e+00 : f32
    %14 = vector.broadcast %cst_11 : f32 to vector<8x256xf32>
    %15 = arith.maximumf %13, %14 : vector<8x256xf32>
    %16 = arith.truncf %15 : vector<8x256xf32> to vector<8x256xbf16>
    %c0_12 = arith.constant 0 : index
    %c0_13 = arith.constant 0 : index
    %17 = vector.load %arg6[%c0_12, %c0_13] : memref<256x256xbf16, #tpu.memory_space<vmem>>, vector<256x256xbf16>
    %cst_14 = arith.constant dense<0.000000e+00> : vector<8x256xf32>
    %18 = tpu.matmul %16, %17, %cst_14 {dimension_numbers = #tpu.dot_dimension_numbers<[1], [0], [0], [1], [0, 0, 1, 1], [], []>} : vector<8x256xbf16>, vector<256x256xbf16>, vector<8x256xf32> -> vector<8x256xf32>
    %c0_15 = arith.constant 0 : index
    %c0_16 = arith.constant 0 : index
    %19 = vector.load %arg7[%c0_15, %c0_16] : memref<1x256xf32, #tpu.memory_space<vmem>>, vector<1x256xf32>
    %20 = vector.broadcast %19 : vector<1x256xf32> to vector<8x256xf32>
    %21 = arith.addf %18, %20 : vector<8x256xf32>
    %c0_17 = arith.constant 0 : index
    %c0_18 = arith.constant 0 : index
    %22 = vector.load %arg8[%c0_17, %c0_18] : memref<8x256xf32, #tpu.memory_space<vmem>>, vector<8x256xf32>
    tpu.vector_store %arg8[%c0_17, %c0_18], %21 {strides = array<i32>} : memref<8x256xf32, #tpu.memory_space<vmem>>, vector<8x256xf32>,
    return
  }
  func.func @transform_0(%arg0: i32) -> (i32, i32) {
    %c0_i32 = arith.constant 0 : i32
    %c0_i32_0 = arith.constant 0 : i32
    return %arg0, %c0_i32 : i32, i32
  }
  func.func @transform_1(%arg0: i32) -> (i32, i32) {
    %c0_i32 = arith.constant 0 : i32
    %c0_i32_0 = arith.constant 0 : i32
    %c0_i32_1 = arith.constant 0 : i32
    return %c0_i32, %c0_i32_0 : i32, i32
  }
  func.func @transform_2(%arg0: i32) -> (i32, i32) {
    %c0_i32 = arith.constant 0 : i32
    %c0_i32_0 = arith.constant 0 : i32
    %c0_i32_1 = arith.constant 0 : i32
    return %c0_i32, %c0_i32_0 : i32, i32
  }
  func.func @transform_3(%arg0: i32) -> (i32, i32) {
    %c0_i32 = arith.constant 0 : i32
    %c0_i32_0 = arith.constant 0 : i32
    %c0_i32_1 = arith.constant 0 : i32
    return %c0_i32, %c0_i32_0 : i32, i32
  }
  func.func @transform_4(%arg0: i32) -> (i32, i32) {
    %c0_i32 = arith.constant 0 : i32
    %c0_i32_0 = arith.constant 0 : i32
    %c0_i32_1 = arith.constant 0 : i32
    return %c0_i32, %c0_i32_0 : i32, i32
  }
  func.func @transform_5(%arg0: i32) -> (i32, i32) {
    %c0_i32 = arith.constant 0 : i32
    %c0_i32_0 = arith.constant 0 : i32
    %c0_i32_1 = arith.constant 0 : i32
    return %c0_i32, %c0_i32_0 : i32, i32
  }
  func.func @transform_6(%arg0: i32) -> (i32, i32) {
    %c0_i32 = arith.constant 0 : i32
    %c0_i32_0 = arith.constant 0 : i32
    %c0_i32_1 = arith.constant 0 : i32
    return %c0_i32, %c0_i32_0 : i32, i32
  }
  func.func @transform_7(%arg0: i32) -> (i32, i32) {
    %c0_i32 = arith.constant 0 : i32
    %c0_i32_0 = arith.constant 0 : i32
    return %arg0, %c0_i32 : i32, i32
  }
}

</mosaic_0001>

<bundles_post_ra>
// kernel: tpu_custom_call.1
= control target key start
LH: loop header
LB: loop body
LE: loop exit
PB: predicated region body
PF: predicated region fallthrough
CT: control target
= control target key end

     0   :  { %12 = vsyncpa [#allocation3], 0  ;;  %s6719_s0 = inlined_call_operand.hbm [shape: bf16[8,1536], index: 0, kind: input, shape index: {}]   ;;  %s6720_s1 = inlined_call_operand.hbm [shape: bf16[1536,512], index: 1, kind: input, shape index: {}]   ;;  %s6721_s2 = inlined_call_operand.hbm [shape: f32[1,512], index: 2, kind: input, shape index: {}]   ;;  %s6722_s3 = inlined_call_operand.hbm [shape: bf16[512,256], index: 3, kind: input, shape index: {}]   ;;  %s6723_s4 = inlined_call_operand.hbm [shape: f32[1,256], index: 4, kind: input, shape index: {}]   ;;  %s6724_s5 = inlined_call_operand.hbm [shape: bf16[256,256], index: 5, kind: input, shape index: {}]   ;;  %s6725_s6 = inlined_call_operand.hbm [shape: f32[1,256], index: 6, kind: input, shape index: {}]   ;;  %s6726_s7 = inlined_call_operand.hbm [shape: f32[8,256], index: 7, kind: output, shape index: {}]  }
   0x1   :  { %13 = vsyncpa [#allocation6], 0 }
   0x2   :  { %14 = vsyncpa [#allocation9], 0 }
   0x3   :  { %15 = vsyncpa [#allocation12], 0  ;;  %s32_s26 = sshll.u32 %s6720_s1, 4  ;;  %s33_s26 = int_to_ptr.hbm [resolvable:$true] %s32_s26 }
   0x4   :  { %16 = vsyncpa [#allocation4], 0  ;;  %s6507_s27 = smov [#allocation5]   ;;  %s56_s8 = sshll.u32 %s6722_s3, 4  ;;  %s57_s8 = int_to_ptr.hbm [resolvable:$true] %s56_s8 }
   0x5   :  { %s34_s28 = sshll.u32 %s6507_s27, 4  ;;  %s6508_s9 = smov 256   ;;  %s35_s28 = int_to_ptr.vmem [resolvable:$true] %s34_s28 }
   0x6   :  { %s6509_s10 = smov 16   ;;  %s6510_s11 = smov [#allocation8]  }
   0x7   :  { %40 = dma.hbm_to_vmem [thread:$0]  %s33_s26, 49152, %s35_s28, [#allocation6], %s6508_s9, %s6508_s9, %s6509_s10  }
   0x8   :  { %s58_s12 = sshll.u32 %s6510_s11, 4  ;;  %s6511_s13 = smov 128   ;;  %s59_s12 = int_to_ptr.vmem [resolvable:$true] %s58_s12 }
   0x9   :  { %s6512_s14 = smov 8   ;;  %s80_s16 = sshll.u32 %s6724_s5, 4  ;;  %s81_s16 = int_to_ptr.hbm [resolvable:$true] %s80_s16 }
   0xa   :  { %64 = dma.hbm_to_vmem [thread:$0]  %s57_s8, 8192, %s59_s12, [#allocation9], %s6511_s13, %s6511_s13, %s6512_s14  }
   0xb   :  { %s6513_s17 = smov [#allocation11]   ;;  %s22_s20 = sshll.u32 %s6719_s0, 4  ;;  %s23_s20 = int_to_ptr.hbm [resolvable:$true] %s22_s20 }
   0xc   :  { %s82_s18 = sshll.u32 %s6513_s17, 4  ;;  %s6514_s21 = smov [#allocation2]   ;;  %s83_s18 = int_to_ptr.vmem [resolvable:$true] %s82_s18 }
   0xd   :  { %88 = dma.hbm_to_vmem [thread:$0]  %s81_s16, 4096, %s83_s18, [#allocation12], %s6511_s13, %s6511_s13, %s6512_s14  }
   0xe   :  { %s24_s22 = sshll.u32 %s6514_s21, 4  ;;  %s46_s25 = sshll.u32 %s6721_s2, 4  ;;  %s25_s22 = int_to_ptr.vmem [resolvable:$true] %s24_s22  ;;  %s47_s25 = int_to_ptr.hbm [resolvable:$true] %s46_s25 }
   0xf   :  { %27 = dma.hbm_to_vmem [thread:$0]  %s23_s20, 768, %s25_s22, [#allocation3]  }
  0x10   :  { %s70_s27 = sshll.u32 %s6723_s4, 4  ;;  %s6515_s28 = smov [#allocation7]   ;;  %s71_s27 = int_to_ptr.hbm [resolvable:$true] %s70_s27 }
  0x11   :  { %s48_s29 = sshll.u32 %s6515_s28, 4  ;;  %s6516_s0 = smov [#allocation10]   ;;  %s49_s29 = int_to_ptr.vmem [resolvable:$true] %s48_s29 }
  0x12   :  { %51 = dma.hbm_to_vmem [thread:$0]  %s47_s25, 64, %s49_s29, [#allocation6]  }
  0x13   :  { %s72_s30 = sshll.u32 %s6516_s0, 4  ;;  %s94_s10 = sshll.u32 %s6725_s6, 4  ;;  %s73_s30 = int_to_ptr.vmem [resolvable:$true] %s72_s30  ;;  %s95_s10 = int_to_ptr.hbm [resolvable:$true] %s94_s10 }
  0x14   :  { %75 = dma.hbm_to_vmem [thread:$0]  %s71_s27, 32, %s73_s30, [#allocation9]  }
  0x15   :  { %s6517_s2 = smov [#allocation13]  }
  0x16   :  { %s96_s11 = sshll.u32 %s6517_s2, 4  ;;  %s97_s11 = int_to_ptr.vmem [resolvable:$true] %s96_s11 }
  0x17   :  { %99 = dma.hbm_to_vmem [thread:$0]  %s95_s10, 32, %s97_s11, [#allocation12]  }
  0x18   :  { %6497 = dma.done.wait [#allocation3], 768  }
  0x19   :  { %6498 = vsyncadd [#allocation3], 4294966528 }
  0x1a   :  { %6499 = dma.done.wait [#allocation6], 49216  }
  0x1b   :  { %6500 = vsyncadd [#allocation6], 4294918080 }
  0x1c   :  { %6501 = dma.done.wait [#allocation9], 8224  }
  0x1d   :  { %6502 = vsyncadd [#allocation9], 4294959072 }
  0x1e   :  { %6503 = dma.done.wait [#allocation12], 4128  }
  0x1f   :  { %6504 = vsyncadd [#allocation12], 4294963168  ;;  %v4006_v0 = vld [vmem:[#allocation5 + $0xe0] sm:$0xf]  ;;  %v5842_v1 = vld [vmem:[#allocation5 + $0xec] sm:$0xf0] }
  0x20   :  { %v4134_v2 = vld [vmem:[#allocation5 + $0x1e0] sm:$0xf]  ;;  %v4007_v3 = vor.u32 %v5842_v1, %v4006_v0  ;;  %v5874_v4 = vld [vmem:[#allocation5 + $0x1ec] sm:$0xf0]  ;;  %s6518_s4 = smov [#allocation14]   ;;  %s3879_s14 = sshll.u32 %s6726_s7, 4  ;;  %s3880_s14 = int_to_ptr.hbm [resolvable:$true] %s3879_s14 }
  0x21   :  { %v4262_v5 = vld [vmem:[#allocation5 + $0x2e0] sm:$0xf]  ;;  %v5906_v6 = vld [vmem:[#allocation5 + $0x2ec] sm:$0xf0]  ;;  %v4135_v7 = vor.u32 %v5874_v4, %v4134_v2  ;;  %s3877_s6 = sshll.u32 %s6518_s4, 4  ;;  %s3878_s6 = int_to_ptr.vmem [resolvable:$true] %s3877_s6 }
  0x22   :  { %v4263_v8 = vor.u32 %v5906_v6, %v4262_v5  ;;  %v4390_v9 = vld [vmem:[#allocation5 + $0x3e0] sm:$0xf]  ;;  %v5938_v10 = vld [vmem:[#allocation5 + $0x3ec] sm:$0xf0]  ;;  %2490 = vmatpush.bf16.msra.mxu0 %v4007_v3 }
  0x23   :  { %v3990_v11 = vld [vmem:[#allocation5 + $0xc0] sm:$0xf]  ;;  %v4391_v12 = vor.u32 %v5938_v10, %v4390_v9  ;;  %v5838_v13 = vld [vmem:[#allocation5 + $0xcc] sm:$0xf0]  ;;  %2503 = vmatpush.bf16.msra.mxu1 %v4135_v7 }
  0x24   :  { %v4118_v14 = vld [vmem:[#allocation5 + $0x1c0] sm:$0xf]  ;;  %v5870_v15 = vld [vmem:[#allocation5 + $0x1cc] sm:$0xf0]  ;;  %2516 = vmatpush.bf16.msra.mxu2 %v4263_v8  ;;  %v3991_v16 = vor.u32 %v5838_v13, %v3990_v11 }
  0x25   :  { %v4119_v17 = vor.u32 %v5870_v15, %v4118_v14  ;;  %v4246_v18 = vld [vmem:[#allocation5 + $0x2c0] sm:$0xf]  ;;  %v5902_v19 = vld [vmem:[#allocation5 + $0x2cc] sm:$0xf0]  ;;  %2529 = vmatpush.bf16.msra.mxu3 %v4391_v12 }
  0x26   :  { %v4374_v20 = vld [vmem:[#allocation5 + $0x3c0] sm:$0xf]  ;;  %v4247_v21 = vor.u32 %v5902_v19, %v4246_v18  ;;  %v5934_v22 = vld [vmem:[#allocation5 + $0x3cc] sm:$0xf0]  ;;  %2491 = vmatpush.bf16.msra.mxu0 %v3991_v16 }
  0x27   :  { %v3974_v23 = vld [vmem:[#allocation5 + $0xa0] sm:$0xf]  ;;  %v5834_v24 = vld [vmem:[#allocation5 + $0xac] sm:$0xf0]  ;;  %v4375_v25 = vor.u32 %v5934_v22, %v4374_v20  ;;  %2504 = vmatpush.bf16.msra.mxu1 %v4119_v17 }
  0x28   :  { %v4102_v26 = vld [vmem:[#allocation5 + $0x1a0] sm:$0xf]  ;;  %v5866_v27 = vld [vmem:[#allocation5 + $0x1ac] sm:$0xf0]  ;;  %v3975_v29 = vor.u32 %v5834_v24, %v3974_v23  ;;  %2517 = vmatpush.bf16.msra.mxu2 %v4247_v21 }
  0x29   :  { %v4230_v28 = vld [vmem:[#allocation5 + $0x2a0] sm:$0xf]  ;;  %v5898_v30 = vld [vmem:[#allocation5 + $0x2ac] sm:$0xf0]  ;;  %v4103_v33 = vor.u32 %v5866_v27, %v4102_v26  ;;  %2530 = vmatpush.bf16.msra.mxu3 %v4375_v25 }
  0x2a   :  { %v4358_v31 = vld [vmem:[#allocation5 + $0x3a0] sm:$0xf]  ;;  %v5930_v32 = vld [vmem:[#allocation5 + $0x3ac] sm:$0xf0]  ;;  %v4231_v34 = vor.u32 %v5898_v30, %v4230_v28  ;;  %2492 = vmatpush.bf16.msra.mxu0 %v3975_v29 }
  0x2b   :  { %v3958_v35 = vld [vmem:[#allocation5 + $0x80] sm:$0xf]  ;;  %v5830_v36 = vld [vmem:[#allocation5 + $0x8c] sm:$0xf0]  ;;  %v4359_v38 = vor.u32 %v5930_v32, %v4358_v31  ;;  %2505 = vmatpush.bf16.msra.mxu1 %v4103_v33 }
  0x2c   :  { %v4086_v37 = vld [vmem:[#allocation5 + $0x180] sm:$0xf]  ;;  %v5862_v39 = vld [vmem:[#allocation5 + $0x18c] sm:$0xf0]  ;;  %v3959_v44 = vor.u32 %v5830_v36, %v3958_v35  ;;  %2518 = vmatpush.bf16.msra.mxu2 %v4231_v34 }
  0x2d   :  { %v4214_v40 = vld [vmem:[#allocation5 + $0x280] sm:$0xf]  ;;  %v5894_v41 = vld [vmem:[#allocation5 + $0x28c] sm:$0xf0]  ;;  %v4087_v45 = vor.u32 %v5862_v39, %v4086_v37  ;;  %2531 = vmatpush.bf16.msra.mxu3 %v4359_v38 }
  0x2e   :  { %v4342_v42 = vld [vmem:[#allocation5 + $0x380] sm:$0xf]  ;;  %v5926_v43 = vld [vmem:[#allocation5 + $0x38c] sm:$0xf0]  ;;  %v4215_v46 = vor.u32 %v5894_v41, %v4214_v40  ;;  %2493 = vmatpush.bf16.msra.mxu0 %v3959_v44 }
  0x2f   :  { %v3942_v47 = vld [vmem:[#allocation5 + $0x60] sm:$0xf]  ;;  %v5826_v48 = vld [vmem:[#allocation5 + $0x6c] sm:$0xf0]  ;;  %v4343_v50 = vor.u32 %v5926_v43, %v4342_v42  ;;  %2506 = vmatpush.bf16.msra.mxu1 %v4087_v45 }
  0x30   :  { %v4070_v49 = vld [vmem:[#allocation5 + $0x160] sm:$0xf]  ;;  %v5858_v51 = vld [vmem:[#allocation5 + $0x16c] sm:$0xf0]  ;;  %v3943_v56 = vor.u32 %v5826_v48, %v3942_v47  ;;  %2519 = vmatpush.bf16.msra.mxu2 %v4215_v46 }
  0x31   :  { %v4198_v52 = vld [vmem:[#allocation5 + $0x260] sm:$0xf]  ;;  %v5890_v53 = vld [vmem:[#allocation5 + $0x26c] sm:$0xf0]  ;;  %v4071_v57 = vor.u32 %v5858_v51, %v4070_v49  ;;  %2532 = vmatpush.bf16.msra.mxu3 %v4343_v50 }
  0x32   :  { %v4326_v54 = vld [vmem:[#allocation5 + $0x360] sm:$0xf]  ;;  %v5922_v55 = vld [vmem:[#allocation5 + $0x36c] sm:$0xf0]  ;;  %v4199_v58 = vor.u32 %v5890_v53, %v4198_v52  ;;  %2494 = vmatpush.bf16.msra.mxu0 %v3943_v56 }
  0x33   :  { %v3926_v59 = vld [vmem:[#allocation5 + $0x40] sm:$0xf]  ;;  %v5822_v60 = vld [vmem:[#allocation5 + $0x4c] sm:$0xf0]  ;;  %v4327_v62 = vor.u32 %v5922_v55, %v4326_v54  ;;  %2507 = vmatpush.bf16.msra.mxu1 %v4071_v57 }
  0x34   :  { %v4054_v61 = vld [vmem:[#allocation5 + $0x140] sm:$0xf]  ;;  %v5854_v63 = vld [vmem:[#allocation5 + $0x14c] sm:$0xf0]  ;;  %v3927_v4 = vor.u32 %v5822_v60, %v3926_v59  ;;  %2520 = vmatpush.bf16.msra.mxu2 %v4199_v58 }
  0x35   :  { %v4182_v0 = vld [vmem:[#allocation5 + $0x240] sm:$0xf]  ;;  %v5886_v1 = vld [vmem:[#allocation5 + $0x24c] sm:$0xf0]  ;;  %v4055_v5 = vor.u32 %v5854_v63, %v4054_v61  ;;  %2533 = vmatpush.bf16.msra.mxu3 %v4327_v62 }
  0x36   :  { %v4310_v2 = vld [vmem:[#allocation5 + $0x340] sm:$0xf]  ;;  %v5918_v3 = vld [vmem:[#allocation5 + $0x34c] sm:$0xf0]  ;;  %v4183_v6 = vor.u32 %v5886_v1, %v4182_v0  ;;  %2495 = vmatpush.bf16.msra.mxu0 %v3927_v4 }
  0x37   :  { %v3910_v7 = vld [vmem:[#allocation5 + $0x20] sm:$0xf]  ;;  %v5818_v8 = vld [vmem:[#allocation5 + $0x2c] sm:$0xf0]  ;;  %v4311_v10 = vor.u32 %v5918_v3, %v4310_v2  ;;  %2508 = vmatpush.bf16.msra.mxu1 %v4055_v5  ;;  %v129_v2 = vld [vmem:[#allocation2 + $0x8] sm:$0xff] }
  0x38   :  { %v4038_v9 = vld [vmem:[#allocation5 + $0x120] sm:$0xf]  ;;  %v5850_v11 = vld [vmem:[#allocation5 + $0x12c] sm:$0xf0]  ;;  %v3911_v16 = vor.u32 %v5818_v8, %v3910_v7  ;;  %2521 = vmatpush.bf16.msra.mxu2 %v4183_v6  ;;  %v536_v8 = vunpack.c.l.b16 %v129_v2 }
  0x39   :  { %v4166_v12 = vld [vmem:[#allocation5 + $0x220] sm:$0xf]  ;;  %v5882_v13 = vld [vmem:[#allocation5 + $0x22c] sm:$0xf0]  ;;  %v4039_v19 = vor.u32 %v5850_v11, %v4038_v9  ;;  %2534 = vmatpush.bf16.msra.mxu3 %v4311_v10  ;;  %v537_v10 = vunpack.c.h.b16 %v129_v2 }
  0x3a   :  { %v4294_v14 = vld [vmem:[#allocation5 + $0x320] sm:$0xf]  ;;  %v5914_v15 = vld [vmem:[#allocation5 + $0x32c] sm:$0xf0]  ;;  %v4167_v20 = vor.u32 %v5882_v13, %v4166_v12  ;;  %2496 = vmatpush.bf16.msra.mxu0 %v3911_v16 }
  0x3b   :  { %v3894_v17 = vld [vmem:[#allocation5] sm:$0xf]  ;;  %v5814_v18 = vld [vmem:[#allocation5 + $0xc] sm:$0xf0]  ;;  %v4295_v24 = vor.u32 %v5914_v15, %v4294_v14  ;;  %2509 = vmatpush.bf16.msra.mxu1 %v4039_v19 }
  0x3c   :  { %v4022_v21 = vld [vmem:[#allocation5 + $0x100] sm:$0xf]  ;;  %v5846_v22 = vld [vmem:[#allocation5 + $0x10c] sm:$0xf0]  ;;  %v3895_v31 = vor.u32 %v5814_v18, %v3894_v17  ;;  %2522 = vmatpush.bf16.msra.mxu2 %v4167_v20  ;;  %v6580_v18 = vpack.c.b16 %v536_v8, %v536_v8  ;;  %v6584_v20 = vpack.c.b16 %v537_v10, %v537_v10 }
  0x3d   :  { %v4150_v23 = vld [vmem:[#allocation5 + $0x200] sm:$0xf]  ;;  %v5878_v25 = vld [vmem:[#allocation5 + $0x20c] sm:$0xf0]  ;;  %v4023_v35 = vor.u32 %v5846_v22, %v4022_v21  ;;  %2535 = vmatpush.bf16.msra.mxu3 %v4295_v24 }
  0x3e   :  { %v4278_v26 = vld [vmem:[#allocation5 + $0x300] sm:$0xf]  ;;  %v5910_v27 = vld [vmem:[#allocation5 + $0x30c] sm:$0xf0]  ;;  %v4151_v36 = vor.u32 %v5878_v25, %v4150_v23  ;;  %2497 = vmatpush.bf16.msra.mxu0 %v3895_v31 }
  0x3f   :  { %v4518_v28 = vld [vmem:[#allocation5 + $0x4e0] sm:$0xf]  ;;  %v5970_v29 = vld [vmem:[#allocation5 + $0x4ec] sm:$0xf0]  ;;  %v4279_v39 = vor.u32 %v5910_v27, %v4278_v26  ;;  %2510 = vmatpush.bf16.msra.mxu1 %v4023_v35 }
  0x40   :  { %v4646_v30 = vld [vmem:[#allocation5 + $0x5e0] sm:$0xf]  ;;  %v6002_v32 = vld [vmem:[#allocation5 + $0x5ec] sm:$0xf0]  ;;  %v4519_v40 = vor.u32 %v5970_v29, %v4518_v28  ;;  %2523 = vmatpush.bf16.msra.mxu2 %v4151_v36 }
  0x41   :  { %v4774_v33 = vld [vmem:[#allocation5 + $0x6e0] sm:$0xf]  ;;  %v6034_v34 = vld [vmem:[#allocation5 + $0x6ec] sm:$0xf0]  ;;  %v4647_v41 = vor.u32 %v6002_v32, %v4646_v30  ;;  %2536 = vmatpush.bf16.msra.mxu3 %v4279_v39 }
  0x42   :  { %v4902_v37 = vld [vmem:[#allocation5 + $0x7e0] sm:$0xf]  ;;  %v6066_v38 = vld [vmem:[#allocation5 + $0x7ec] sm:$0xf0]  ;;  %v4775_v42 = vor.u32 %v6034_v34, %v4774_v33  ;;  %2542 = vmatpush.bf16.msrb.mxu0 %v4519_v40 }
  0x43   :  { %v4502_v43 = vld [vmem:[#allocation5 + $0x4c0] sm:$0xf]  ;;  %v5966_v44 = vld [vmem:[#allocation5 + $0x4cc] sm:$0xf0]  ;;  %v4903_v46 = vor.u32 %v6066_v38, %v4902_v37  ;;  %2555 = vmatpush.bf16.msrb.mxu1 %v4647_v41  ;;  %2524 = vmatmul.bf16.vlgmr.msra.gmra.mxu2 %v6580_v18 }
  0x44   :  { %v4630_v45 = vld [vmem:[#allocation5 + $0x5c0] sm:$0xf]  ;;  %v5998_v47 = vld [vmem:[#allocation5 + $0x5cc] sm:$0xf0]  ;;  %v4503_v52 = vor.u32 %v5966_v44, %v4502_v43  ;;  %2568 = vmatpush.bf16.msrb.mxu2 %v4775_v42  ;;  %2537 = vmatmul.bf16.vlgmr.msra.gmra.mxu3 %v6584_v20 }
  0x45   :  { %v4758_v48 = vld [vmem:[#allocation5 + $0x6c0] sm:$0xf]  ;;  %v6030_v49 = vld [vmem:[#allocation5 + $0x6cc] sm:$0xf0]  ;;  %v4631_v54 = vor.u32 %v5998_v47, %v4630_v45  ;;  %2581 = vmatpush.bf16.msrb.mxu3 %v4903_v46 }
  0x46   :  { %v4886_v50 = vld [vmem:[#allocation5 + $0x7c0] sm:$0xf]  ;;  %v6062_v51 = vld [vmem:[#allocation5 + $0x7cc] sm:$0xf0]  ;;  %v4759_v55 = vor.u32 %v6030_v49, %v4758_v48  ;;  %2543 = vmatpush.bf16.msrb.mxu0 %v4503_v52 }
  0x47   :  { %v4486_v53 = vld [vmem:[#allocation5 + $0x4a0] sm:$0xf]  ;;  %v5962_v56 = vld [vmem:[#allocation5 + $0x4ac] sm:$0xf0]  ;;  %v4887_v59 = vor.u32 %v6062_v51, %v4886_v50  ;;  %2556 = vmatpush.bf16.msrb.mxu1 %v4631_v54 }
  0x48   :  { %v4614_v57 = vld [vmem:[#allocation5 + $0x5a0] sm:$0xf]  ;;  %v5994_v58 = vld [vmem:[#allocation5 + $0x5ac] sm:$0xf0]  ;;  %v4487_v0 = vor.u32 %v5962_v56, %v4486_v53  ;;  %2569 = vmatpush.bf16.msrb.mxu2 %v4759_v55 }
  0x49   :  { %v4742_v60 = vld [vmem:[#allocation5 + $0x6a0] sm:$0xf]  ;;  %v6026_v61 = vld [vmem:[#allocation5 + $0x6ac] sm:$0xf0]  ;;  %v4615_v1 = vor.u32 %v5994_v58, %v4614_v57  ;;  %2582 = vmatpush.bf16.msrb.mxu3 %v4887_v59 }
  0x4a   :  { %v4870_v62 = vld [vmem:[#allocation5 + $0x7a0] sm:$0xf]  ;;  %v6058_v63 = vld [vmem:[#allocation5 + $0x7ac] sm:$0xf0]  ;;  %v4743_v4 = vor.u32 %v6026_v61, %v4742_v60  ;;  %2544 = vmatpush.bf16.msrb.mxu0 %v4487_v0 }
  0x4b   :  { %v128_v3 = vld [vmem:[#allocation2] sm:$0xff]  ;;  %v4470_v5 = vld [vmem:[#allocation5 + $0x480] sm:$0xf]  ;;  %v4871_v11 = vor.u32 %v6058_v63, %v4870_v62  ;;  %2557 = vmatpush.bf16.msrb.mxu1 %v4615_v1 }
  0x4c   :  { %v5958_v6 = vld [vmem:[#allocation5 + $0x48c] sm:$0xf0]  ;;  %v4598_v7 = vld [vmem:[#allocation5 + $0x580] sm:$0xf]  ;;  %v534_v9 = vunpack.c.l.b16 %v128_v3  ;;  %v535_v15 = vunpack.c.h.b16 %v128_v3  ;;  %2570 = vmatpush.bf16.msrb.mxu2 %v4743_v4  ;;  %v131_v3 = vld [vmem:[#allocation2 + $0x18] sm:$0xff] }
  0x4d   :  { %v5990_v12 = vld [vmem:[#allocation5 + $0x58c] sm:$0xf0]  ;;  %v4726_v13 = vld [vmem:[#allocation5 + $0x680] sm:$0xf]  ;;  %v4471_v21 = vor.u32 %v5958_v6, %v4470_v5  ;;  %2583 = vmatpush.bf16.msrb.mxu3 %v4871_v11 }
  0x4e   :  { %v6022_v14 = vld [vmem:[#allocation5 + $0x68c] sm:$0xf0]  ;;  %v4854_v16 = vld [vmem:[#allocation5 + $0x780] sm:$0xf]  ;;  %v6582_v19 = vpack.c.b16 %v534_v9, %v534_v9  ;;  %v6586_v22 = vpack.c.b16 %v535_v15, %v535_v15  ;;  %v4599_v23 = vor.u32 %v5990_v12, %v4598_v7  ;;  %v540_v15 = vunpack.c.l.b16 %v131_v3 }
  0x4f   :  { %v6054_v17 = vld [vmem:[#allocation5 + $0x78c] sm:$0xf0]  ;;  %v4727_v24 = vor.u32 %v6022_v14, %v4726_v13  ;;  %v4454_v25 = vld [vmem:[#allocation5 + $0x460] sm:$0xf]  ;;  %2545 = vmatpush.bf16.msrb.mxu0 %v4471_v21 }
  0x50   :  { %v5954_v26 = vld [vmem:[#allocation5 + $0x46c] sm:$0xf0]  ;;  %v4582_v27 = vld [vmem:[#allocation5 + $0x560] sm:$0xf]  ;;  %v4855_v28 = vor.u32 %v6054_v17, %v4854_v16  ;;  %2498 = vmatmul.bf16.vlgmr.msra.gmra.mxu0 %v6582_v19  ;;  %2511 = vmatmul.bf16.vlgmr.msra.gmra.mxu1 %v6586_v22 }
  0x51   :  { %v5986_v29 = vld [vmem:[#allocation5 + $0x56c] sm:$0xf0]  ;;  %v4710_v30 = vld [vmem:[#allocation5 + $0x660] sm:$0xf]  ;;  %v4455_v34 = vor.u32 %v5954_v26, %v4454_v25  ;;  %2558 = vmatpush.bf16.msrb.mxu1 %v4599_v23  ;;  %2571 = vmatpush.bf16.msrb.mxu2 %v4727_v24  ;;  %v541_v25 = vunpack.c.h.b16 %v131_v3 }
  0x52   :  { %v6018_v31 = vld [vmem:[#allocation5 + $0x66c] sm:$0xf0]  ;;  %v4838_v32 = vld [vmem:[#allocation5 + $0x760] sm:$0xf]  ;;  %v4583_v35 = vor.u32 %v5986_v29, %v4582_v27  ;;  %2584 = vmatpush.bf16.msrb.mxu3 %v4855_v28 }
  0x53   :  { %v6050_v33 = vld [vmem:[#allocation5 + $0x76c] sm:$0xf0]  ;;  %v4711_v36 = vor.u32 %v6018_v31, %v4710_v30  ;;  %v4438_v37 = vld [vmem:[#allocation5 + $0x440] sm:$0xf]  ;;  %2546 = vmatpush.bf16.msrb.mxu0 %v4455_v34 }
  0x54   :  { %v5950_v38 = vld [vmem:[#allocation5 + $0x44c] sm:$0xf0]  ;;  %v4566_v39 = vld [vmem:[#allocation5 + $0x540] sm:$0xf]  ;;  %v4839_v40 = vor.u32 %v6050_v33, %v4838_v32 }
  0x55   :  { %v5982_v41 = vld [vmem:[#allocation5 + $0x54c] sm:$0xf0]  ;;  %v4694_v42 = vld [vmem:[#allocation5 + $0x640] sm:$0xf]  ;;  %v4439_v46 = vor.u32 %v5950_v38, %v4438_v37  ;;  %2559 = vmatpush.bf16.msrb.mxu1 %v4583_v35  ;;  %2572 = vmatpush.bf16.msrb.mxu2 %v4711_v36  ;;  %v6592_v38 = vpack.c.b16 %v540_v15, %v540_v15 }
  0x56   :  { %v6014_v43 = vld [vmem:[#allocation5 + $0x64c] sm:$0xf0]  ;;  %v4822_v44 = vld [vmem:[#allocation5 + $0x740] sm:$0xf]  ;;  %v4567_v47 = vor.u32 %v5982_v41, %v4566_v39  ;;  %2585 = vmatpush.bf16.msrb.mxu3 %v4839_v40 }
  0x57   :  { %v6046_v45 = vld [vmem:[#allocation5 + $0x74c] sm:$0xf0]  ;;  %v4695_v48 = vor.u32 %v6014_v43, %v4694_v42  ;;  %v4422_v49 = vld [vmem:[#allocation5 + $0x420] sm:$0xf]  ;;  %2547 = vmatpush.bf16.msrb.mxu0 %v4439_v46  ;;  %v6596_v42 = vpack.c.b16 %v541_v25, %v541_v25 }
  0x58   :  { %v5946_v50 = vld [vmem:[#allocation5 + $0x42c] sm:$0xf0]  ;;  %v4550_v51 = vld [vmem:[#allocation5 + $0x520] sm:$0xf]  ;;  %v4823_v52 = vor.u32 %v6046_v45, %v4822_v44 }
  0x59   :  { %v5978_v53 = vld [vmem:[#allocation5 + $0x52c] sm:$0xf0]  ;;  %v4678_v54 = vld [vmem:[#allocation5 + $0x620] sm:$0xf]  ;;  %v4423_v59 = vor.u32 %v5946_v50, %v4422_v49  ;;  %2560 = vmatpush.bf16.msrb.mxu1 %v4567_v47  ;;  %2573 = vmatpush.bf16.msrb.mxu2 %v4695_v48 }
  0x5a   :  { %v6010_v55 = vld [vmem:[#allocation5 + $0x62c] sm:$0xf0]  ;;  %v4806_v56 = vld [vmem:[#allocation5 + $0x720] sm:$0xf]  ;;  %v4551_v63 = vor.u32 %v5978_v53, %v4550_v51  ;;  %2586 = vmatpush.bf16.msrb.mxu3 %v4823_v52 }
  0x5b   :  { %v6042_v57 = vld [vmem:[#allocation5 + $0x72c] sm:$0xf0]  ;;  %v4406_v58 = vld [vmem:[#allocation5 + $0x400] sm:$0xf]  ;;  %v4679_v0 = vor.u32 %v6010_v55, %v4678_v54  ;;  %2548 = vmatpush.bf16.msrb.mxu0 %v4423_v59 }
  0x5c   :  { %v5942_v60 = vld [vmem:[#allocation5 + $0x40c] sm:$0xf0]  ;;  %v4534_v61 = vld [vmem:[#allocation5 + $0x500] sm:$0xf]  ;;  %v4807_v4 = vor.u32 %v6042_v57, %v4806_v56 }
  0x5d   :  { %v5974_v62 = vld [vmem:[#allocation5 + $0x50c] sm:$0xf0]  ;;  %v4662_v1 = vld [vmem:[#allocation5 + $0x600] sm:$0xf]  ;;  %v4407_v11 = vor.u32 %v5942_v60, %v4406_v58  ;;  %2561 = vmatpush.bf16.msrb.mxu1 %v4551_v63  ;;  %2574 = vmatpush.bf16.msrb.mxu2 %v4679_v0 }
  0x5e   :  { %v6006_v2 = vld [vmem:[#allocation5 + $0x60c] sm:$0xf0]  ;;  %v4790_v5 = vld [vmem:[#allocation5 + $0x700] sm:$0xf]  ;;  %v4535_v16 = vor.u32 %v5974_v62, %v4534_v61  ;;  %2587 = vmatpush.bf16.msrb.mxu3 %v4807_v4 }
  0x5f   :  { %v6038_v6 = vld [vmem:[#allocation5 + $0x70c] sm:$0xf0]  ;;  %v130_v7 = vld [vmem:[#allocation2 + $0x10] sm:$0xff]  ;;  %v4663_v17 = vor.u32 %v6006_v2, %v4662_v1  ;;  %2549 = vmatpush.bf16.msrb.mxu0 %v4407_v11 }
  0x60   :  { %v5030_v8 = vld [vmem:[#allocation5 + $0x8e0] sm:$0xf]  ;;  %v6098_v9 = vld [vmem:[#allocation5 + $0x8ec] sm:$0xf0]  ;;  %v538_v24 = vunpack.c.l.b16 %v130_v7  ;;  %v4791_v26 = vor.u32 %v6038_v6, %v4790_v5  ;;  %v539_v28 = vunpack.c.h.b16 %v130_v7 }
  0x61   :  { %v5158_v10 = vld [vmem:[#allocation5 + $0x9e0] sm:$0xf]  ;;  %v6130_v12 = vld [vmem:[#allocation5 + $0x9ec] sm:$0xf0]  ;;  %v5031_v27 = vor.u32 %v6098_v9, %v5030_v8  ;;  %2562 = vmatpush.bf16.msrb.mxu1 %v4535_v16  ;;  %2575 = vmatpush.bf16.msrb.mxu2 %v4663_v17 }
  0x62   :  { %v5286_v13 = vld [vmem:[#allocation5 + $0xae0] sm:$0xf]  ;;  %v6162_v14 = vld [vmem:[#allocation5 + $0xaec] sm:$0xf0]  ;;  %v5159_v29 = vor.u32 %v6130_v12, %v5158_v10  ;;  %v6594_v41 = vpack.c.b16 %v538_v24, %v538_v24  ;;  %2588 = vmatpush.bf16.msrb.mxu3 %v4791_v26  ;;  %v6598_v44 = vpack.c.b16 %v539_v28, %v539_v28 }
  0x63   :  { %v5414_v21 = vld [vmem:[#allocation5 + $0xbe0] sm:$0xf]  ;;  %v6194_v23 = vld [vmem:[#allocation5 + $0xbec] sm:$0xf0]  ;;  %v5287_v30 = vor.u32 %v6162_v14, %v5286_v13  ;;  %2594 = vmatpush.bf16.msra.mxu0 %v5031_v27 }
  0x64   :  { %v5014_v31 = vld [vmem:[#allocation5 + $0x8c0] sm:$0xf]  ;;  %v6094_v32 = vld [vmem:[#allocation5 + $0x8cc] sm:$0xf0]  ;;  %v5415_v34 = vor.u32 %v6194_v23, %v5414_v21  ;;  %2576 = vmatmul.bf16.vlgmr.msrb.gmra.mxu2 %v6592_v38  ;;  %2550 = vmatmul.bf16.vlgmr.msrb.gmra.mxu0 %v6594_v41 }
  0x65   :  { %v5142_v33 = vld [vmem:[#allocation5 + $0x9c0] sm:$0xf]  ;;  %v6126_v35 = vld [vmem:[#allocation5 + $0x9cc] sm:$0xf0]  ;;  %v5015_v43 = vor.u32 %v6094_v32, %v5014_v31  ;;  %2607 = vmatpush.bf16.msra.mxu1 %v5159_v29  ;;  %2620 = vmatpush.bf16.msra.mxu2 %v5287_v30 }
  0x66   :  { %v5270_v36 = vld [vmem:[#allocation5 + $0xac0] sm:$0xf]  ;;  %v6158_v37 = vld [vmem:[#allocation5 + $0xacc] sm:$0xf0]  ;;  %v5143_v45 = vor.u32 %v6126_v35, %v5142_v33  ;;  %2633 = vmatpush.bf16.msra.mxu3 %v5415_v34  ;;  %2563 = vmatmul.bf16.vlgmr.msrb.gmra.mxu1 %v6598_v44 }
  0x67   :  { %v5398_v39 = vld [vmem:[#allocation5 + $0xbc0] sm:$0xf]  ;;  %v6190_v40 = vld [vmem:[#allocation5 + $0xbcc] sm:$0xf0]  ;;  %v5271_v46 = vor.u32 %v6158_v37, %v5270_v36  ;;  %2589 = vmatmul.bf16.vlgmr.msrb.gmra.mxu3 %v6596_v42  ;;  %2595 = vmatpush.bf16.msra.mxu0 %v5015_v43 }
  0x68   :  { %v4998_v47 = vld [vmem:[#allocation5 + $0x8a0] sm:$0xf]  ;;  %v6090_v48 = vld [vmem:[#allocation5 + $0x8ac] sm:$0xf0]  ;;  %v5399_v50 = vor.u32 %v6190_v40, %v5398_v39 }
  0x69   :  { %v5126_v49 = vld [vmem:[#allocation5 + $0x9a0] sm:$0xf]  ;;  %v6122_v51 = vld [vmem:[#allocation5 + $0x9ac] sm:$0xf0]  ;;  %v4999_v56 = vor.u32 %v6090_v48, %v4998_v47  ;;  %2608 = vmatpush.bf16.msra.mxu1 %v5143_v45  ;;  %2621 = vmatpush.bf16.msra.mxu2 %v5271_v46 }
  0x6a   :  { %v5254_v52 = vld [vmem:[#allocation5 + $0xaa0] sm:$0xf]  ;;  %v6154_v53 = vld [vmem:[#allocation5 + $0xaac] sm:$0xf0]  ;;  %v5127_v57 = vor.u32 %v6122_v51, %v5126_v49  ;;  %2634 = vmatpush.bf16.msra.mxu3 %v5399_v50 }
  0x6b   :  { %v5382_v54 = vld [vmem:[#allocation5 + $0xba0] sm:$0xf]  ;;  %v6186_v55 = vld [vmem:[#allocation5 + $0xbac] sm:$0xf0]  ;;  %v5255_v58 = vor.u32 %v6154_v53, %v5254_v52  ;;  %2596 = vmatpush.bf16.msra.mxu0 %v4999_v56 }
  0x6c   :  { %v4982_v59 = vld [vmem:[#allocation5 + $0x880] sm:$0xf]  ;;  %v6086_v60 = vld [vmem:[#allocation5 + $0x88c] sm:$0xf0]  ;;  %v5383_v62 = vor.u32 %v6186_v55, %v5382_v54 }
  0x6d   :  { %v5110_v61 = vld [vmem:[#allocation5 + $0x980] sm:$0xf]  ;;  %v6118_v63 = vld [vmem:[#allocation5 + $0x98c] sm:$0xf0]  ;;  %v4983_v4 = vor.u32 %v6086_v60, %v4982_v59  ;;  %2609 = vmatpush.bf16.msra.mxu1 %v5127_v57  ;;  %2622 = vmatpush.bf16.msra.mxu2 %v5255_v58 }
  0x6e   :  { %v5238_v0 = vld [vmem:[#allocation5 + $0xa80] sm:$0xf]  ;;  %v6150_v1 = vld [vmem:[#allocation5 + $0xa8c] sm:$0xf0]  ;;  %v5111_v5 = vor.u32 %v6118_v63, %v5110_v61  ;;  %2635 = vmatpush.bf16.msra.mxu3 %v5383_v62  ;;  %v133_v61 = vld [vmem:[#allocation2 + $0x28] sm:$0xff] }
  0x6f   :  { %v5366_v2 = vld [vmem:[#allocation5 + $0xb80] sm:$0xf]  ;;  %v6182_v3 = vld [vmem:[#allocation5 + $0xb8c] sm:$0xf0]  ;;  %v5239_v6 = vor.u32 %v6150_v1, %v5238_v0  ;;  %2597 = vmatpush.bf16.msra.mxu0 %v4983_v4  ;;  %v5840_v62 = vld [vmem:[#allocation5 + $0xe4] sm:$0xf] }
  0x70   :  { %v4966_v7 = vld [vmem:[#allocation5 + $0x860] sm:$0xf]  ;;  %v6082_v8 = vld [vmem:[#allocation5 + $0x86c] sm:$0xf0]  ;;  %v5367_v10 = vor.u32 %v6182_v3, %v5366_v2  ;;  %v4008_v63 = vld [vmem:[#allocation5 + $0xf0] sm:$0xf0] }
  0x71   :  { %v5094_v9 = vld [vmem:[#allocation5 + $0x960] sm:$0xf]  ;;  %v6114_v11 = vld [vmem:[#allocation5 + $0x96c] sm:$0xf0]  ;;  %v4967_v16 = vor.u32 %v6082_v8, %v4966_v7  ;;  %2610 = vmatpush.bf16.msra.mxu1 %v5111_v5  ;;  %2623 = vmatpush.bf16.msra.mxu2 %v5239_v6  ;;  %v5872_v0 = vld [vmem:[#allocation5 + $0x1e4] sm:$0xf] }
  0x72   :  { %v5222_v12 = vld [vmem:[#allocation5 + $0xa60] sm:$0xf]  ;;  %v6146_v13 = vld [vmem:[#allocation5 + $0xa6c] sm:$0xf0]  ;;  %v5095_v17 = vor.u32 %v6114_v11, %v5094_v9  ;;  %2636 = vmatpush.bf16.msra.mxu3 %v5367_v10  ;;  %v4136_v2 = vld [vmem:[#allocation5 + $0x1f0] sm:$0xf0]  ;;  %v544_v10 = vunpack.c.l.b16 %v133_v61 }
  0x73   :  { %v5350_v14 = vld [vmem:[#allocation5 + $0xb60] sm:$0xf]  ;;  %v6178_v15 = vld [vmem:[#allocation5 + $0xb6c] sm:$0xf0]  ;;  %v5223_v21 = vor.u32 %v6146_v13, %v5222_v12  ;;  %2598 = vmatpush.bf16.msra.mxu0 %v4967_v16  ;;  %v5904_v3 = vld [vmem:[#allocation5 + $0x2e4] sm:$0xf]  ;;  %v4011_v13 = vor.u32 %v5840_v62, %v4008_v63 }
  0x74   :  { %v4950_v23 = vld [vmem:[#allocation5 + $0x840] sm:$0xf]  ;;  %v6078_v24 = vld [vmem:[#allocation5 + $0x84c] sm:$0xf0]  ;;  %v5351_v26 = vor.u32 %v6178_v15, %v5350_v14  ;;  %v4264_v4 = vld [vmem:[#allocation5 + $0x2f0] sm:$0xf0]  ;;  %v545_v14 = vunpack.c.h.b16 %v133_v61  ;;  %v4139_v15 = vor.u32 %v5872_v0, %v4136_v2 }
  0x75   :  { %v5078_v25 = vld [vmem:[#allocation5 + $0x940] sm:$0xf]  ;;  %v6110_v27 = vld [vmem:[#allocation5 + $0x94c] sm:$0xf0]  ;;  %v4951_v32 = vor.u32 %v6078_v24, %v4950_v23  ;;  %2611 = vmatpush.bf16.msra.mxu1 %v5095_v17  ;;  %2624 = vmatpush.bf16.msra.mxu2 %v5223_v21  ;;  %v5936_v8 = vld [vmem:[#allocation5 + $0x3e4] sm:$0xf]  ;;  %v4267_v16 = vor.u32 %v5904_v3, %v4264_v4 }
  0x76   :  { %v5206_v28 = vld [vmem:[#allocation5 + $0xa40] sm:$0xf]  ;;  %v6142_v29 = vld [vmem:[#allocation5 + $0xa4c] sm:$0xf0]  ;;  %v5079_v33 = vor.u32 %v6110_v27, %v5078_v25  ;;  %2637 = vmatpush.bf16.msra.mxu3 %v5351_v26  ;;  %v4392_v9 = vld [vmem:[#allocation5 + $0x3f0] sm:$0xf0] }
  0x77   :  { %v5334_v30 = vld [vmem:[#allocation5 + $0xb40] sm:$0xf]  ;;  %v6174_v31 = vld [vmem:[#allocation5 + $0xb4c] sm:$0xf0]  ;;  %v5207_v34 = vor.u32 %v6142_v29, %v5206_v28  ;;  %2599 = vmatpush.bf16.msra.mxu0 %v4951_v32  ;;  %v5836_v17 = vld [vmem:[#allocation5 + $0xc4] sm:$0xf]  ;;  %v4395_v24 = vor.u32 %v5936_v8, %v4392_v9  ;;  %v6606_v29 = vpack.c.b16 %v544_v10, %v544_v10 }
  0x78   :  { %v4934_v35 = vld [vmem:[#allocation5 + $0x820] sm:$0xf]  ;;  %v6074_v36 = vld [vmem:[#allocation5 + $0x82c] sm:$0xf0]  ;;  %v5335_v39 = vor.u32 %v6174_v31, %v5334_v30  ;;  %v3992_v21 = vld [vmem:[#allocation5 + $0xd0] sm:$0xf0] }
  0x79   :  { %v5062_v37 = vld [vmem:[#allocation5 + $0x920] sm:$0xf]  ;;  %v6106_v40 = vld [vmem:[#allocation5 + $0x92c] sm:$0xf0]  ;;  %v4935_v49 = vor.u32 %v6074_v36, %v4934_v35  ;;  %2612 = vmatpush.bf16.msra.mxu1 %v5079_v33  ;;  %2625 = vmatpush.bf16.msra.mxu2 %v5207_v34  ;;  %v5868_v23 = vld [vmem:[#allocation5 + $0x1c4] sm:$0xf]  ;;  %v6610_v33 = vpack.c.b16 %v545_v14, %v545_v14  ;;  %v3995_v34 = vor.u32 %v5836_v17, %v3992_v21 }
  0x7a   :  { %v5190_v43 = vld [vmem:[#allocation5 + $0xa20] sm:$0xf]  ;;  %v6138_v45 = vld [vmem:[#allocation5 + $0xa2c] sm:$0xf0]  ;;  %v5063_v53 = vor.u32 %v6106_v40, %v5062_v37  ;;  %2638 = vmatpush.bf16.msra.mxu3 %v5335_v39  ;;  %v4120_v26 = vld [vmem:[#allocation5 + $0x1d0] sm:$0xf0] }
  0x7b   :  { %v5318_v46 = vld [vmem:[#allocation5 + $0xb20] sm:$0xf]  ;;  %v6170_v47 = vld [vmem:[#allocation5 + $0xb2c] sm:$0xf0]  ;;  %v5191_v54 = vor.u32 %v6138_v45, %v5190_v43  ;;  %2600 = vmatpush.bf16.msra.mxu0 %v4935_v49  ;;  %v5900_v27 = vld [vmem:[#allocation5 + $0x2c4] sm:$0xf]  ;;  %v4123_v35 = vor.u32 %v5868_v23, %v4120_v26 }
  0x7c   :  { %v4918_v48 = vld [vmem:[#allocation5 + $0x800] sm:$0xf]  ;;  %v6070_v50 = vld [vmem:[#allocation5 + $0x80c] sm:$0xf0]  ;;  %v5319_v58 = vor.u32 %v6170_v47, %v5318_v46  ;;  %v4248_v28 = vld [vmem:[#allocation5 + $0x2d0] sm:$0xf0] }
  0x7d   :  { %v5046_v51 = vld [vmem:[#allocation5 + $0x900] sm:$0xf]  ;;  %v6102_v52 = vld [vmem:[#allocation5 + $0x90c] sm:$0xf0]  ;;  %v4919_v1 = vor.u32 %v6070_v50, %v4918_v48  ;;  %2613 = vmatpush.bf16.msra.mxu1 %v5063_v53  ;;  %2626 = vmatpush.bf16.msra.mxu2 %v5191_v54  ;;  %v5932_v31 = vld [vmem:[#allocation5 + $0x3c4] sm:$0xf]  ;;  %v4251_v36 = vor.u32 %v5900_v27, %v4248_v28 }
  0x7e   :  { %v5174_v55 = vld [vmem:[#allocation5 + $0xa00] sm:$0xf]  ;;  %v6134_v56 = vld [vmem:[#allocation5 + $0xa0c] sm:$0xf0]  ;;  %v5047_v6 = vor.u32 %v6102_v52, %v5046_v51  ;;  %2639 = vmatpush.bf16.msra.mxu3 %v5319_v58  ;;  %v4376_v32 = vld [vmem:[#allocation5 + $0x3d0] sm:$0xf0] }
  0x7f   :  { %v132_v57 = vld [vmem:[#allocation2 + $0x20] sm:$0xff]  ;;  %v5302_v59 = vld [vmem:[#allocation5 + $0xb00] sm:$0xf]  ;;  %v5175_v7 = vor.u32 %v6134_v56, %v5174_v55  ;;  %2601 = vmatpush.bf16.msra.mxu0 %v4919_v1  ;;  %v5832_v37 = vld [vmem:[#allocation5 + $0xa4] sm:$0xf]  ;;  %v4379_v43 = vor.u32 %v5932_v31, %v4376_v32 }
  0x80   :  { %v6166_v60 = vld [vmem:[#allocation5 + $0xb0c] sm:$0xf0]  ;;  %v542_v5 = vunpack.c.l.b16 %v132_v57  ;;  %v543_v11 = vunpack.c.h.b16 %v132_v57  ;;  %v3976_v39 = vld [vmem:[#allocation5 + $0xb0] sm:$0xf0]  ;;  %v5864_v40 = vld [vmem:[#allocation5 + $0x1a4] sm:$0xf] }
  0x81   :  { %v5303_v12 = vor.u32 %v6166_v60, %v5302_v59  ;;  %2614 = vmatpush.bf16.msra.mxu1 %v5047_v6  ;;  %2627 = vmatpush.bf16.msra.mxu2 %v5175_v7  ;;  %v4104_v45 = vld [vmem:[#allocation5 + $0x1b0] sm:$0xf0]  ;;  %v5896_v46 = vld [vmem:[#allocation5 + $0x2a4] sm:$0xf]  ;;  %v3979_v50 = vor.u32 %v5832_v37, %v3976_v39 }
  0x82   :  { %v6604_v25 = vpack.c.b16 %v542_v5, %v542_v5  ;;  %v6608_v30 = vpack.c.b16 %v543_v11, %v543_v11  ;;  %v4232_v47 = vld [vmem:[#allocation5 + $0x2b0] sm:$0xf0]  ;;  %v5928_v48 = vld [vmem:[#allocation5 + $0x3a4] sm:$0xf]  ;;  %v4107_v51 = vor.u32 %v5864_v40, %v4104_v45 }
  0x83   :  { %2640 = vmatpush.bf16.msra.mxu3 %v5303_v12  ;;  %2646 = vmatpush.bf16.msrb.mxu0 %v4011_v13  ;;  %v4360_v49 = vld [vmem:[#allocation5 + $0x3b0] sm:$0xf0]  ;;  %v4235_v52 = vor.u32 %v5896_v46, %v4232_v47  ;;  %v5828_v53 = vld [vmem:[#allocation5 + $0x84] sm:$0xf] }
  0x84   :  { %2602 = vmatmul.bf16.vlgmr.msra.gmra.mxu0 %v6604_v25  ;;  %2628 = vmatmul.bf16.vlgmr.msra.gmra.mxu2 %v6606_v29  ;;  %v3960_v54 = vld [vmem:[#allocation5 + $0x90] sm:$0xf0]  ;;  %v5860_v55 = vld [vmem:[#allocation5 + $0x184] sm:$0xf]  ;;  %v4363_v56 = vor.u32 %v5928_v48, %v4360_v49 }
  0x85   :  { %2659 = vmatpush.bf16.msrb.mxu1 %v4139_v15  ;;  %2672 = vmatpush.bf16.msrb.mxu2 %v4267_v16  ;;  %v4088_v57 = vld [vmem:[#allocation5 + $0x190] sm:$0xf0]  ;;  %v5892_v58 = vld [vmem:[#allocation5 + $0x284] sm:$0xf]  ;;  %v3963_v62 = vor.u32 %v5828_v53, %v3960_v54 }
  0x86   :  { %2615 = vmatmul.bf16.vlgmr.msra.gmra.mxu1 %v6608_v30  ;;  %2641 = vmatmul.bf16.vlgmr.msra.gmra.mxu3 %v6610_v33  ;;  %v4216_v59 = vld [vmem:[#allocation5 + $0x290] sm:$0xf0]  ;;  %v5924_v60 = vld [vmem:[#allocation5 + $0x384] sm:$0xf]  ;;  %v4091_v63 = vor.u32 %v5860_v55, %v4088_v57 }
  0x87   :  { %2685 = vmatpush.bf16.msrb.mxu3 %v4395_v24  ;;  %2647 = vmatpush.bf16.msrb.mxu0 %v3995_v34  ;;  %v4344_v61 = vld [vmem:[#allocation5 + $0x390] sm:$0xf0]  ;;  %v4219_v0 = vor.u32 %v5892_v58, %v4216_v59  ;;  %v5824_v1 = vld [vmem:[#allocation5 + $0x64] sm:$0xf] }
  0x88   :  { %v3944_v2 = vld [vmem:[#allocation5 + $0x70] sm:$0xf0]  ;;  %v5856_v3 = vld [vmem:[#allocation5 + $0x164] sm:$0xf]  ;;  %v4347_v4 = vor.u32 %v5924_v60, %v4344_v61 }
  0x89   :  { %2660 = vmatpush.bf16.msrb.mxu1 %v4123_v35  ;;  %2673 = vmatpush.bf16.msrb.mxu2 %v4251_v36  ;;  %v4072_v5 = vld [vmem:[#allocation5 + $0x170] sm:$0xf0]  ;;  %v5888_v6 = vld [vmem:[#allocation5 + $0x264] sm:$0xf]  ;;  %v3947_v10 = vor.u32 %v5824_v1, %v3944_v2 }
  0x8a   :  { %v4200_v7 = vld [vmem:[#allocation5 + $0x270] sm:$0xf0]  ;;  %v5920_v8 = vld [vmem:[#allocation5 + $0x364] sm:$0xf]  ;;  %v4075_v11 = vor.u32 %v5856_v3, %v4072_v5 }
  0x8b   :  { %2686 = vmatpush.bf16.msrb.mxu3 %v4379_v43  ;;  %2648 = vmatpush.bf16.msrb.mxu0 %v3979_v50  ;;  %v4328_v9 = vld [vmem:[#allocation5 + $0x370] sm:$0xf0]  ;;  %v4203_v12 = vor.u32 %v5888_v6, %v4200_v7  ;;  %v5820_v13 = vld [vmem:[#allocation5 + $0x44] sm:$0xf] }
  0x8c   :  { %v3928_v14 = vld [vmem:[#allocation5 + $0x50] sm:$0xf0]  ;;  %v5852_v15 = vld [vmem:[#allocation5 + $0x144] sm:$0xf]  ;;  %v4331_v16 = vor.u32 %v5920_v8, %v4328_v9 }
  0x8d   :  { %2661 = vmatpush.bf16.msrb.mxu1 %v4107_v51  ;;  %2674 = vmatpush.bf16.msrb.mxu2 %v4235_v52  ;;  %v4056_v17 = vld [vmem:[#allocation5 + $0x150] sm:$0xf0]  ;;  %v5884_v21 = vld [vmem:[#allocation5 + $0x244] sm:$0xf]  ;;  %v3931_v27 = vor.u32 %v5820_v13, %v3928_v14 }
  0x8e   :  { %v4184_v23 = vld [vmem:[#allocation5 + $0x250] sm:$0xf0]  ;;  %v5916_v24 = vld [vmem:[#allocation5 + $0x344] sm:$0xf]  ;;  %v4059_v28 = vor.u32 %v5852_v15, %v4056_v17 }
  0x8f   :  { %2687 = vmatpush.bf16.msrb.mxu3 %v4363_v56  ;;  %2649 = vmatpush.bf16.msrb.mxu0 %v3963_v62  ;;  %v4312_v26 = vld [vmem:[#allocation5 + $0x350] sm:$0xf0]  ;;  %v4187_v31 = vor.u32 %v5884_v21, %v4184_v23  ;;  %v5816_v32 = vld [vmem:[#allocation5 + $0x24] sm:$0xf] }
  0x90   :  { %v3912_v34 = vld [vmem:[#allocation5 + $0x30] sm:$0xf0]  ;;  %v5848_v35 = vld [vmem:[#allocation5 + $0x124] sm:$0xf]  ;;  %v4315_v36 = vor.u32 %v5916_v24, %v4312_v26 }
  0x91   :  { %2662 = vmatpush.bf16.msrb.mxu1 %v4091_v63  ;;  %2675 = vmatpush.bf16.msrb.mxu2 %v4219_v0  ;;  %v4040_v37 = vld [vmem:[#allocation5 + $0x130] sm:$0xf0]  ;;  %v5880_v39 = vld [vmem:[#allocation5 + $0x224] sm:$0xf]  ;;  %v3915_v46 = vor.u32 %v5816_v32, %v3912_v34 }
  0x92   :  { %v4168_v40 = vld [vmem:[#allocation5 + $0x230] sm:$0xf0]  ;;  %v5912_v43 = vld [vmem:[#allocation5 + $0x324] sm:$0xf]  ;;  %v4043_v49 = vor.u32 %v5848_v35, %v4040_v37 }
  0x93   :  { %2688 = vmatpush.bf16.msrb.mxu3 %v4347_v4  ;;  %2650 = vmatpush.bf16.msrb.mxu0 %v3947_v10  ;;  %v4296_v45 = vld [vmem:[#allocation5 + $0x330] sm:$0xf0]  ;;  %v5812_v47 = vld [vmem:[#allocation5 + $0x4] sm:$0xf]  ;;  %v4171_v50 = vor.u32 %v5880_v39, %v4168_v40 }
  0x94   :  { %v3896_v48 = vld [vmem:[#allocation5 + $0x10] sm:$0xf0]  ;;  %v5844_v51 = vld [vmem:[#allocation5 + $0x104] sm:$0xf]  ;;  %v4299_v54 = vor.u32 %v5912_v43, %v4296_v45 }
  0x95   :  { %2663 = vmatpush.bf16.msrb.mxu1 %v4075_v11  ;;  %2676 = vmatpush.bf16.msrb.mxu2 %v4203_v12  ;;  %v4024_v52 = vld [vmem:[#allocation5 + $0x110] sm:$0xf0]  ;;  %v5876_v53 = vld [vmem:[#allocation5 + $0x204] sm:$0xf]  ;;  %v3899_v61 = vor.u32 %v5812_v47, %v3896_v48 }
  0x96   :  { %v4152_v55 = vld [vmem:[#allocation5 + $0x210] sm:$0xf0]  ;;  %v5908_v56 = vld [vmem:[#allocation5 + $0x304] sm:$0xf]  ;;  %v4027_v1 = vor.u32 %v5844_v51, %v4024_v52 }
  0x97   :  { %2689 = vmatpush.bf16.msrb.mxu3 %v4331_v16  ;;  %2651 = vmatpush.bf16.msrb.mxu0 %v3931_v27  ;;  %v4280_v57 = vld [vmem:[#allocation5 + $0x310] sm:$0xf0]  ;;  %v5968_v58 = vld [vmem:[#allocation5 + $0x4e4] sm:$0xf]  ;;  %v4155_v2 = vor.u32 %v5876_v53, %v4152_v55 }
  0x98   :  { %v4520_v59 = vld [vmem:[#allocation5 + $0x4f0] sm:$0xf0]  ;;  %v6000_v60 = vld [vmem:[#allocation5 + $0x5e4] sm:$0xf]  ;;  %v4283_v5 = vor.u32 %v5908_v56, %v4280_v57 }
  0x99   :  { %2664 = vmatpush.bf16.msrb.mxu1 %v4059_v28  ;;  %2677 = vmatpush.bf16.msrb.mxu2 %v4187_v31  ;;  %v4648_v62 = vld [vmem:[#allocation5 + $0x5f0] sm:$0xf0]  ;;  %v6032_v63 = vld [vmem:[#allocation5 + $0x6e4] sm:$0xf]  ;;  %v4523_v6 = vor.u32 %v5968_v58, %v4520_v59 }
  0x9a   :  { %v4776_v0 = vld [vmem:[#allocation5 + $0x6f0] sm:$0xf0]  ;;  %v6064_v3 = vld [vmem:[#allocation5 + $0x7e4] sm:$0xf]  ;;  %v4651_v7 = vor.u32 %v6000_v60, %v4648_v62 }
  0x9b   :  { %2690 = vmatpush.bf16.msrb.mxu3 %v4315_v36  ;;  %2652 = vmatpush.bf16.msrb.mxu0 %v3915_v46  ;;  %v4904_v4 = vld [vmem:[#allocation5 + $0x7f0] sm:$0xf0]  ;;  %v4779_v8 = vor.u32 %v6032_v63, %v4776_v0  ;;  %v5964_v9 = vld [vmem:[#allocation5 + $0x4c4] sm:$0xf] }
  0x9c   :  { %v4504_v10 = vld [vmem:[#allocation5 + $0x4d0] sm:$0xf0]  ;;  %v5996_v11 = vld [vmem:[#allocation5 + $0x5c4] sm:$0xf]  ;;  %v4907_v12 = vor.u32 %v6064_v3, %v4904_v4 }
  0x9d   :  { %2665 = vmatpush.bf16.msrb.mxu1 %v4043_v49  ;;  %2678 = vmatpush.bf16.msrb.mxu2 %v4171_v50  ;;  %v4632_v13 = vld [vmem:[#allocation5 + $0x5d0] sm:$0xf0]  ;;  %v6028_v14 = vld [vmem:[#allocation5 + $0x6c4] sm:$0xf]  ;;  %v4507_v21 = vor.u32 %v5964_v9, %v4504_v10 }
  0x9e   :  { %v4760_v15 = vld [vmem:[#allocation5 + $0x6d0] sm:$0xf0]  ;;  %v6060_v16 = vld [vmem:[#allocation5 + $0x7c4] sm:$0xf]  ;;  %v4635_v23 = vor.u32 %v5996_v11, %v4632_v13 }
  0x9f   :  { %2691 = vmatpush.bf16.msrb.mxu3 %v4299_v54  ;;  %2653 = vmatpush.bf16.msrb.mxu0 %v3899_v61  ;;  %v4888_v17 = vld [vmem:[#allocation5 + $0x7d0] sm:$0xf0]  ;;  %v4763_v24 = vor.u32 %v6028_v14, %v4760_v15  ;;  %v5960_v26 = vld [vmem:[#allocation5 + $0x4a4] sm:$0xf] }
  0xa0   :  { %v4488_v27 = vld [vmem:[#allocation5 + $0x4b0] sm:$0xf0]  ;;  %v5992_v28 = vld [vmem:[#allocation5 + $0x5a4] sm:$0xf]  ;;  %v4891_v31 = vor.u32 %v6060_v16, %v4888_v17 }
  0xa1   :  { %2666 = vmatpush.bf16.msrb.mxu1 %v4027_v1  ;;  %2679 = vmatpush.bf16.msrb.mxu2 %v4155_v2  ;;  %v4616_v32 = vld [vmem:[#allocation5 + $0x5b0] sm:$0xf0]  ;;  %v6024_v34 = vld [vmem:[#allocation5 + $0x6a4] sm:$0xf]  ;;  %v4491_v39 = vor.u32 %v5960_v26, %v4488_v27 }
  0xa2   :  { %v4744_v35 = vld [vmem:[#allocation5 + $0x6b0] sm:$0xf0]  ;;  %v6056_v36 = vld [vmem:[#allocation5 + $0x7a4] sm:$0xf]  ;;  %2654 = vmatmul.bf16.vlgmr.msrb.gmra.mxu0 %v6582_v19  ;;  %v4619_v40 = vor.u32 %v5992_v28, %v4616_v32 }
  0xa3   :  { %2692 = vmatpush.bf16.msrb.mxu3 %v4283_v5  ;;  %2698 = vmatpush.bf16.msra.mxu0 %v4523_v6  ;;  %v4872_v37 = vld [vmem:[#allocation5 + $0x7b0] sm:$0xf0]  ;;  %v4747_v43 = vor.u32 %v6024_v34, %v4744_v35  ;;  %v5956_v45 = vld [vmem:[#allocation5 + $0x484] sm:$0xf] }
  0xa4   :  { %2680 = vmatmul.bf16.vlgmr.msrb.gmra.mxu2 %v6580_v18  ;;  %2667 = vmatmul.bf16.vlgmr.msrb.gmra.mxu1 %v6586_v22  ;;  %v4472_v46 = vld [vmem:[#allocation5 + $0x490] sm:$0xf0]  ;;  %v5988_v47 = vld [vmem:[#allocation5 + $0x584] sm:$0xf]  ;;  %v4875_v48 = vor.u32 %v6056_v36, %v4872_v37 }
  0xa5   :  { %2711 = vmatpush.bf16.msra.mxu1 %v4651_v7  ;;  %2724 = vmatpush.bf16.msra.mxu2 %v4779_v8  ;;  %v4600_v49 = vld [vmem:[#allocation5 + $0x590] sm:$0xf0]  ;;  %v6020_v50 = vld [vmem:[#allocation5 + $0x684] sm:$0xf]  ;;  %v4475_v54 = vor.u32 %v5956_v45, %v4472_v46 }
  0xa6   :  { %2693 = vmatmul.bf16.vlgmr.msrb.gmra.mxu3 %v6584_v20  ;;  %v4728_v51 = vld [vmem:[#allocation5 + $0x690] sm:$0xf0]  ;;  %v6052_v52 = vld [vmem:[#allocation5 + $0x784] sm:$0xf]  ;;  %v4603_v55 = vor.u32 %v5988_v47, %v4600_v49 }
  0xa7   :  { %2737 = vmatpush.bf16.msra.mxu3 %v4907_v12  ;;  %2699 = vmatpush.bf16.msra.mxu0 %v4507_v21  ;;  %v4856_v53 = vld [vmem:[#allocation5 + $0x790] sm:$0xf0]  ;;  %v4731_v56 = vor.u32 %v6020_v50, %v4728_v51  ;;  %v5952_v57 = vld [vmem:[#allocation5 + $0x464] sm:$0xf] }
  0xa8   :  { %v4456_v58 = vld [vmem:[#allocation5 + $0x470] sm:$0xf0]  ;;  %v5984_v59 = vld [vmem:[#allocation5 + $0x564] sm:$0xf]  ;;  %v4859_v60 = vor.u32 %v6052_v52, %v4856_v53 }
  0xa9   :  { %2712 = vmatpush.bf16.msra.mxu1 %v4635_v23  ;;  %2725 = vmatpush.bf16.msra.mxu2 %v4763_v24  ;;  %v4584_v61 = vld [vmem:[#allocation5 + $0x570] sm:$0xf0]  ;;  %v6016_v62 = vld [vmem:[#allocation5 + $0x664] sm:$0xf]  ;;  %v4459_v2 = vor.u32 %v5952_v57, %v4456_v58 }
  0xaa   :  { %v4712_v63 = vld [vmem:[#allocation5 + $0x670] sm:$0xf0]  ;;  %v6048_v0 = vld [vmem:[#allocation5 + $0x764] sm:$0xf]  ;;  %v4587_v3 = vor.u32 %v5984_v59, %v4584_v61 }
  0xab   :  { %2738 = vmatpush.bf16.msra.mxu3 %v4891_v31  ;;  %2700 = vmatpush.bf16.msra.mxu0 %v4491_v39  ;;  %v4840_v1 = vld [vmem:[#allocation5 + $0x770] sm:$0xf0]  ;;  %v4715_v4 = vor.u32 %v6016_v62, %v4712_v63  ;;  %v5948_v5 = vld [vmem:[#allocation5 + $0x444] sm:$0xf] }
  0xac   :  { %v4440_v6 = vld [vmem:[#allocation5 + $0x450] sm:$0xf0]  ;;  %v5980_v7 = vld [vmem:[#allocation5 + $0x544] sm:$0xf]  ;;  %v4843_v8 = vor.u32 %v6048_v0, %v4840_v1 }
  0xad   :  { %2713 = vmatpush.bf16.msra.mxu1 %v4619_v40  ;;  %2726 = vmatpush.bf16.msra.mxu2 %v4747_v43  ;;  %v4568_v9 = vld [vmem:[#allocation5 + $0x550] sm:$0xf0]  ;;  %v6012_v10 = vld [vmem:[#allocation5 + $0x644] sm:$0xf]  ;;  %v4443_v14 = vor.u32 %v5948_v5, %v4440_v6 }
  0xae   :  { %v4696_v11 = vld [vmem:[#allocation5 + $0x650] sm:$0xf0]  ;;  %v6044_v12 = vld [vmem:[#allocation5 + $0x744] sm:$0xf]  ;;  %v4571_v15 = vor.u32 %v5980_v7, %v4568_v9 }
  0xaf   :  { %2739 = vmatpush.bf16.msra.mxu3 %v4875_v48  ;;  %2701 = vmatpush.bf16.msra.mxu0 %v4475_v54  ;;  %v4824_v13 = vld [vmem:[#allocation5 + $0x750] sm:$0xf0]  ;;  %v4699_v16 = vor.u32 %v6012_v10, %v4696_v11  ;;  %v5944_v17 = vld [vmem:[#allocation5 + $0x424] sm:$0xf] }
  0xb0   :  { %v4424_v21 = vld [vmem:[#allocation5 + $0x430] sm:$0xf0]  ;;  %v5976_v23 = vld [vmem:[#allocation5 + $0x524] sm:$0xf]  ;;  %v4827_v24 = vor.u32 %v6044_v12, %v4824_v13 }
  0xb1   :  { %2714 = vmatpush.bf16.msra.mxu1 %v4603_v55  ;;  %2727 = vmatpush.bf16.msra.mxu2 %v4731_v56  ;;  %v4552_v26 = vld [vmem:[#allocation5 + $0x530] sm:$0xf0]  ;;  %v6008_v27 = vld [vmem:[#allocation5 + $0x624] sm:$0xf]  ;;  %v4427_v34 = vor.u32 %v5944_v17, %v4424_v21 }
  0xb2   :  { %v4680_v28 = vld [vmem:[#allocation5 + $0x630] sm:$0xf0]  ;;  %v6040_v31 = vld [vmem:[#allocation5 + $0x724] sm:$0xf]  ;;  %v4555_v37 = vor.u32 %v5976_v23, %v4552_v26 }
  0xb3   :  { %2740 = vmatpush.bf16.msra.mxu3 %v4859_v60  ;;  %2702 = vmatpush.bf16.msra.mxu0 %v4459_v2  ;;  %v4808_v32 = vld [vmem:[#allocation5 + $0x730] sm:$0xf0]  ;;  %v5940_v35 = vld [vmem:[#allocation5 + $0x404] sm:$0xf]  ;;  %v4683_v39 = vor.u32 %v6008_v27, %v4680_v28 }
  0xb4   :  { %v4408_v36 = vld [vmem:[#allocation5 + $0x410] sm:$0xf0]  ;;  %v5972_v40 = vld [vmem:[#allocation5 + $0x504] sm:$0xf]  ;;  %v4811_v46 = vor.u32 %v6040_v31, %v4808_v32 }
  0xb5   :  { %2715 = vmatpush.bf16.msra.mxu1 %v4587_v3  ;;  %2728 = vmatpush.bf16.msra.mxu2 %v4715_v4  ;;  %v4536_v43 = vld [vmem:[#allocation5 + $0x510] sm:$0xf0]  ;;  %v6004_v45 = vld [vmem:[#allocation5 + $0x604] sm:$0xf]  ;;  %v4411_v53 = vor.u32 %v5940_v35, %v4408_v36 }
  0xb6   :  { %v4664_v47 = vld [vmem:[#allocation5 + $0x610] sm:$0xf0]  ;;  %v6036_v48 = vld [vmem:[#allocation5 + $0x704] sm:$0xf]  ;;  %v4539_v57 = vor.u32 %v5972_v40, %v4536_v43 }
  0xb7   :  { %2741 = vmatpush.bf16.msra.mxu3 %v4843_v8  ;;  %2703 = vmatpush.bf16.msra.mxu0 %v4443_v14  ;;  %v4792_v49 = vld [vmem:[#allocation5 + $0x710] sm:$0xf0]  ;;  %v6096_v50 = vld [vmem:[#allocation5 + $0x8e4] sm:$0xf]  ;;  %v4667_v58 = vor.u32 %v6004_v45, %v4664_v47 }
  0xb8   :  { %v5032_v51 = vld [vmem:[#allocation5 + $0x8f0] sm:$0xf0]  ;;  %v6128_v52 = vld [vmem:[#allocation5 + $0x9e4] sm:$0xf]  ;;  %v4795_v61 = vor.u32 %v6036_v48, %v4792_v49 }
  0xb9   :  { %2716 = vmatpush.bf16.msra.mxu1 %v4571_v15  ;;  %2729 = vmatpush.bf16.msra.mxu2 %v4699_v16  ;;  %v5160_v54 = vld [vmem:[#allocation5 + $0x9f0] sm:$0xf0]  ;;  %v6160_v55 = vld [vmem:[#allocation5 + $0xae4] sm:$0xf]  ;;  %v5035_v62 = vor.u32 %v6096_v50, %v5032_v51 }
  0xba   :  { %v5288_v56 = vld [vmem:[#allocation5 + $0xaf0] sm:$0xf0]  ;;  %v6192_v59 = vld [vmem:[#allocation5 + $0xbe4] sm:$0xf]  ;;  %v5163_v63 = vor.u32 %v6128_v52, %v5160_v54 }
  0xbb   :  { %2742 = vmatpush.bf16.msra.mxu3 %v4827_v24  ;;  %2704 = vmatpush.bf16.msra.mxu0 %v4427_v34  ;;  %v5416_v60 = vld [vmem:[#allocation5 + $0xbf0] sm:$0xf0]  ;;  %v5291_v0 = vor.u32 %v6160_v55, %v5288_v56  ;;  %v6092_v1 = vld [vmem:[#allocation5 + $0x8c4] sm:$0xf]  ;;  %v6624_v56 = vld [vmem:[#allocation7] sm:$0xf] }
  0xbc   :  { %v5016_v2 = vld [vmem:[#allocation5 + $0x8d0] sm:$0xf0]  ;;  %v6124_v3 = vld [vmem:[#allocation5 + $0x9c4] sm:$0xf]  ;;  %v5419_v4 = vor.u32 %v6192_v59, %v5416_v60 }
  0xbd   :  { %2717 = vmatpush.bf16.msra.mxu1 %v4555_v37  ;;  %2730 = vmatpush.bf16.msra.mxu2 %v4683_v39  ;;  %v5144_v5 = vld [vmem:[#allocation5 + $0x9d0] sm:$0xf0]  ;;  %v6156_v6 = vld [vmem:[#allocation5 + $0xac4] sm:$0xf]  ;;  %v5019_v10 = vor.u32 %v6092_v1, %v5016_v2  ;;  %v520_v1 = vperm.slane %v6624_v56, 0 }
  0xbe   :  { %v5272_v7 = vld [vmem:[#allocation5 + $0xad0] sm:$0xf0]  ;;  %v6188_v8 = vld [vmem:[#allocation5 + $0xbc4] sm:$0xf]  ;;  %v5147_v11 = vor.u32 %v6124_v3, %v5144_v5 }
  0xbf   :  { %2743 = vmatpush.bf16.msra.mxu3 %v4811_v46  ;;  %2705 = vmatpush.bf16.msra.mxu0 %v4411_v53  ;;  %v5400_v9 = vld [vmem:[#allocation5 + $0xbd0] sm:$0xf0]  ;;  %v5275_v12 = vor.u32 %v6156_v6, %v5272_v7  ;;  %v6088_v13 = vld [vmem:[#allocation5 + $0x8a4] sm:$0xf] }
  0xc0   :  { %v5000_v14 = vld [vmem:[#allocation5 + $0x8b0] sm:$0xf0]  ;;  %v6120_v15 = vld [vmem:[#allocation5 + $0x9a4] sm:$0xf]  ;;  %v5403_v16 = vor.u32 %v6188_v8, %v5400_v9 }
  0xc1   :  { %2718 = vmatpush.bf16.msra.mxu1 %v4539_v57  ;;  %2731 = vmatpush.bf16.msra.mxu2 %v4667_v58  ;;  %v5128_v17 = vld [vmem:[#allocation5 + $0x9b0] sm:$0xf0]  ;;  %v6152_v21 = vld [vmem:[#allocation5 + $0xaa4] sm:$0xf]  ;;  %v5003_v27 = vor.u32 %v6088_v13, %v5000_v14 }
  0xc2   :  { %v5256_v23 = vld [vmem:[#allocation5 + $0xab0] sm:$0xf0]  ;;  %v6184_v24 = vld [vmem:[#allocation5 + $0xba4] sm:$0xf]  ;;  %2706 = vmatmul.bf16.vlgmr.msra.gmra.mxu0 %v6594_v41  ;;  %v5131_v28 = vor.u32 %v6120_v15, %v5128_v17 }
  0xc3   :  { %2744 = vmatpush.bf16.msra.mxu3 %v4795_v61  ;;  %2750 = vmatpush.bf16.msrb.mxu0 %v5035_v62  ;;  %v5384_v26 = vld [vmem:[#allocation5 + $0xbb0] sm:$0xf0]  ;;  %v5259_v31 = vor.u32 %v6152_v21, %v5256_v23  ;;  %v6084_v32 = vld [vmem:[#allocation5 + $0x884] sm:$0xf] }
  0xc4   :  { %2732 = vmatmul.bf16.vlgmr.msra.gmra.mxu2 %v6592_v38  ;;  %2719 = vmatmul.bf16.vlgmr.msra.gmra.mxu1 %v6598_v44  ;;  %v4984_v34 = vld [vmem:[#allocation5 + $0x890] sm:$0xf0]  ;;  %v6116_v35 = vld [vmem:[#allocation5 + $0x984] sm:$0xf]  ;;  %v5387_v36 = vor.u32 %v6184_v24, %v5384_v26 }
  0xc5   :  { %2763 = vmatpush.bf16.msrb.mxu1 %v5163_v63  ;;  %2776 = vmatpush.bf16.msrb.mxu2 %v5291_v0  ;;  %v5112_v37 = vld [vmem:[#allocation5 + $0x990] sm:$0xf0]  ;;  %v6148_v39 = vld [vmem:[#allocation5 + $0xa84] sm:$0xf]  ;;  %v4987_v46 = vor.u32 %v6084_v32, %v4984_v34 }
  0xc6   :  { %2745 = vmatmul.bf16.vlgmr.msra.gmra.mxu3 %v6596_v42  ;;  %v5240_v40 = vld [vmem:[#allocation5 + $0xa90] sm:$0xf0]  ;;  %v6180_v43 = vld [vmem:[#allocation5 + $0xb84] sm:$0xf]  ;;  %v5115_v48 = vor.u32 %v6116_v35, %v5112_v37 }
  0xc7   :  { %2789 = vmatpush.bf16.msrb.mxu3 %v5419_v4  ;;  %2751 = vmatpush.bf16.msrb.mxu0 %v5019_v10  ;;  %v5368_v45 = vld [vmem:[#allocation5 + $0xb90] sm:$0xf0]  ;;  %v6080_v47 = vld [vmem:[#allocation5 + $0x864] sm:$0xf]  ;;  %v5243_v49 = vor.u32 %v6148_v39, %v5240_v40 }
  0xc8   :  { %v4968_v50 = vld [vmem:[#allocation5 + $0x870] sm:$0xf0]  ;;  %v6112_v51 = vld [vmem:[#allocation5 + $0x964] sm:$0xf]  ;;  %v5371_v53 = vor.u32 %v6180_v43, %v5368_v45  ;;  %v2525_v43 = vpop.f32.mrf.mxu2 }
  0xc9   :  { %2764 = vmatpush.bf16.msrb.mxu1 %v5147_v11  ;;  %2777 = vmatpush.bf16.msrb.mxu2 %v5275_v12  ;;  %v5096_v52 = vld [vmem:[#allocation5 + $0x970] sm:$0xf0]  ;;  %v6144_v54 = vld [vmem:[#allocation5 + $0xa64] sm:$0xf]  ;;  %v4971_v59 = vor.u32 %v6080_v47, %v4968_v50  ;;  %v2538_v50 = vpop.f32.mrf.mxu3 }
  0xca   :  { %v5224_v55 = vld [vmem:[#allocation5 + $0xa70] sm:$0xf0]  ;;  %v6176_v57 = vld [vmem:[#allocation5 + $0xb64] sm:$0xf]  ;;  %v5099_v61 = vor.u32 %v6112_v51, %v5096_v52  ;;  %v4014_v51 = vld [vmem:[#allocation5 + $0xe8] sm:$0xf] }
  0xcb   :  { %2790 = vmatpush.bf16.msrb.mxu3 %v5403_v16  ;;  %2752 = vmatpush.bf16.msrb.mxu0 %v5003_v27  ;;  %v5352_v58 = vld [vmem:[#allocation5 + $0xb70] sm:$0xf0]  ;;  %v6076_v60 = vld [vmem:[#allocation5 + $0x844] sm:$0xf]  ;;  %v5227_v62 = vor.u32 %v6144_v54, %v5224_v55  ;;  %v5843_v52 = vld [vmem:[#allocation5 + $0xf4] sm:$0xf0] }
  0xcc   :  { %v4952_v63 = vld [vmem:[#allocation5 + $0x850] sm:$0xf0]  ;;  %v6108_v0 = vld [vmem:[#allocation5 + $0x944] sm:$0xf]  ;;  %v5355_v2 = vor.u32 %v6176_v57, %v5352_v58  ;;  %v5875_v55 = vld [vmem:[#allocation5 + $0x1f4] sm:$0xf0] }
  0xcd   :  { %2765 = vmatpush.bf16.msrb.mxu1 %v5131_v28  ;;  %2778 = vmatpush.bf16.msrb.mxu2 %v5259_v31  ;;  %v5080_v3 = vld [vmem:[#allocation5 + $0x950] sm:$0xf0]  ;;  %v6140_v4 = vld [vmem:[#allocation5 + $0xa44] sm:$0xf]  ;;  %v4955_v8 = vor.u32 %v6076_v60, %v4952_v63  ;;  %v2499_v9 = vpop.f32.mrf.mxu0  ;;  %v2512_v16 = vpop.f32.mrf.mxu1  ;;  %v4270_v57 = vld [vmem:[#allocation5 + $0x2e8] sm:$0xf] }
  0xce   :  { %v5208_v5 = vld [vmem:[#allocation5 + $0xa50] sm:$0xf0]  ;;  %v6172_v6 = vld [vmem:[#allocation5 + $0xb44] sm:$0xf]  ;;  %v5083_v10 = vor.u32 %v6108_v0, %v5080_v3  ;;  %v2500_v15 = vadd.f32 %v2499_v9, %v520_v1  ;;  %v5907_v58 = vld [vmem:[#allocation5 + $0x2f4] sm:$0xf0]  ;;  %v4015_v3 = vor.u32 %v5843_v52, %v4014_v51 }
  0xcf   :  { %2791 = vmatpush.bf16.msrb.mxu3 %v5387_v36  ;;  %2753 = vmatpush.bf16.msrb.mxu0 %v4987_v46  ;;  %v5336_v7 = vld [vmem:[#allocation5 + $0xb50] sm:$0xf0]  ;;  %v5211_v11 = vor.u32 %v6140_v4, %v5208_v5  ;;  %v6072_v12 = vld [vmem:[#allocation5 + $0x824] sm:$0xf]  ;;  %v4398_v63 = vld [vmem:[#allocation5 + $0x3e8] sm:$0xf]  ;;  %v4271_v5 = vor.u32 %v5907_v58, %v4270_v57 }
  0xd0   :  { %v4936_v13 = vld [vmem:[#allocation5 + $0x830] sm:$0xf0]  ;;  %v6104_v14 = vld [vmem:[#allocation5 + $0x924] sm:$0xf]  ;;  %v5339_v17 = vor.u32 %v6172_v6, %v5336_v7  ;;  %v2513_v28 = vadd.f32 %v2512_v16, %v2500_v15  ;;  %v5939_v0 = vld [vmem:[#allocation5 + $0x3f4] sm:$0xf0]  ;;  %v2527_v15 = vpop.f32.mrf.mxu2 }
  0xd1   :  { %2766 = vmatpush.bf16.msrb.mxu1 %v5115_v48  ;;  %2779 = vmatpush.bf16.msrb.mxu2 %v5243_v49  ;;  %v5064_v21 = vld [vmem:[#allocation5 + $0x930] sm:$0xf0]  ;;  %v6136_v23 = vld [vmem:[#allocation5 + $0xa24] sm:$0xf]  ;;  %v4939_v31 = vor.u32 %v6072_v12, %v4936_v13  ;;  %v3998_v6 = vld [vmem:[#allocation5 + $0xc8] sm:$0xf]  ;;  %v4399_v9 = vor.u32 %v5939_v0, %v4398_v63 }
  0xd2   :  { %v5192_v24 = vld [vmem:[#allocation5 + $0xa30] sm:$0xf0]  ;;  %v6168_v26 = vld [vmem:[#allocation5 + $0xb24] sm:$0xf]  ;;  %v5067_v35 = vor.u32 %v6104_v14, %v5064_v21  ;;  %v2526_v49 = vadd.f32 %v2525_v43, %v2513_v28  ;;  %v5839_v7 = vld [vmem:[#allocation5 + $0xd4] sm:$0xf0] }
  0xd3   :  { %2792 = vmatpush.bf16.msrb.mxu3 %v5371_v53  ;;  %2754 = vmatpush.bf16.msrb.mxu0 %v4971_v59  ;;  %v5320_v27 = vld [vmem:[#allocation5 + $0xb30] sm:$0xf0]  ;;  %v6068_v32 = vld [vmem:[#allocation5 + $0x804] sm:$0xf]  ;;  %v5195_v36 = vor.u32 %v6136_v23, %v5192_v24  ;;  %v4142_v53 = vld [vmem:[#allocation5 + $0x1e8] sm:$0xf]  ;;  %v3999_v16 = vor.u32 %v5839_v7, %v3998_v6 }
  0xd4   :  { %v4920_v34 = vld [vmem:[#allocation5 + $0x810] sm:$0xf0]  ;;  %v6100_v37 = vld [vmem:[#allocation5 + $0x904] sm:$0xf]  ;;  %v5323_v45 = vor.u32 %v6168_v26, %v5320_v27  ;;  %v6627_v59 = vadd.f32 %v2538_v50, %v2526_v49  ;;  %v4143_v4 = vor.u32 %v5875_v55, %v4142_v53  ;;  %v5903_v12 = vld [vmem:[#allocation5 + $0x2d4] sm:$0xf0] }
  0xd5   :  { %2767 = vmatpush.bf16.msrb.mxu1 %v5099_v61  ;;  %2780 = vmatpush.bf16.msrb.mxu2 %v5227_v62  ;;  %v5048_v39 = vld [vmem:[#allocation5 + $0x910] sm:$0xf0]  ;;  %v6132_v40 = vld [vmem:[#allocation5 + $0xa04] sm:$0xf]  ;;  %v4923_v54 = vor.u32 %v6068_v32, %v4920_v34  ;;  %v2501_v60 = vpop.f32.mrf.mxu0  ;;  %v2514_v1 = vpop.f32.mrf.mxu1  ;;  %v4382_v13 = vld [vmem:[#allocation5 + $0x3c8] sm:$0xf] }
  0xd6   :  { %v5176_v46 = vld [vmem:[#allocation5 + $0xa10] sm:$0xf0]  ;;  %v6164_v47 = vld [vmem:[#allocation5 + $0xb04] sm:$0xf]  ;;  %v5051_v61 = vor.u32 %v6100_v37, %v5048_v39  ;;  %v5935_v14 = vld [vmem:[#allocation5 + $0x3d4] sm:$0xf0] }
  0xd7   :  { %2793 = vmatpush.bf16.msrb.mxu3 %v5355_v2  ;;  %2755 = vmatpush.bf16.msrb.mxu0 %v4955_v8  ;;  %v5304_v48 = vld [vmem:[#allocation5 + $0xb10] sm:$0xf0]  ;;  %v5179_v62 = vor.u32 %v6132_v40, %v5176_v46  ;;  %v4126_v8 = vld [vmem:[#allocation5 + $0x1c8] sm:$0xf]  ;;  %v5835_v26 = vld [vmem:[#allocation5 + $0xb4] sm:$0xf0]  ;;  %v4383_v28 = vor.u32 %v5935_v14, %v4382_v13 }
  0xd8   :  { %v5307_v2 = vor.u32 %v6164_v47, %v5304_v48  ;;  %v3982_v24 = vld [vmem:[#allocation5 + $0xa8] sm:$0xf]  ;;  %v5899_v34 = vld [vmem:[#allocation5 + $0x2b4] sm:$0xf0] }
  0xd9   :  { %2768 = vmatpush.bf16.msrb.mxu1 %v5083_v10  ;;  %2781 = vmatpush.bf16.msrb.mxu2 %v5211_v11  ;;  %v5871_v10 = vld [vmem:[#allocation5 + $0x1d4] sm:$0xf0]  ;;  %v4254_v11 = vld [vmem:[#allocation5 + $0x2c8] sm:$0xf]  ;;  %v3983_v37 = vor.u32 %v5835_v26, %v3982_v24 }
  0xda   :  { %v4127_v21 = vor.u32 %v5871_v10, %v4126_v8  ;;  %v4255_v23 = vor.u32 %v5903_v12, %v4254_v11  ;;  %v4110_v27 = vld [vmem:[#allocation5 + $0x1a8] sm:$0xf]  ;;  %v5863_v48 = vld [vmem:[#allocation5 + $0x194] sm:$0xf0] }
  0xdb   :  { %2794 = vmatpush.bf16.msrb.mxu3 %v5339_v17  ;;  %2756 = vmatpush.bf16.msrb.mxu0 %v4939_v31  ;;  %v2540_v17 = vpop.f32.mrf.mxu3  ;;  %v5867_v31 = vld [vmem:[#allocation5 + $0x1b4] sm:$0xf0]  ;;  %v4238_v32 = vld [vmem:[#allocation5 + $0x2a8] sm:$0xf] }
  0xdc   :  { %v4111_v39 = vor.u32 %v5867_v31, %v4110_v27  ;;  %v4239_v40 = vor.u32 %v5899_v34, %v4238_v32  ;;  %v3966_v43 = vld [vmem:[#allocation5 + $0x88] sm:$0xf]  ;;  %v5895_v50 = vld [vmem:[#allocation5 + $0x294] sm:$0xf0] }
  0xdd   :  { %2769 = vmatpush.bf16.msrb.mxu1 %v5067_v35  ;;  %2782 = vmatpush.bf16.msrb.mxu2 %v5195_v36  ;;  %v4366_v35 = vld [vmem:[#allocation5 + $0x3a8] sm:$0xf]  ;;  %v5931_v36 = vld [vmem:[#allocation5 + $0x3b4] sm:$0xf0] }
  0xde   :  { %v4094_v46 = vld [vmem:[#allocation5 + $0x188] sm:$0xf]  ;;  %v4367_v47 = vor.u32 %v5931_v36, %v4366_v35  ;;  %v5927_v52 = vld [vmem:[#allocation5 + $0x394] sm:$0xf0] }
  0xdf   :  { %2795 = vmatpush.bf16.msrb.mxu3 %v5323_v45  ;;  %2757 = vmatpush.bf16.msrb.mxu0 %v4923_v54  ;;  %v5831_v45 = vld [vmem:[#allocation5 + $0x94] sm:$0xf0]  ;;  %v4222_v49 = vld [vmem:[#allocation5 + $0x288] sm:$0xf]  ;;  %v4095_v55 = vor.u32 %v5863_v48, %v4094_v46 }
  0xe0   :  { %v4350_v51 = vld [vmem:[#allocation5 + $0x388] sm:$0xf]  ;;  %v3967_v53 = vor.u32 %v5831_v45, %v3966_v43  ;;  %v4223_v57 = vor.u32 %v5895_v50, %v4222_v49  ;;  %v5827_v60 = vld [vmem:[#allocation5 + $0x74] sm:$0xf0] }
  0xe1   :  { %2770 = vmatpush.bf16.msrb.mxu1 %v5051_v61  ;;  %2783 = vmatpush.bf16.msrb.mxu2 %v5179_v62  ;;  %v2551_v54 = vpop.f32.mrf.mxu0  ;;  %v3950_v58 = vld [vmem:[#allocation5 + $0x68] sm:$0xf]  ;;  %v4351_v0 = vor.u32 %v5927_v52, %v4350_v51  ;;  %v5859_v1 = vld [vmem:[#allocation5 + $0x174] sm:$0xf0] }
  0xe2   :  { %2758 = vmatmul.bf16.vlgmr.msrb.gmra.mxu0 %v6604_v25  ;;  %v4078_v61 = vld [vmem:[#allocation5 + $0x168] sm:$0xf]  ;;  %v2552_v62 = vadd.f32 %v2551_v54, %v6627_v59  ;;  %v3951_v7 = vor.u32 %v5827_v60, %v3950_v58  ;;  %v5823_v11 = vld [vmem:[#allocation5 + $0x54] sm:$0xf0] }
  0xe3   :  { %2796 = vmatpush.bf16.msrb.mxu3 %v5307_v2  ;;  %2802 = vmatpush.bf16.msra.mxu0 %v4015_v3  ;;  %v2564_v63 = vpop.f32.mrf.mxu1  ;;  %v4206_v2 = vld [vmem:[#allocation5 + $0x268] sm:$0xf]  ;;  %v5891_v3 = vld [vmem:[#allocation5 + $0x274] sm:$0xf0]  ;;  %v4079_v8 = vor.u32 %v5859_v1, %v4078_v61 }
  0xe4   :  { %2784 = vmatmul.bf16.vlgmr.msrb.gmra.mxu2 %v6606_v29  ;;  %2771 = vmatmul.bf16.vlgmr.msrb.gmra.mxu1 %v6608_v30  ;;  %v2565_v6 = vadd.f32 %v2564_v63, %v2552_v62  ;;  %v3934_v10 = vld [vmem:[#allocation5 + $0x48] sm:$0xf]  ;;  %v5855_v14 = vld [vmem:[#allocation5 + $0x154] sm:$0xf0] }
  0xe5   :  { %2815 = vmatpush.bf16.msra.mxu1 %v4143_v4  ;;  %2828 = vmatpush.bf16.msra.mxu2 %v4271_v5  ;;  %v4334_v4 = vld [vmem:[#allocation5 + $0x368] sm:$0xf]  ;;  %v5923_v5 = vld [vmem:[#allocation5 + $0x374] sm:$0xf0]  ;;  %v3935_v26 = vor.u32 %v5823_v11, %v3934_v10 }
  0xe6   :  { %2797 = vmatmul.bf16.vlgmr.msrb.gmra.mxu3 %v6610_v33  ;;  %v4062_v12 = vld [vmem:[#allocation5 + $0x148] sm:$0xf]  ;;  %v4335_v59 = vor.u32 %v5923_v5, %v4334_v4  ;;  %v5919_v24 = vld [vmem:[#allocation5 + $0x354] sm:$0xf0] }
  0xe7   :  { %2841 = vmatpush.bf16.msra.mxu3 %v4399_v9  ;;  %2803 = vmatpush.bf16.msra.mxu0 %v3999_v16  ;;  %v4207_v9 = vor.u32 %v5891_v3, %v4206_v2  ;;  %v2577_v13 = vpop.f32.mrf.mxu2  ;;  %v4190_v15 = vld [vmem:[#allocation5 + $0x248] sm:$0xf]  ;;  %v5887_v16 = vld [vmem:[#allocation5 + $0x254] sm:$0xf0]  ;;  %v4063_v31 = vor.u32 %v5855_v14, %v4062_v12 }
  0xe8   :  { %v2578_v17 = vadd.f32 %v2577_v13, %v2565_v6  ;;  %v4191_v32 = vor.u32 %v5887_v16, %v4190_v15  ;;  %v3918_v34 = vld [vmem:[#allocation5 + $0x28] sm:$0xf]  ;;  %v5819_v35 = vld [vmem:[#allocation5 + $0x34] sm:$0xf0] }
  0xe9   :  { %2816 = vmatpush.bf16.msra.mxu1 %v4127_v21  ;;  %2829 = vmatpush.bf16.msra.mxu2 %v4255_v23  ;;  %v4318_v23 = vld [vmem:[#allocation5 + $0x348] sm:$0xf]  ;;  %v5883_v45 = vld [vmem:[#allocation5 + $0x234] sm:$0xf0]  ;;  %v3919_v48 = vor.u32 %v5819_v35, %v3918_v34 }
  0xea   :  { %v2590_v21 = vpop.f32.mrf.mxu3  ;;  %v4046_v36 = vld [vmem:[#allocation5 + $0x128] sm:$0xf]  ;;  %v5815_v50 = vld [vmem:[#allocation5 + $0x14] sm:$0xf0] }
  0xeb   :  { %2842 = vmatpush.bf16.msra.mxu3 %v4383_v28  ;;  %2804 = vmatpush.bf16.msra.mxu0 %v3983_v37  ;;  %v6634_v27 = vadd.f32 %v2590_v21, %v2578_v17  ;;  %v2553_v28 = vpop.f32.mrf.mxu0  ;;  %v2566_v37 = vpop.f32.mrf.mxu1  ;;  %v4174_v43 = vld [vmem:[#allocation5 + $0x228] sm:$0xf]  ;;  %v5847_v54 = vld [vmem:[#allocation5 + $0x114] sm:$0xf0] }
  0xec   :  { %v4302_v46 = vld [vmem:[#allocation5 + $0x328] sm:$0xf]  ;;  %v4175_v52 = vor.u32 %v5883_v45, %v4174_v43  ;;  %v5879_v60 = vld [vmem:[#allocation5 + $0x214] sm:$0xf0] }
  0xed   :  { %2817 = vmatpush.bf16.msra.mxu1 %v4111_v39  ;;  %2830 = vmatpush.bf16.msra.mxu2 %v4239_v40  ;;  %v4319_v39 = vor.u32 %v5919_v24, %v4318_v23  ;;  %v5851_v40 = vld [vmem:[#allocation5 + $0x134] sm:$0xf0]  ;;  %v3902_v49 = vld [vmem:[#allocation5 + $0x8] sm:$0xf] }
  0xee   :  { %v4047_v51 = vor.u32 %v5851_v40, %v4046_v36  ;;  %v4286_v61 = vld [vmem:[#allocation5 + $0x308] sm:$0xf]  ;;  %v5911_v62 = vld [vmem:[#allocation5 + $0x314] sm:$0xf0]  ;;  %v3903_v3 = vor.u32 %v5815_v50, %v3902_v49 }
  0xef   :  { %2843 = vmatpush.bf16.msra.mxu3 %v4367_v47  ;;  %2805 = vmatpush.bf16.msra.mxu0 %v3967_v53  ;;  %v5915_v47 = vld [vmem:[#allocation5 + $0x334] sm:$0xf0]  ;;  %v4030_v53 = vld [vmem:[#allocation5 + $0x108] sm:$0xf]  ;;  %v4287_v11 = vor.u32 %v5911_v62, %v4286_v61 }
  0xf0   :  { %v4303_v58 = vor.u32 %v5915_v47, %v4302_v46  ;;  %v5971_v1 = vld [vmem:[#allocation5 + $0x4f4] sm:$0xf0]  ;;  %v4654_v2 = vld [vmem:[#allocation5 + $0x5e8] sm:$0xf] }
  0xf1   :  { %2818 = vmatpush.bf16.msra.mxu1 %v4095_v55  ;;  %2831 = vmatpush.bf16.msra.mxu2 %v4223_v57  ;;  %v4158_v55 = vld [vmem:[#allocation5 + $0x208] sm:$0xf]  ;;  %v2579_v57 = vpop.f32.mrf.mxu2  ;;  %v6003_v4 = vld [vmem:[#allocation5 + $0x5f4] sm:$0xf0] }
  0xf2   :  { %v2592_v63 = vpop.f32.mrf.mxu3  ;;  %v4782_v5 = vld [vmem:[#allocation5 + $0x6e8] sm:$0xf]  ;;  %v6035_v6 = vld [vmem:[#allocation5 + $0x6f4] sm:$0xf0]  ;;  %v4655_v13 = vor.u32 %v6003_v4, %v4654_v2 }
  0xf3   :  { %2844 = vmatpush.bf16.msra.mxu3 %v4351_v0  ;;  %2806 = vmatpush.bf16.msra.mxu0 %v3951_v7  ;;  %v4526_v0 = vld [vmem:[#allocation5 + $0x4e8] sm:$0xf]  ;;  %v4031_v7 = vor.u32 %v5847_v54, %v4030_v53  ;;  %v6067_v10 = vld [vmem:[#allocation5 + $0x7f4] sm:$0xf0] }
  0xf4   :  { %v4527_v12 = vor.u32 %v5971_v1, %v4526_v0  ;;  %v4510_v14 = vld [vmem:[#allocation5 + $0x4c8] sm:$0xf]  ;;  %v5967_v15 = vld [vmem:[#allocation5 + $0x4d4] sm:$0xf0] }
  0xf5   :  { %2819 = vmatpush.bf16.msra.mxu1 %v4079_v8  ;;  %2832 = vmatpush.bf16.msra.mxu2 %v4207_v9  ;;  %v4159_v8 = vor.u32 %v5879_v60, %v4158_v55  ;;  %v4910_v9 = vld [vmem:[#allocation5 + $0x7e8] sm:$0xf]  ;;  %v5999_v21 = vld [vmem:[#allocation5 + $0x5d4] sm:$0xf0] }
  0xf6   :  { %v4638_v16 = vld [vmem:[#allocation5 + $0x5c8] sm:$0xf]  ;;  %v4911_v17 = vor.u32 %v6067_v10, %v4910_v9  ;;  %v6031_v24 = vld [vmem:[#allocation5 + $0x6d4] sm:$0xf0] }
  0xf7   :  { %2845 = vmatpush.bf16.msra.mxu3 %v4335_v59  ;;  %2807 = vmatpush.bf16.msra.mxu0 %v3935_v26  ;;  %v4783_v59 = vor.u32 %v6035_v6, %v4782_v5  ;;  %v4766_v23 = vld [vmem:[#allocation5 + $0x6c8] sm:$0xf]  ;;  %v6063_v28 = vld [vmem:[#allocation5 + $0x7d4] sm:$0xf0] }
  0xf8   :  { %v4894_v26 = vld [vmem:[#allocation5 + $0x7c8] sm:$0xf]  ;;  %v4767_v34 = vor.u32 %v6031_v24, %v4766_v23  ;;  %v5963_v36 = vld [vmem:[#allocation5 + $0x4b4] sm:$0xf0] }
  0xf9   :  { %2820 = vmatpush.bf16.msra.mxu1 %v4063_v31  ;;  %2833 = vmatpush.bf16.msra.mxu2 %v4191_v32  ;;  %v4511_v31 = vor.u32 %v5967_v15, %v4510_v14  ;;  %v4639_v32 = vor.u32 %v5999_v21, %v4638_v16  ;;  %v4494_v35 = vld [vmem:[#allocation5 + $0x4a8] sm:$0xf]  ;;  %v5995_v40 = vld [vmem:[#allocation5 + $0x5b4] sm:$0xf0] }
  0xfa   :  { %v4622_v37 = vld [vmem:[#allocation5 + $0x5a8] sm:$0xf]  ;;  %v6027_v45 = vld [vmem:[#allocation5 + $0x6b4] sm:$0xf0] }
  0xfb   :  { %2846 = vmatpush.bf16.msra.mxu3 %v4319_v39  ;;  %2808 = vmatpush.bf16.msra.mxu0 %v3919_v48  ;;  %v4895_v39 = vor.u32 %v6063_v28, %v4894_v26  ;;  %v4750_v43 = vld [vmem:[#allocation5 + $0x6a8] sm:$0xf]  ;;  %v6059_v47 = vld [vmem:[#allocation5 + $0x7b4] sm:$0xf0]  ;;  %v4495_v48 = vor.u32 %v5963_v36, %v4494_v35  ;;  %v4623_v49 = vor.u32 %v5995_v40, %v4622_v37 }
  0xfc   :  { %v4878_v46 = vld [vmem:[#allocation5 + $0x7a8] sm:$0xf]  ;;  %v4751_v50 = vor.u32 %v6027_v45, %v4750_v43  ;;  %v5991_v55 = vld [vmem:[#allocation5 + $0x594] sm:$0xf0] }
  0xfd   :  { %2821 = vmatpush.bf16.msra.mxu1 %v4047_v51  ;;  %2834 = vmatpush.bf16.msra.mxu2 %v4175_v52  ;;  %v4478_v51 = vld [vmem:[#allocation5 + $0x488] sm:$0xf]  ;;  %v5959_v52 = vld [vmem:[#allocation5 + $0x494] sm:$0xf0]  ;;  %v4879_v54 = vor.u32 %v6059_v47, %v4878_v46 }
  0xfe   :  { %v4606_v53 = vld [vmem:[#allocation5 + $0x588] sm:$0xf]  ;;  %v6055_v62 = vld [vmem:[#allocation5 + $0x794] sm:$0xf0]  ;;  %v4479_v0 = vor.u32 %v5959_v52, %v4478_v51 }
  0xff   :  { %2847 = vmatpush.bf16.msra.mxu3 %v4303_v58  ;;  %2809 = vmatpush.bf16.msra.mxu0 %v3903_v3  ;;  %v4734_v57 = vld [vmem:[#allocation5 + $0x688] sm:$0xf]  ;;  %v6023_v58 = vld [vmem:[#allocation5 + $0x694] sm:$0xf0]  ;;  %v4607_v2 = vor.u32 %v5991_v55, %v4606_v53 }
 0x100   :  { %v4862_v61 = vld [vmem:[#allocation5 + $0x788] sm:$0xf]  ;;  %v4735_v3 = vor.u32 %v6023_v58, %v4734_v57  ;;  %v5955_v5 = vld [vmem:[#allocation5 + $0x474] sm:$0xf0] }
 0x101   :  { %2822 = vmatpush.bf16.msra.mxu1 %v4031_v7  ;;  %2835 = vmatpush.bf16.msra.mxu2 %v4159_v8  ;;  %v2603_v60 = vpop.f32.mrf.mxu0  ;;  %v4462_v4 = vld [vmem:[#allocation5 + $0x468] sm:$0xf]  ;;  %v4863_v7 = vor.u32 %v6055_v62, %v4862_v61  ;;  %v5987_v9 = vld [vmem:[#allocation5 + $0x574] sm:$0xf0] }
 0x102   :  { %2810 = vmatmul.bf16.vlgmr.msra.gmra.mxu0 %v6582_v19  ;;  %v2604_v63 = vadd.f32 %v2603_v60, %v6634_v27  ;;  %v4590_v6 = vld [vmem:[#allocation5 + $0x568] sm:$0xf]  ;;  %v5951_v16 = vld [vmem:[#allocation5 + $0x454] sm:$0xf0] }
 0x103   :  { %2848 = vmatpush.bf16.msra.mxu3 %v4287_v11  ;;  %2854 = vmatpush.bf16.msrb.mxu0 %v4527_v12  ;;  %v2616_v1 = vpop.f32.mrf.mxu1  ;;  %v4718_v10 = vld [vmem:[#allocation5 + $0x668] sm:$0xf]  ;;  %v6019_v11 = vld [vmem:[#allocation5 + $0x674] sm:$0xf0]  ;;  %v4591_v27 = vor.u32 %v5987_v9, %v4590_v6 }
 0x104   :  { %2836 = vmatmul.bf16.vlgmr.msra.gmra.mxu2 %v6580_v18  ;;  %2823 = vmatmul.bf16.vlgmr.msra.gmra.mxu1 %v6586_v22  ;;  %v2617_v8 = vadd.f32 %v2616_v1, %v2604_v63  ;;  %v4846_v12 = vld [vmem:[#allocation5 + $0x768] sm:$0xf]  ;;  %v4719_v14 = vor.u32 %v6019_v11, %v4718_v10  ;;  %v5983_v24 = vld [vmem:[#allocation5 + $0x554] sm:$0xf0] }
 0x105   :  { %2867 = vmatpush.bf16.msrb.mxu1 %v4655_v13  ;;  %2880 = vmatpush.bf16.msrb.mxu2 %v4783_v59  ;;  %v6051_v13 = vld [vmem:[#allocation5 + $0x774] sm:$0xf0]  ;;  %v4463_v59 = vor.u32 %v5955_v5, %v4462_v4  ;;  %v4446_v15 = vld [vmem:[#allocation5 + $0x448] sm:$0xf] }
 0x106   :  { %2849 = vmatmul.bf16.vlgmr.msra.gmra.mxu3 %v6584_v20  ;;  %v4847_v21 = vor.u32 %v6051_v13, %v4846_v12  ;;  %v4702_v26 = vld [vmem:[#allocation5 + $0x648] sm:$0xf]  ;;  %v6015_v28 = vld [vmem:[#allocation5 + $0x654] sm:$0xf0]  ;;  %v4447_v37 = vor.u32 %v5951_v16, %v4446_v15 }
 0x107   :  { %2893 = vmatpush.bf16.msrb.mxu3 %v4911_v17  ;;  %2855 = vmatpush.bf16.msrb.mxu0 %v4511_v31  ;;  %v4574_v17 = vld [vmem:[#allocation5 + $0x548] sm:$0xf]  ;;  %v2629_v23 = vpop.f32.mrf.mxu2  ;;  %v6047_v35 = vld [vmem:[#allocation5 + $0x754] sm:$0xf0]  ;;  %v4703_v45 = vor.u32 %v6015_v28, %v4702_v26 }
 0x108   :  { %v2630_v31 = vadd.f32 %v2629_v23, %v2617_v8  ;;  %v4575_v43 = vor.u32 %v5983_v24, %v4574_v17  ;;  %v4430_v46 = vld [vmem:[#allocation5 + $0x428] sm:$0xf]  ;;  %v5947_v47 = vld [vmem:[#allocation5 + $0x434] sm:$0xf0] }
 0x109   :  { %2868 = vmatpush.bf16.msrb.mxu1 %v4639_v32  ;;  %2881 = vmatpush.bf16.msrb.mxu2 %v4767_v34  ;;  %v2642_v32 = vpop.f32.mrf.mxu3  ;;  %v4830_v34 = vld [vmem:[#allocation5 + $0x748] sm:$0xf]  ;;  %v2605_v36 = vpop.f32.mrf.mxu0  ;;  %v6011_v52 = vld [vmem:[#allocation5 + $0x634] sm:$0xf0]  ;;  %v4431_v55 = vor.u32 %v5947_v47, %v4430_v46 }
 0x10a   :  { %v6641_v40 = vadd.f32 %v2642_v32, %v2630_v31  ;;  %v4686_v51 = vld [vmem:[#allocation5 + $0x628] sm:$0xf]  ;;  %v5943_v58 = vld [vmem:[#allocation5 + $0x414] sm:$0xf0] }
 0x10b   :  { %2894 = vmatpush.bf16.msrb.mxu3 %v4895_v39  ;;  %2856 = vmatpush.bf16.msrb.mxu0 %v4495_v48  ;;  %v2618_v39 = vpop.f32.mrf.mxu1  ;;  %v4558_v48 = vld [vmem:[#allocation5 + $0x528] sm:$0xf]  ;;  %v4687_v61 = vor.u32 %v6011_v52, %v4686_v51  ;;  %v5975_v63 = vld [vmem:[#allocation5 + $0x514] sm:$0xf0] }
 0x10c   :  { %v4814_v53 = vld [vmem:[#allocation5 + $0x728] sm:$0xf]  ;;  %v6039_v4 = vld [vmem:[#allocation5 + $0x714] sm:$0xf0] }
 0x10d   :  { %2869 = vmatpush.bf16.msrb.mxu1 %v4623_v49  ;;  %2882 = vmatpush.bf16.msrb.mxu2 %v4751_v50  ;;  %v4831_v49 = vor.u32 %v6047_v35, %v4830_v34  ;;  %v5979_v50 = vld [vmem:[#allocation5 + $0x534] sm:$0xf0]  ;;  %v4414_v57 = vld [vmem:[#allocation5 + $0x408] sm:$0xf] }
 0x10e   :  { %v4559_v60 = vor.u32 %v5979_v50, %v4558_v48  ;;  %v4542_v62 = vld [vmem:[#allocation5 + $0x508] sm:$0xf]  ;;  %v4415_v10 = vor.u32 %v5943_v58, %v4414_v57  ;;  %v6131_v11 = vld [vmem:[#allocation5 + $0x9f4] sm:$0xf0] }
 0x10f   :  { %2895 = vmatpush.bf16.msrb.mxu3 %v4879_v54  ;;  %2857 = vmatpush.bf16.msrb.mxu0 %v4479_v0  ;;  %v6043_v54 = vld [vmem:[#allocation5 + $0x734] sm:$0xf0]  ;;  %v4670_v0 = vld [vmem:[#allocation5 + $0x608] sm:$0xf]  ;;  %v2631_v5 = vpop.f32.mrf.mxu2 }
 0x110   :  { %v4815_v1 = vor.u32 %v6043_v54, %v4814_v53  ;;  %v5038_v6 = vld [vmem:[#allocation5 + $0x8e8] sm:$0xf]  ;;  %v6163_v13 = vld [vmem:[#allocation5 + $0xaf4] sm:$0xf0] }
 0x111   :  { %2870 = vmatpush.bf16.msrb.mxu1 %v4607_v2  ;;  %2883 = vmatpush.bf16.msrb.mxu2 %v4735_v3  ;;  %v6007_v2 = vld [vmem:[#allocation5 + $0x614] sm:$0xf0]  ;;  %v4798_v3 = vld [vmem:[#allocation5 + $0x708] sm:$0xf]  ;;  %v2644_v9 = vpop.f32.mrf.mxu3 }
 0x112   :  { %v5166_v8 = vld [vmem:[#allocation5 + $0x9e8] sm:$0xf]  ;;  %v6195_v15 = vld [vmem:[#allocation5 + $0xbf4] sm:$0xf0]  ;;  %v4799_v16 = vor.u32 %v6039_v4, %v4798_v3 }
 0x113   :  { %2896 = vmatpush.bf16.msrb.mxu3 %v4863_v7  ;;  %2858 = vmatpush.bf16.msrb.mxu0 %v4463_v59  ;;  %v6099_v7 = vld [vmem:[#allocation5 + $0x8f4] sm:$0xf0]  ;;  %v5294_v12 = vld [vmem:[#allocation5 + $0xae8] sm:$0xf]  ;;  %v4543_v59 = vor.u32 %v5975_v63, %v4542_v62  ;;  %v521_v63 = vperm.slane %v6624_v56, 1 }
 0x114   :  { %v5039_v17 = vor.u32 %v6099_v7, %v5038_v6  ;;  %v5295_v23 = vor.u32 %v6163_v13, %v5294_v12  ;;  %v5022_v24 = vld [vmem:[#allocation5 + $0x8c8] sm:$0xf]  ;;  %v6095_v26 = vld [vmem:[#allocation5 + $0x8d4] sm:$0xf0] }
 0x115   :  { %2871 = vmatpush.bf16.msrb.mxu1 %v4591_v27  ;;  %2884 = vmatpush.bf16.msrb.mxu2 %v4719_v14  ;;  %v4671_v27 = vor.u32 %v6007_v2, %v4670_v0  ;;  %v5422_v14 = vld [vmem:[#allocation5 + $0xbe8] sm:$0xf]  ;;  %v6127_v32 = vld [vmem:[#allocation5 + $0x9d4] sm:$0xf0]  ;;  %v5023_v39 = vor.u32 %v6095_v26, %v5022_v24 }
 0x116   :  { %v5150_v28 = vld [vmem:[#allocation5 + $0x9c8] sm:$0xf]  ;;  %v5423_v31 = vor.u32 %v6195_v15, %v5422_v14  ;;  %v6159_v35 = vld [vmem:[#allocation5 + $0xad4] sm:$0xf0] }
 0x117   :  { %2897 = vmatpush.bf16.msrb.mxu3 %v4847_v21  ;;  %2859 = vmatpush.bf16.msrb.mxu0 %v4447_v37  ;;  %v5167_v21 = vor.u32 %v6131_v11, %v5166_v8  ;;  %v5278_v34 = vld [vmem:[#allocation5 + $0xac8] sm:$0xf]  ;;  %v6191_v37 = vld [vmem:[#allocation5 + $0xbd4] sm:$0xf0] }
 0x118   :  { %v5406_v36 = vld [vmem:[#allocation5 + $0xbc8] sm:$0xf]  ;;  %v6091_v47 = vld [vmem:[#allocation5 + $0x8b4] sm:$0xf0] }
 0x119   :  { %2872 = vmatpush.bf16.msrb.mxu1 %v4575_v43  ;;  %2885 = vmatpush.bf16.msrb.mxu2 %v4703_v45  ;;  %v5151_v43 = vor.u32 %v6127_v32, %v5150_v28  ;;  %v5279_v45 = vor.u32 %v6159_v35, %v5278_v34  ;;  %v5006_v46 = vld [vmem:[#allocation5 + $0x8a8] sm:$0xf]  ;;  %v6123_v50 = vld [vmem:[#allocation5 + $0x9b4] sm:$0xf0] }
 0x11a   :  { %v5134_v48 = vld [vmem:[#allocation5 + $0x9a8] sm:$0xf]  ;;  %v6155_v52 = vld [vmem:[#allocation5 + $0xab4] sm:$0xf0] }
 0x11b   :  { %2898 = vmatpush.bf16.msrb.mxu3 %v4831_v49  ;;  %2860 = vmatpush.bf16.msrb.mxu0 %v4431_v55  ;;  %v5407_v49 = vor.u32 %v6191_v37, %v5406_v36  ;;  %v5262_v51 = vld [vmem:[#allocation5 + $0xaa8] sm:$0xf]  ;;  %v6187_v54 = vld [vmem:[#allocation5 + $0xbb4] sm:$0xf0]  ;;  %v5007_v55 = vor.u32 %v6091_v47, %v5006_v46  ;;  %v5135_v58 = vor.u32 %v6123_v50, %v5134_v48 }
 0x11c   :  { %v5390_v53 = vld [vmem:[#allocation5 + $0xba8] sm:$0xf]  ;;  %v6151_v3 = vld [vmem:[#allocation5 + $0xa94] sm:$0xf0] }
 0x11d   :  { %2873 = vmatpush.bf16.msrb.mxu1 %v4559_v60  ;;  %2886 = vmatpush.bf16.msrb.mxu2 %v4687_v61  ;;  %v4990_v57 = vld [vmem:[#allocation5 + $0x888] sm:$0xf]  ;;  %v5263_v60 = vor.u32 %v6155_v52, %v5262_v51  ;;  %v6087_v61 = vld [vmem:[#allocation5 + $0x894] sm:$0xf0]  ;;  %v5391_v0 = vor.u32 %v6187_v54, %v5390_v53 }
 0x11e   :  { %v5118_v62 = vld [vmem:[#allocation5 + $0x988] sm:$0xf]  ;;  %v6183_v5 = vld [vmem:[#allocation5 + $0xb94] sm:$0xf0]  ;;  %v4991_v6 = vor.u32 %v6087_v61, %v4990_v57 }
 0x11f   :  { %2899 = vmatpush.bf16.msrb.mxu3 %v4815_v1  ;;  %2861 = vmatpush.bf16.msrb.mxu0 %v4415_v10  ;;  %v6119_v1 = vld [vmem:[#allocation5 + $0x994] sm:$0xf0]  ;;  %v5246_v2 = vld [vmem:[#allocation5 + $0xa88] sm:$0xf]  ;;  %v2655_v7 = vpop.f32.mrf.mxu0 }
 0x120   :  { %v5374_v4 = vld [vmem:[#allocation5 + $0xb88] sm:$0xf]  ;;  %v5119_v8 = vor.u32 %v6119_v1, %v5118_v62  ;;  %v5247_v9 = vor.u32 %v6151_v3, %v5246_v2  ;;  %v6083_v11 = vld [vmem:[#allocation5 + $0x874] sm:$0xf0]  ;;  %v2656_v13 = vadd.f32 %v2655_v7, %v521_v63 }
 0x121   :  { %2874 = vmatpush.bf16.msrb.mxu1 %v4543_v59  ;;  %2887 = vmatpush.bf16.msrb.mxu2 %v4671_v27  ;;  %v4974_v10 = vld [vmem:[#allocation5 + $0x868] sm:$0xf]  ;;  %v2668_v59 = vpop.f32.mrf.mxu1  ;;  %v5375_v56 = vor.u32 %v6183_v5, %v5374_v4  ;;  %v6115_v27 = vld [vmem:[#allocation5 + $0x974] sm:$0xf0] }
 0x122   :  { %2862 = vmatmul.bf16.vlgmr.msrb.gmra.mxu0 %v6594_v41  ;;  %v5102_v12 = vld [vmem:[#allocation5 + $0x968] sm:$0xf]  ;;  %v6147_v15 = vld [vmem:[#allocation5 + $0xa74] sm:$0xf0] }
 0x123   :  { %2900 = vmatpush.bf16.msrb.mxu3 %v4799_v16  ;;  %2906 = vmatpush.bf16.msra.mxu0 %v5039_v17  ;;  %v5230_v14 = vld [vmem:[#allocation5 + $0xa68] sm:$0xf]  ;;  %v6179_v17 = vld [vmem:[#allocation5 + $0xb74] sm:$0xf0]  ;;  %v5103_v24 = vor.u32 %v6115_v27, %v5102_v12  ;;  %v4016_v27 = vld [vmem:[#allocation5 + $0xf8] sm:$0xf0] }
 0x124   :  { %2888 = vmatmul.bf16.vlgmr.msrb.gmra.mxu2 %v6592_v38  ;;  %2875 = vmatmul.bf16.vlgmr.msrb.gmra.mxu1 %v6598_v44  ;;  %v5358_v16 = vld [vmem:[#allocation5 + $0xb68] sm:$0xf]  ;;  %v5231_v26 = vor.u32 %v6147_v15, %v5230_v14  ;;  %v6111_v36 = vld [vmem:[#allocation5 + $0x954] sm:$0xf0]  ;;  %v5873_v14 = vld [vmem:[#allocation5 + $0x1ec] sm:$0xf] }
 0x125   :  { %2919 = vmatpush.bf16.msra.mxu1 %v5167_v21  ;;  %2932 = vmatpush.bf16.msra.mxu2 %v5295_v23  ;;  %v2669_v21 = vadd.f32 %v2668_v59, %v2656_v13  ;;  %v4975_v23 = vor.u32 %v6083_v11, %v4974_v10  ;;  %v4958_v28 = vld [vmem:[#allocation5 + $0x848] sm:$0xf]  ;;  %v5359_v35 = vor.u32 %v6179_v17, %v5358_v16  ;;  %v6175_v47 = vld [vmem:[#allocation5 + $0xb54] sm:$0xf0]  ;;  %v4144_v16 = vld [vmem:[#allocation5 + $0x1f8] sm:$0xf0] }
 0x126   :  { %2901 = vmatmul.bf16.vlgmr.msrb.gmra.mxu3 %v6596_v42  ;;  %v5086_v32 = vld [vmem:[#allocation5 + $0x948] sm:$0xf]  ;;  %v6075_v54 = vld [vmem:[#allocation5 + $0x834] sm:$0xf0]  ;;  %v5905_v17 = vld [vmem:[#allocation5 + $0x2ec] sm:$0xf] }
 0x127   :  { %2945 = vmatpush.bf16.msra.mxu3 %v5423_v31  ;;  %2907 = vmatpush.bf16.msra.mxu0 %v5023_v39  ;;  %v6079_v31 = vld [vmem:[#allocation5 + $0x854] sm:$0xf0]  ;;  %v2681_v34 = vpop.f32.mrf.mxu2  ;;  %v5214_v37 = vld [vmem:[#allocation5 + $0xa48] sm:$0xf]  ;;  %v2657_v50 = vpop.f32.mrf.mxu0  ;;  %v5087_v51 = vor.u32 %v6111_v36, %v5086_v32  ;;  %v5837_v36 = vld [vmem:[#allocation5 + $0xcc] sm:$0xf] }
 0x128   :  { %v6143_v39 = vld [vmem:[#allocation5 + $0xa54] sm:$0xf0]  ;;  %v5342_v46 = vld [vmem:[#allocation5 + $0xb48] sm:$0xf]  ;;  %v4959_v48 = vor.u32 %v6079_v31, %v4958_v28  ;;  %v4400_v28 = vld [vmem:[#allocation5 + $0x3f8] sm:$0xf0] }
 0x129   :  { %2920 = vmatpush.bf16.msra.mxu1 %v5151_v43  ;;  %2933 = vmatpush.bf16.msra.mxu2 %v5279_v45  ;;  %v2682_v43 = vadd.f32 %v2681_v34, %v2669_v21  ;;  %v2694_v45 = vpop.f32.mrf.mxu3  ;;  %v5215_v52 = vor.u32 %v6143_v39, %v5214_v37  ;;  %v4942_v53 = vld [vmem:[#allocation5 + $0x828] sm:$0xf]  ;;  %v2670_v57 = vpop.f32.mrf.mxu1  ;;  %v6139_v62 = vld [vmem:[#allocation5 + $0xa34] sm:$0xf0]  ;;  %v4272_v21 = vld [vmem:[#allocation5 + $0x2f8] sm:$0xf0]  ;;  %v4147_v34 = vor.u32 %v5873_v14, %v4144_v16 }
 0x12a   :  { %v5198_v61 = vld [vmem:[#allocation5 + $0xa28] sm:$0xf]  ;;  %v4943_v1 = vor.u32 %v6075_v54, %v4942_v53  ;;  %v6071_v3 = vld [vmem:[#allocation5 + $0x814] sm:$0xf0]  ;;  %v4000_v37 = vld [vmem:[#allocation5 + $0xd8] sm:$0xf0] }
 0x12b   :  { %2946 = vmatpush.bf16.msra.mxu3 %v5407_v49  ;;  %2908 = vmatpush.bf16.msra.mxu0 %v5007_v55  ;;  %v6648_v49 = vadd.f32 %v2694_v45, %v2682_v43  ;;  %v5070_v55 = vld [vmem:[#allocation5 + $0x928] sm:$0xf]  ;;  %v5199_v5 = vor.u32 %v6139_v62, %v5198_v61  ;;  %v6103_v7 = vld [vmem:[#allocation5 + $0x914] sm:$0xf0]  ;;  %v5869_v39 = vld [vmem:[#allocation5 + $0x1cc] sm:$0xf] }
 0x12c   :  { %v5326_v63 = vld [vmem:[#allocation5 + $0xb28] sm:$0xf]  ;;  %v6135_v11 = vld [vmem:[#allocation5 + $0xa14] sm:$0xf0]  ;;  %v4128_v45 = vld [vmem:[#allocation5 + $0x1d8] sm:$0xf0] }
 0x12d   :  { %2921 = vmatpush.bf16.msra.mxu1 %v5135_v58  ;;  %2934 = vmatpush.bf16.msra.mxu2 %v5263_v60  ;;  %v5343_v58 = vor.u32 %v6175_v47, %v5342_v46  ;;  %v6107_v60 = vld [vmem:[#allocation5 + $0x934] sm:$0xf0]  ;;  %v4926_v2 = vld [vmem:[#allocation5 + $0x808] sm:$0xf]  ;;  %v5901_v46 = vld [vmem:[#allocation5 + $0x2cc] sm:$0xf] }
 0x12e   :  { %v5071_v4 = vor.u32 %v6107_v60, %v5070_v55  ;;  %v5310_v12 = vld [vmem:[#allocation5 + $0xb08] sm:$0xf]  ;;  %v6167_v13 = vld [vmem:[#allocation5 + $0xb14] sm:$0xf0]  ;;  %v4927_v15 = vor.u32 %v6071_v3, %v4926_v2  ;;  %v4256_v47 = vld [vmem:[#allocation5 + $0x2d8] sm:$0xf0] }
 0x12f   :  { %2947 = vmatpush.bf16.msra.mxu3 %v5391_v0  ;;  %2909 = vmatpush.bf16.msra.mxu0 %v4991_v6  ;;  %v6171_v0 = vld [vmem:[#allocation5 + $0xb34] sm:$0xf0]  ;;  %v5054_v6 = vld [vmem:[#allocation5 + $0x908] sm:$0xf]  ;;  %v5311_v31 = vor.u32 %v6167_v13, %v5310_v12  ;;  %v4384_v50 = vld [vmem:[#allocation5 + $0x3d8] sm:$0xf0]  ;;  %v4259_v53 = vor.u32 %v5901_v46, %v4256_v47 }
 0x130   :  { %v5327_v10 = vor.u32 %v6171_v0, %v5326_v63  ;;  %v5833_v54 = vld [vmem:[#allocation5 + $0xac] sm:$0xf]  ;;  %v3984_v55 = vld [vmem:[#allocation5 + $0xb8] sm:$0xf0] }
 0x131   :  { %2922 = vmatpush.bf16.msra.mxu1 %v5119_v8  ;;  %2935 = vmatpush.bf16.msra.mxu2 %v5247_v9  ;;  %v5182_v8 = vld [vmem:[#allocation5 + $0xa08] sm:$0xf]  ;;  %v2683_v9 = vpop.f32.mrf.mxu2  ;;  %v2696_v59 = vpop.f32.mrf.mxu3  ;;  %v5865_v57 = vld [vmem:[#allocation5 + $0x1ac] sm:$0xf]  ;;  %v4112_v60 = vld [vmem:[#allocation5 + $0x1b8] sm:$0xf0] }
 0x132   :  { %v5897_v61 = vld [vmem:[#allocation5 + $0x2ac] sm:$0xf]  ;;  %v4240_v62 = vld [vmem:[#allocation5 + $0x2b8] sm:$0xf0]  ;;  %v4115_v2 = vor.u32 %v5865_v57, %v4112_v60 }
 0x133   :  { %2948 = vmatpush.bf16.msra.mxu3 %v5375_v56  ;;  %2910 = vmatpush.bf16.msra.mxu0 %v4975_v23  ;;  %v5841_v56 = vld [vmem:[#allocation5 + $0xec] sm:$0xf]  ;;  %v5055_v23 = vor.u32 %v6103_v7, %v5054_v6  ;;  %v4368_v0 = vld [vmem:[#allocation5 + $0x3b8] sm:$0xf0]  ;;  %v4243_v3 = vor.u32 %v5897_v61, %v4240_v62 }
 0x134   :  { %v4019_v32 = vor.u32 %v5841_v56, %v4016_v27  ;;  %v5929_v63 = vld [vmem:[#allocation5 + $0x3ac] sm:$0xf]  ;;  %v4352_v12 = vld [vmem:[#allocation5 + $0x398] sm:$0xf0] }
 0x135   :  { %2923 = vmatpush.bf16.msra.mxu1 %v5103_v24  ;;  %2936 = vmatpush.bf16.msra.mxu2 %v5231_v26  ;;  %v5183_v24 = vor.u32 %v6135_v11, %v5182_v8  ;;  %v5937_v26 = vld [vmem:[#allocation5 + $0x3ec] sm:$0xf]  ;;  %v4371_v7 = vor.u32 %v5929_v63, %v4368_v0  ;;  %v4096_v8 = vld [vmem:[#allocation5 + $0x198] sm:$0xf0] }
 0x136   :  { %v4403_v43 = vor.u32 %v5937_v26, %v4400_v28  ;;  %v5861_v6 = vld [vmem:[#allocation5 + $0x18c] sm:$0xf]  ;;  %v4208_v28 = vld [vmem:[#allocation5 + $0x278] sm:$0xf0] }
 0x137   :  { %2949 = vmatpush.bf16.msra.mxu3 %v5359_v35  ;;  %2911 = vmatpush.bf16.msra.mxu0 %v4959_v48  ;;  %v4275_v35 = vor.u32 %v5905_v17, %v4272_v21  ;;  %v5933_v48 = vld [vmem:[#allocation5 + $0x3cc] sm:$0xf]  ;;  %v4099_v56 = vor.u32 %v5861_v6, %v4096_v8  ;;  %v4064_v47 = vld [vmem:[#allocation5 + $0x158] sm:$0xf0] }
 0x138   :  { %v5893_v9 = vld [vmem:[#allocation5 + $0x28c] sm:$0xf]  ;;  %v3920_v63 = vld [vmem:[#allocation5 + $0x38] sm:$0xf0] }
 0x139   :  { %2924 = vmatpush.bf16.msra.mxu1 %v5087_v51  ;;  %2937 = vmatpush.bf16.msra.mxu2 %v5215_v52  ;;  %v4003_v51 = vor.u32 %v5837_v36, %v4000_v37  ;;  %v4131_v52 = vor.u32 %v5869_v39, %v4128_v45  ;;  %v5925_v11 = vld [vmem:[#allocation5 + $0x38c] sm:$0xf] }
 0x13a   :  { %v5825_v14 = vld [vmem:[#allocation5 + $0x6c] sm:$0xf] }
 0x13b   :  { %2950 = vmatpush.bf16.msra.mxu3 %v5343_v58  ;;  %2912 = vmatpush.bf16.msra.mxu0 %v4943_v1  ;;  %v4387_v58 = vor.u32 %v5933_v48, %v4384_v50  ;;  %v3987_v1 = vor.u32 %v5833_v54, %v3984_v55  ;;  %v5857_v16 = vld [vmem:[#allocation5 + $0x16c] sm:$0xf]  ;;  %v4192_v50 = vld [vmem:[#allocation5 + $0x258] sm:$0xf0] }
 0x13c   :  { %v5889_v26 = vld [vmem:[#allocation5 + $0x26c] sm:$0xf]  ;;  %v4320_v54 = vld [vmem:[#allocation5 + $0x358] sm:$0xf0] }
 0x13d   :  { %2925 = vmatpush.bf16.msra.mxu1 %v5071_v4  ;;  %2938 = vmatpush.bf16.msra.mxu2 %v5199_v5  ;;  %v5829_v4 = vld [vmem:[#allocation5 + $0x8c] sm:$0xf]  ;;  %v3968_v5 = vld [vmem:[#allocation5 + $0x98] sm:$0xf0]  ;;  %v4211_v37 = vor.u32 %v5889_v26, %v4208_v28 }
 0x13e   :  { %v3971_v13 = vor.u32 %v5829_v4, %v3968_v5  ;;  %v5821_v39 = vld [vmem:[#allocation5 + $0x4c] sm:$0xf]  ;;  %v4176_v5 = vld [vmem:[#allocation5 + $0x238] sm:$0xf0] }
 0x13f   :  { %2951 = vmatpush.bf16.msra.mxu3 %v5327_v10  ;;  %2913 = vmatpush.bf16.msra.mxu0 %v4927_v15  ;;  %v4224_v10 = vld [vmem:[#allocation5 + $0x298] sm:$0xf0]  ;;  %v2707_v59 = vpop.f32.mrf.mxu0  ;;  %v5853_v45 = vld [vmem:[#allocation5 + $0x14c] sm:$0xf] }
 0x140   :  { %v4227_v27 = vor.u32 %v5893_v9, %v4224_v10  ;;  %v3952_v15 = vld [vmem:[#allocation5 + $0x78] sm:$0xf0]  ;;  %v2708_v17 = vadd.f32 %v2707_v59, %v6648_v49  ;;  %v5885_v48 = vld [vmem:[#allocation5 + $0x24c] sm:$0xf]  ;;  %v4067_v60 = vor.u32 %v5853_v45, %v4064_v47 }
 0x141   :  { %2926 = vmatpush.bf16.msra.mxu1 %v5055_v23  ;;  %2939 = vmatpush.bf16.msra.mxu2 %v5183_v24  ;;  %v2720_v21 = vpop.f32.mrf.mxu1  ;;  %v4355_v23 = vor.u32 %v5925_v11, %v4352_v12  ;;  %v4080_v24 = vld [vmem:[#allocation5 + $0x178] sm:$0xf0]  ;;  %v4195_v61 = vor.u32 %v5885_v48, %v4192_v50  ;;  %v5817_v62 = vld [vmem:[#allocation5 + $0x2c] sm:$0xf] }
 0x142   :  { %2914 = vmatmul.bf16.vlgmr.msra.gmra.mxu0 %v6604_v25  ;;  %v4083_v36 = vor.u32 %v5857_v16, %v4080_v24  ;;  %v5849_v0 = vld [vmem:[#allocation5 + $0x12c] sm:$0xf]  ;;  %v3923_v8 = vor.u32 %v5817_v62, %v3920_v63  ;;  %v3904_v10 = vld [vmem:[#allocation5 + $0x18] sm:$0xf0] }
 0x143   :  { %2952 = vmatpush.bf16.msra.mxu3 %v5311_v31  ;;  %2958 = vmatpush.bf16.msrb.mxu0 %v4019_v32  ;;  %v5921_v31 = vld [vmem:[#allocation5 + $0x36c] sm:$0xf]  ;;  %v4336_v32 = vld [vmem:[#allocation5 + $0x378] sm:$0xf0] }
 0x144   :  { %2940 = vmatmul.bf16.vlgmr.msra.gmra.mxu2 %v6606_v29  ;;  %2927 = vmatmul.bf16.vlgmr.msra.gmra.mxu1 %v6608_v30  ;;  %v4339_v49 = vor.u32 %v5921_v31, %v4336_v32  ;;  %v5881_v4 = vld [vmem:[#allocation5 + $0x22c] sm:$0xf]  ;;  %v4032_v59 = vld [vmem:[#allocation5 + $0x118] sm:$0xf0] }
 0x145   :  { %2971 = vmatpush.bf16.msrb.mxu1 %v4147_v34  ;;  %2984 = vmatpush.bf16.msrb.mxu2 %v4275_v35  ;;  %v2721_v34 = vadd.f32 %v2720_v21, %v2708_v17  ;;  %v3955_v35 = vor.u32 %v5825_v14, %v3952_v15  ;;  %v5913_v6 = vld [vmem:[#allocation5 + $0x32c] sm:$0xf]  ;;  %v4179_v12 = vor.u32 %v5881_v4, %v4176_v5  ;;  %v4160_v15 = vld [vmem:[#allocation5 + $0x218] sm:$0xf0] }
 0x146   :  { %2953 = vmatmul.bf16.vlgmr.msra.gmra.mxu3 %v6610_v33  ;;  %v5813_v9 = vld [vmem:[#allocation5 + $0xc] sm:$0xf]  ;;  %v4288_v17 = vld [vmem:[#allocation5 + $0x318] sm:$0xf0] }
 0x147   :  { %2997 = vmatpush.bf16.msrb.mxu3 %v4403_v43  ;;  %2959 = vmatpush.bf16.msrb.mxu0 %v4003_v51  ;;  %v3936_v43 = vld [vmem:[#allocation5 + $0x58] sm:$0xf0]  ;;  %v2733_v46 = vpop.f32.mrf.mxu2  ;;  %v5909_v16 = vld [vmem:[#allocation5 + $0x30c] sm:$0xf]  ;;  %v3907_v28 = vor.u32 %v5813_v9, %v3904_v10 }
 0x148   :  { %v2734_v51 = vadd.f32 %v2733_v46, %v2721_v34  ;;  %v3939_v55 = vor.u32 %v5821_v39, %v3936_v43  ;;  %v4528_v24 = vld [vmem:[#allocation5 + $0x4f8] sm:$0xf0]  ;;  %v6001_v26 = vld [vmem:[#allocation5 + $0x5ec] sm:$0xf]  ;;  %v4291_v43 = vor.u32 %v5909_v16, %v4288_v17 }
 0x149   :  { %2972 = vmatpush.bf16.msrb.mxu1 %v4131_v52  ;;  %2985 = vmatpush.bf16.msrb.mxu2 %v4259_v53  ;;  %v2746_v52 = vpop.f32.mrf.mxu3  ;;  %v5917_v53 = vld [vmem:[#allocation5 + $0x34c] sm:$0xf]  ;;  %v4656_v31 = vld [vmem:[#allocation5 + $0x5f8] sm:$0xf0] }
 0x14a   :  { %v6655_v57 = vadd.f32 %v2746_v52, %v2734_v51  ;;  %v6033_v32 = vld [vmem:[#allocation5 + $0x6ec] sm:$0xf]  ;;  %v4784_v34 = vld [vmem:[#allocation5 + $0x6f8] sm:$0xf0]  ;;  %v4659_v46 = vor.u32 %v6001_v26, %v4656_v31 }
 0x14b   :  { %2998 = vmatpush.bf16.msrb.mxu3 %v4387_v58  ;;  %2960 = vmatpush.bf16.msrb.mxu0 %v3987_v1  ;;  %v2709_v58 = vpop.f32.mrf.mxu0  ;;  %v2722_v1 = vpop.f32.mrf.mxu1  ;;  %v4912_v39 = vld [vmem:[#allocation5 + $0x7f8] sm:$0xf0]  ;;  %v5965_v47 = vld [vmem:[#allocation5 + $0x4cc] sm:$0xf] }
 0x14c   :  { %v4512_v48 = vld [vmem:[#allocation5 + $0x4d8] sm:$0xf0]  ;;  %v5997_v50 = vld [vmem:[#allocation5 + $0x5cc] sm:$0xf] }
 0x14d   :  { %2973 = vmatpush.bf16.msrb.mxu1 %v4115_v2  ;;  %2986 = vmatpush.bf16.msrb.mxu2 %v4243_v3  ;;  %v4323_v2 = vor.u32 %v5917_v53, %v4320_v54  ;;  %v4048_v3 = vld [vmem:[#allocation5 + $0x138] sm:$0xf0]  ;;  %v6029_v53 = vld [vmem:[#allocation5 + $0x6cc] sm:$0xf] }
 0x14e   :  { %v4051_v11 = vor.u32 %v5849_v0, %v4048_v3  ;;  %v4640_v52 = vld [vmem:[#allocation5 + $0x5d8] sm:$0xf0]  ;;  %v5961_v63 = vld [vmem:[#allocation5 + $0x4ac] sm:$0xf] }
 0x14f   :  { %2999 = vmatpush.bf16.msrb.mxu3 %v4371_v7  ;;  %2961 = vmatpush.bf16.msrb.mxu0 %v3971_v13  ;;  %v4304_v7 = vld [vmem:[#allocation5 + $0x338] sm:$0xf0]  ;;  %v5845_v13 = vld [vmem:[#allocation5 + $0x10c] sm:$0xf] }
 0x150   :  { %v4307_v14 = vor.u32 %v5913_v6, %v4304_v7  ;;  %v4768_v54 = vld [vmem:[#allocation5 + $0x6d8] sm:$0xf0]  ;;  %v5993_v1 = vld [vmem:[#allocation5 + $0x5ac] sm:$0xf] }
 0x151   :  { %2974 = vmatpush.bf16.msrb.mxu1 %v4099_v56  ;;  %2987 = vmatpush.bf16.msrb.mxu2 %v4227_v27  ;;  %v5877_v56 = vld [vmem:[#allocation5 + $0x20c] sm:$0xf]  ;;  %v2735_v27 = vpop.f32.mrf.mxu2  ;;  %v2748_v21 = vpop.f32.mrf.mxu3  ;;  %v4896_v58 = vld [vmem:[#allocation5 + $0x7d8] sm:$0xf0]  ;;  %v4771_v62 = vor.u32 %v6029_v53, %v4768_v54 }
 0x152   :  { %v4496_v0 = vld [vmem:[#allocation5 + $0x4b8] sm:$0xf0]  ;;  %v6025_v4 = vld [vmem:[#allocation5 + $0x6ac] sm:$0xf] }
 0x153   :  { %3000 = vmatpush.bf16.msrb.mxu3 %v4355_v23  ;;  %2962 = vmatpush.bf16.msrb.mxu0 %v3955_v35  ;;  %v5969_v23 = vld [vmem:[#allocation5 + $0x4ec] sm:$0xf]  ;;  %v4035_v35 = vor.u32 %v5845_v13, %v4032_v59  ;;  %v4624_v3 = vld [vmem:[#allocation5 + $0x5b8] sm:$0xf0] }
 0x154   :  { %v4531_v45 = vor.u32 %v5969_v23, %v4528_v24  ;;  %v4752_v5 = vld [vmem:[#allocation5 + $0x6b8] sm:$0xf0]  ;;  %v6057_v6 = vld [vmem:[#allocation5 + $0x7ac] sm:$0xf]  ;;  %v4627_v9 = vor.u32 %v5993_v1, %v4624_v3 }
 0x155   :  { %2975 = vmatpush.bf16.msrb.mxu1 %v4083_v36  ;;  %2988 = vmatpush.bf16.msrb.mxu2 %v4211_v37  ;;  %v4163_v36 = vor.u32 %v5877_v56, %v4160_v15  ;;  %v6065_v37 = vld [vmem:[#allocation5 + $0x7ec] sm:$0xf]  ;;  %v4880_v7 = vld [vmem:[#allocation5 + $0x7b8] sm:$0xf0]  ;;  %v4755_v10 = vor.u32 %v6025_v4, %v4752_v5 }
 0x156   :  { %v4915_v51 = vor.u32 %v6065_v37, %v4912_v39  ;;  %v5989_v13 = vld [vmem:[#allocation5 + $0x58c] sm:$0xf]  ;;  %v4883_v59 = vor.u32 %v6057_v6, %v4880_v7  ;;  %v4736_v27 = vld [vmem:[#allocation5 + $0x698] sm:$0xf0] }
 0x157   :  { %3001 = vmatpush.bf16.msrb.mxu3 %v4339_v49  ;;  %2963 = vmatpush.bf16.msrb.mxu0 %v3939_v55  ;;  %v4787_v49 = vor.u32 %v6033_v32, %v4784_v34  ;;  %v6061_v55 = vld [vmem:[#allocation5 + $0x7cc] sm:$0xf]  ;;  %v4864_v15 = vld [vmem:[#allocation5 + $0x798] sm:$0xf0] }
 0x158   :  { %v6021_v56 = vld [vmem:[#allocation5 + $0x68c] sm:$0xf]  ;;  %v4464_v24 = vld [vmem:[#allocation5 + $0x478] sm:$0xf0] }
 0x159   :  { %2976 = vmatpush.bf16.msrb.mxu1 %v4067_v60  ;;  %2989 = vmatpush.bf16.msrb.mxu2 %v4195_v61  ;;  %v4515_v60 = vor.u32 %v5965_v47, %v4512_v48  ;;  %v4643_v61 = vor.u32 %v5997_v50, %v4640_v52  ;;  %v4739_v21 = vor.u32 %v6021_v56, %v4736_v27  ;;  %v5953_v23 = vld [vmem:[#allocation5 + $0x46c] sm:$0xf]  ;;  %v4592_v32 = vld [vmem:[#allocation5 + $0x578] sm:$0xf0] }
 0x15a   :  { %v5985_v26 = vld [vmem:[#allocation5 + $0x56c] sm:$0xf]  ;;  %v4848_v37 = vld [vmem:[#allocation5 + $0x778] sm:$0xf0]  ;;  %v4467_v39 = vor.u32 %v5953_v23, %v4464_v24 }
 0x15b   :  { %3002 = vmatpush.bf16.msrb.mxu3 %v4323_v2  ;;  %2964 = vmatpush.bf16.msrb.mxu0 %v3923_v8  ;;  %v4899_v2 = vor.u32 %v6061_v55, %v4896_v58  ;;  %v4499_v8 = vor.u32 %v5961_v63, %v4496_v0  ;;  %v6017_v34 = vld [vmem:[#allocation5 + $0x66c] sm:$0xf]  ;;  %v4576_v50 = vld [vmem:[#allocation5 + $0x558] sm:$0xf0] }
 0x15c   :  { %v4704_v52 = vld [vmem:[#allocation5 + $0x658] sm:$0xf0]  ;;  %v6045_v55 = vld [vmem:[#allocation5 + $0x74c] sm:$0xf] }
 0x15d   :  { %2977 = vmatpush.bf16.msrb.mxu1 %v4051_v11  ;;  %2990 = vmatpush.bf16.msrb.mxu2 %v4179_v12  ;;  %v5957_v11 = vld [vmem:[#allocation5 + $0x48c] sm:$0xf]  ;;  %v4480_v12 = vld [vmem:[#allocation5 + $0x498] sm:$0xf0] }
 0x15e   :  { %v4483_v16 = vor.u32 %v5957_v11, %v4480_v12  ;;  %v4832_v58 = vld [vmem:[#allocation5 + $0x758] sm:$0xf0]  ;;  %v5977_v4 = vld [vmem:[#allocation5 + $0x52c] sm:$0xf] }
 0x15f   :  { %3003 = vmatpush.bf16.msrb.mxu3 %v4307_v14  ;;  %2965 = vmatpush.bf16.msrb.mxu0 %v3907_v28  ;;  %v2759_v14 = vpop.f32.mrf.mxu0  ;;  %v4432_v3 = vld [vmem:[#allocation5 + $0x438] sm:$0xf0]  ;;  %v4835_v5 = vor.u32 %v6045_v55, %v4832_v58  ;;  %v6009_v7 = vld [vmem:[#allocation5 + $0x62c] sm:$0xf] }
 0x160   :  { %v4560_v6 = vld [vmem:[#allocation5 + $0x538] sm:$0xf0]  ;;  %v5941_v12 = vld [vmem:[#allocation5 + $0x40c] sm:$0xf] }
 0x161   :  { %2978 = vmatpush.bf16.msrb.mxu1 %v4035_v35  ;;  %2991 = vmatpush.bf16.msrb.mxu2 %v4163_v36  ;;  %v4720_v35 = vld [vmem:[#allocation5 + $0x678] sm:$0xf0]  ;;  %v6049_v36 = vld [vmem:[#allocation5 + $0x76c] sm:$0xf] }
 0x162   :  { %2966 = vmatmul.bf16.vlgmr.msrb.gmra.mxu0 %v6582_v19  ;;  %v6053_v19 = vld [vmem:[#allocation5 + $0x78c] sm:$0xf]  ;;  %v4851_v47 = vor.u32 %v6049_v36, %v4848_v37  ;;  %v4544_v27 = vld [vmem:[#allocation5 + $0x518] sm:$0xf0] }
 0x163   :  { %3004 = vmatpush.bf16.msrb.mxu3 %v4291_v43  ;;  %3010 = vmatpush.bf16.msra.mxu0 %v4531_v45  ;;  %v4867_v28 = vor.u32 %v6053_v19, %v4864_v15  ;;  %v4723_v43 = vor.u32 %v6017_v34, %v4720_v35  ;;  %v5949_v45 = vld [vmem:[#allocation5 + $0x44c] sm:$0xf]  ;;  %v4672_v15 = vld [vmem:[#allocation5 + $0x618] sm:$0xf0] }
 0x164   :  { %2992 = vmatmul.bf16.vlgmr.msrb.gmra.mxu2 %v6580_v18  ;;  %2979 = vmatmul.bf16.vlgmr.msrb.gmra.mxu1 %v6586_v22  ;;  %v4608_v18 = vld [vmem:[#allocation5 + $0x598] sm:$0xf0]  ;;  %v2772_v22 = vpop.f32.mrf.mxu1  ;;  %v5973_v56 = vld [vmem:[#allocation5 + $0x50c] sm:$0xf] }
 0x165   :  { %3023 = vmatpush.bf16.msra.mxu1 %v4659_v46  ;;  %3036 = vmatpush.bf16.msra.mxu2 %v4787_v49  ;;  %v4611_v17 = vor.u32 %v5989_v13, %v4608_v18  ;;  %v4448_v46 = vld [vmem:[#allocation5 + $0x458] sm:$0xf0]  ;;  %v5981_v49 = vld [vmem:[#allocation5 + $0x54c] sm:$0xf]  ;;  %v4547_v34 = vor.u32 %v5973_v56, %v4544_v27 }
 0x166   :  { %3005 = vmatmul.bf16.vlgmr.msrb.gmra.mxu3 %v6584_v20  ;;  %v2760_v20 = vadd.f32 %v2759_v14, %v6655_v57  ;;  %v4595_v57 = vor.u32 %v5985_v26, %v4592_v32  ;;  %v4579_v0 = vor.u32 %v5981_v49, %v4576_v50  ;;  %v4416_v13 = vld [vmem:[#allocation5 + $0x418] sm:$0xf0]  ;;  %v6005_v14 = vld [vmem:[#allocation5 + $0x60c] sm:$0xf] }
 0x167   :  { %3049 = vmatpush.bf16.msra.mxu3 %v4915_v51  ;;  %3011 = vmatpush.bf16.msra.mxu0 %v4515_v60  ;;  %v2785_v48 = vpop.f32.mrf.mxu2  ;;  %v6013_v51 = vld [vmem:[#allocation5 + $0x64c] sm:$0xf]  ;;  %v2761_v60 = vpop.f32.mrf.mxu0  ;;  %v4419_v26 = vor.u32 %v5941_v12, %v4416_v13  ;;  %v5296_v32 = vld [vmem:[#allocation5 + $0xaf8] sm:$0xf0]  ;;  %v4675_v35 = vor.u32 %v6005_v14, %v4672_v15 }
 0x168   :  { %v2773_v31 = vadd.f32 %v2772_v22, %v2760_v20  ;;  %v4707_v1 = vor.u32 %v6013_v51, %v4704_v52  ;;  %v6037_v20 = vld [vmem:[#allocation5 + $0x70c] sm:$0xf]  ;;  %v5424_v37 = vld [vmem:[#allocation5 + $0xbf8] sm:$0xf0] }
 0x169   :  { %3024 = vmatpush.bf16.msra.mxu1 %v4643_v61  ;;  %3037 = vmatpush.bf16.msra.mxu2 %v4771_v62  ;;  %v2798_v54 = vpop.f32.mrf.mxu3  ;;  %v4451_v61 = vor.u32 %v5949_v45, %v4448_v46  ;;  %v6129_v23 = vld [vmem:[#allocation5 + $0x9ec] sm:$0xf]  ;;  %v5024_v49 = vld [vmem:[#allocation5 + $0x8d8] sm:$0xf0] }
 0x16a   :  { %v2786_v53 = vadd.f32 %v2785_v48, %v2773_v31  ;;  %v6161_v31 = vld [vmem:[#allocation5 + $0xaec] sm:$0xf]  ;;  %v5152_v50 = vld [vmem:[#allocation5 + $0x9d8] sm:$0xf0] }
 0x16b   :  { %3050 = vmatpush.bf16.msra.mxu3 %v4899_v2  ;;  %3012 = vmatpush.bf16.msra.mxu0 %v4499_v8  ;;  %v5945_v2 = vld [vmem:[#allocation5 + $0x42c] sm:$0xf]  ;;  %v4688_v8 = vld [vmem:[#allocation5 + $0x638] sm:$0xf0]  ;;  %v5299_v45 = vor.u32 %v6161_v31, %v5296_v32 }
 0x16c   :  { %v2774_v62 = vpop.f32.mrf.mxu1  ;;  %v6662_v63 = vadd.f32 %v2798_v54, %v2786_v53  ;;  %v4435_v11 = vor.u32 %v5945_v2, %v4432_v3  ;;  %v4691_v18 = vor.u32 %v6009_v7, %v4688_v8  ;;  %v6193_v36 = vld [vmem:[#allocation5 + $0xbec] sm:$0xf]  ;;  %v5280_v52 = vld [vmem:[#allocation5 + $0xad8] sm:$0xf0] }
 0x16d   :  { %3025 = vmatpush.bf16.msra.mxu1 %v4627_v9  ;;  %3038 = vmatpush.bf16.msra.mxu2 %v4755_v10  ;;  %v6041_v9 = vld [vmem:[#allocation5 + $0x72c] sm:$0xf]  ;;  %v4816_v10 = vld [vmem:[#allocation5 + $0x738] sm:$0xf0]  ;;  %v5427_v48 = vor.u32 %v6193_v36, %v5424_v37 }
 0x16e   :  { %v4819_v19 = vor.u32 %v6041_v9, %v4816_v10  ;;  %v6093_v46 = vld [vmem:[#allocation5 + $0x8cc] sm:$0xf]  ;;  %v5408_v54 = vld [vmem:[#allocation5 + $0xbd8] sm:$0xf0] }
 0x16f   :  { %3051 = vmatpush.bf16.msra.mxu3 %v4883_v59  ;;  %3013 = vmatpush.bf16.msra.mxu0 %v4483_v16  ;;  %v4563_v59 = vor.u32 %v5977_v4, %v4560_v6  ;;  %v4800_v16 = vld [vmem:[#allocation5 + $0x718] sm:$0xf0]  ;;  %v2787_v22 = vpop.f32.mrf.mxu2  ;;  %v6157_v51 = vld [vmem:[#allocation5 + $0xacc] sm:$0xf]  ;;  %v5027_v55 = vor.u32 %v6093_v46, %v5024_v49 }
 0x170   :  { %v6189_v53 = vld [vmem:[#allocation5 + $0xbcc] sm:$0xf]  ;;  %v5283_v60 = vor.u32 %v6157_v51, %v5280_v52  ;;  %v5008_v62 = vld [vmem:[#allocation5 + $0x8b8] sm:$0xf0] }
 0x171   :  { %3026 = vmatpush.bf16.msra.mxu1 %v4611_v17  ;;  %3039 = vmatpush.bf16.msra.mxu2 %v4739_v21  ;;  %v6097_v17 = vld [vmem:[#allocation5 + $0x8ec] sm:$0xf]  ;;  %v5040_v21 = vld [vmem:[#allocation5 + $0x8f8] sm:$0xf0]  ;;  %v2800_v24 = vpop.f32.mrf.mxu3 }
 0x172   :  { %v5136_v2 = vld [vmem:[#allocation5 + $0x9b8] sm:$0xf0]  ;;  %v6153_v3 = vld [vmem:[#allocation5 + $0xaac] sm:$0xf] }
 0x173   :  { %3052 = vmatpush.bf16.msra.mxu3 %v4867_v28  ;;  %3014 = vmatpush.bf16.msra.mxu0 %v4467_v39  ;;  %v5168_v28 = vld [vmem:[#allocation5 + $0x9f8] sm:$0xf0]  ;;  %v4803_v39 = vor.u32 %v6037_v20, %v4800_v16  ;;  %v6085_v10 = vld [vmem:[#allocation5 + $0x88c] sm:$0xf] }
 0x174   :  { %v5264_v4 = vld [vmem:[#allocation5 + $0xab8] sm:$0xf0]  ;;  %v6181_v56 = vld [vmem:[#allocation5 + $0xb8c] sm:$0xf] }
 0x175   :  { %3027 = vmatpush.bf16.msra.mxu1 %v4595_v57  ;;  %3040 = vmatpush.bf16.msra.mxu2 %v4723_v43  ;;  %v5043_v57 = vor.u32 %v6097_v17, %v5040_v21  ;;  %v5171_v43 = vor.u32 %v6129_v23, %v5168_v28  ;;  %v5392_v6 = vld [vmem:[#allocation5 + $0xbb8] sm:$0xf0]  ;;  %v5267_v9 = vor.u32 %v6153_v3, %v5264_v4  ;;  %v6113_v20 = vld [vmem:[#allocation5 + $0x96c] sm:$0xf] }
 0x176   :  { %v5120_v13 = vld [vmem:[#allocation5 + $0x998] sm:$0xf0]  ;;  %v6145_v21 = vld [vmem:[#allocation5 + $0xa6c] sm:$0xf] }
 0x177   :  { %3053 = vmatpush.bf16.msra.mxu3 %v4851_v47  ;;  %3015 = vmatpush.bf16.msra.mxu0 %v4451_v61  ;;  %v6125_v47 = vld [vmem:[#allocation5 + $0x9cc] sm:$0xf]  ;;  %v4976_v15 = vld [vmem:[#allocation5 + $0x878] sm:$0xf0] }
 0x178   :  { %v5155_v58 = vor.u32 %v6125_v47, %v5152_v50  ;;  %v6089_v61 = vld [vmem:[#allocation5 + $0x8ac] sm:$0xf]  ;;  %v5104_v17 = vld [vmem:[#allocation5 + $0x978] sm:$0xf0] }
 0x179   :  { %3028 = vmatpush.bf16.msra.mxu1 %v4579_v0  ;;  %3041 = vmatpush.bf16.msra.mxu2 %v4707_v1  ;;  %v6121_v0 = vld [vmem:[#allocation5 + $0x9ac] sm:$0xf]  ;;  %v5411_v1 = vor.u32 %v6189_v53, %v5408_v54  ;;  %v5011_v7 = vor.u32 %v6089_v61, %v5008_v62  ;;  %v5232_v23 = vld [vmem:[#allocation5 + $0xa78] sm:$0xf0]  ;;  %v5107_v31 = vor.u32 %v6113_v20, %v5104_v17  ;;  %v5614_v17 = vld [vmem:[#allocation8 + $0x170] sm:$0xf] }
 0x17a   :  { %v5139_v8 = vor.u32 %v6121_v0, %v5136_v2  ;;  %v6177_v24 = vld [vmem:[#allocation5 + $0xb6c] sm:$0xf]  ;;  %v5235_v32 = vor.u32 %v6145_v21, %v5232_v23  ;;  %v5344_v47 = vld [vmem:[#allocation5 + $0xb58] sm:$0xf0] }
 0x17b   :  { %3054 = vmatpush.bf16.msra.mxu3 %v4835_v5  ;;  %3016 = vmatpush.bf16.msra.mxu0 %v4435_v11  ;;  %v6185_v5 = vld [vmem:[#allocation5 + $0xbac] sm:$0xf]  ;;  %v4992_v11 = vld [vmem:[#allocation5 + $0x898] sm:$0xf0] }
 0x17c   :  { %v5395_v12 = vor.u32 %v6185_v5, %v5392_v6  ;;  %v6109_v36 = vld [vmem:[#allocation5 + $0x94c] sm:$0xf]  ;;  %v4944_v54 = vld [vmem:[#allocation5 + $0x838] sm:$0xf0] }
 0x17d   :  { %3029 = vmatpush.bf16.msra.mxu1 %v4563_v59  ;;  %3042 = vmatpush.bf16.msra.mxu2 %v4691_v18  ;;  %v6149_v59 = vld [vmem:[#allocation5 + $0xa8c] sm:$0xf]  ;;  %v5248_v18 = vld [vmem:[#allocation5 + $0xa98] sm:$0xf0] }
 0x17e   :  { %v5251_v14 = vor.u32 %v6149_v59, %v5248_v18  ;;  %v6173_v49 = vld [vmem:[#allocation5 + $0xb4c] sm:$0xf]  ;;  %v5072_v61 = vld [vmem:[#allocation5 + $0x938] sm:$0xf0] }
 0x17f   :  { %3055 = vmatpush.bf16.msra.mxu3 %v4819_v19  ;;  %3017 = vmatpush.bf16.msra.mxu0 %v4419_v26  ;;  %v6668_v27 = vpop.f32.mrf.mxu0  ;;  %v6081_v19 = vld [vmem:[#allocation5 + $0x86c] sm:$0xf]  ;;  %v5360_v26 = vld [vmem:[#allocation5 + $0xb78] sm:$0xf0] }
 0x180   :  { %v4979_v28 = vor.u32 %v6081_v19, %v4976_v15  ;;  %v6073_v53 = vld [vmem:[#allocation5 + $0x82c] sm:$0xf]  ;;  %v5200_v0 = vld [vmem:[#allocation5 + $0xa38] sm:$0xf0] }
 0x181   :  { %3030 = vmatpush.bf16.msra.mxu1 %v4547_v34  ;;  %3043 = vmatpush.bf16.msra.mxu2 %v4675_v35  ;;  %v6670_v16 = vpop.f32.mrf.mxu1  ;;  %v6077_v34 = vld [vmem:[#allocation5 + $0x84c] sm:$0xf]  ;;  %v4960_v35 = vld [vmem:[#allocation5 + $0x858] sm:$0xf0]  ;;  %v4947_v3 = vor.u32 %v6073_v53, %v4944_v54  ;;  %v5462_v54 = vld [vmem:[#allocation8 + $0x40] sm:$0xf] }
 0x182   :  { %3018 = vmatmul.bf16.vlgmr.msra.gmra.mxu0 %v6594_v41  ;;  %v5376_v41 = vld [vmem:[#allocation5 + $0xb98] sm:$0xf0]  ;;  %v6137_v62 = vld [vmem:[#allocation5 + $0xa2c] sm:$0xf] }
 0x183   :  { %3056 = vmatpush.bf16.msra.mxu3 %v4803_v39  ;;  %3062 = vmatpush.bf16.msrb.mxu0 %v5043_v57  ;;  %v5379_v22 = vor.u32 %v6181_v56, %v5376_v41  ;;  %v5363_v39 = vor.u32 %v6177_v24, %v5360_v26  ;;  %v5088_v57 = vld [vmem:[#allocation5 + $0x958] sm:$0xf0]  ;;  %v6069_v4 = vld [vmem:[#allocation5 + $0x80c] sm:$0xf]  ;;  %v5203_v6 = vor.u32 %v6137_v62, %v5200_v0  ;;  %v5486_v56 = vld [vmem:[#allocation8 + $0x70] sm:$0xf] }
 0x184   :  { %3044 = vmatmul.bf16.vlgmr.msra.gmra.mxu2 %v6592_v38  ;;  %3031 = vmatmul.bf16.vlgmr.msra.gmra.mxu1 %v6598_v44  ;;  %v6117_v38 = vld [vmem:[#allocation5 + $0x98c] sm:$0xf]  ;;  %v5091_v51 = vor.u32 %v6109_v36, %v5088_v57  ;;  %v5328_v2 = vld [vmem:[#allocation5 + $0xb38] sm:$0xf0]  ;;  %v5478_v24 = vld [vmem:[#allocation8 + $0x60] sm:$0xf] }
 0x185   :  { %3075 = vmatpush.bf16.msrb.mxu1 %v5171_v43  ;;  %3088 = vmatpush.bf16.msrb.mxu2 %v5299_v45  ;;  %v5123_v44 = vor.u32 %v6117_v38, %v5120_v13  ;;  %v6141_v43 = vld [vmem:[#allocation5 + $0xa4c] sm:$0xf]  ;;  %v5216_v45 = vld [vmem:[#allocation5 + $0xa58] sm:$0xf0]  ;;  %v5470_v57 = vld [vmem:[#allocation8 + $0x50] sm:$0xf] }
 0x186   :  { %3057 = vmatmul.bf16.vlgmr.msra.gmra.mxu3 %v6596_v42  ;;  %v4995_v42 = vor.u32 %v6085_v10, %v4992_v11  ;;  %v5219_v52 = vor.u32 %v6141_v43, %v5216_v45  ;;  %v6133_v38 = vld [vmem:[#allocation5 + $0xa0c] sm:$0xf]  ;;  %v5312_v18 = vld [vmem:[#allocation5 + $0xb18] sm:$0xf0]  ;;  %v5534_v45 = vld [vmem:[#allocation8 + $0xd0] sm:$0xf] }
 0x187   :  { %3101 = vmatpush.bf16.msrb.mxu3 %v5427_v48  ;;  %3063 = vmatpush.bf16.msrb.mxu0 %v5027_v55  ;;  %v6672_v37 = vpop.f32.mrf.mxu2  ;;  %v4963_v48 = vor.u32 %v6077_v34, %v4960_v35  ;;  %v2813_v50 = vpop.f32.mrf.mxu0  ;;  %v6105_v55 = vld [vmem:[#allocation5 + $0x92c] sm:$0xf]  ;;  %v6211_v41 = vld [vmem:[#allocation8 + $0x74] sm:$0xf0]  ;;  %v5606_v35 = vld [vmem:[#allocation8 + $0x160] sm:$0xf] }
 0x188   :  { %v5075_v5 = vor.u32 %v6105_v55, %v5072_v61  ;;  %v6165_v13 = vld [vmem:[#allocation5 + $0xb0c] sm:$0xf]  ;;  %v6243_v21 = vld [vmem:[#allocation8 + $0x174] sm:$0xf0]  ;;  %v5598_v50 = vld [vmem:[#allocation8 + $0x150] sm:$0xf] }
 0x189   :  { %3076 = vmatpush.bf16.msrb.mxu1 %v5155_v58  ;;  %3089 = vmatpush.bf16.msrb.mxu2 %v5283_v60  ;;  %v6674_v46 = vpop.f32.mrf.mxu3  ;;  %v2826_v58 = vpop.f32.mrf.mxu1  ;;  %v5347_v60 = vor.u32 %v6173_v49, %v5344_v47  ;;  %v5315_v20 = vor.u32 %v6165_v13, %v5312_v18  ;;  %v6209_v26 = vld [vmem:[#allocation8 + $0x64] sm:$0xf0]  ;;  %v6207_v43 = vld [vmem:[#allocation8 + $0x54] sm:$0xf0]  ;;  %v5526_v55 = vld [vmem:[#allocation8 + $0xc0] sm:$0xf] }
 0x18a   :  { %v5479_v34 = vor.u32 %v6209_v26, %v5478_v24  ;;  %v6241_v36 = vld [vmem:[#allocation8 + $0x164] sm:$0xf0]  ;;  %v6223_v49 = vld [vmem:[#allocation8 + $0xd4] sm:$0xf0]  ;;  %v5590_v61 = vld [vmem:[#allocation8 + $0x140] sm:$0xf] }
 0x18b   :  { %3102 = vmatpush.bf16.msrb.mxu3 %v5411_v1  ;;  %3064 = vmatpush.bf16.msrb.mxu0 %v5011_v7  ;;  %v6169_v1 = vld [vmem:[#allocation5 + $0xb2c] sm:$0xf]  ;;  %v4928_v7 = vld [vmem:[#allocation5 + $0x818] sm:$0xf0]  ;;  %v5607_v47 = vor.u32 %v6241_v36, %v5606_v35  ;;  %v5535_v53 = vor.u32 %v6223_v49, %v5534_v45  ;;  %v5430_v35 = vld [vmem:[#allocation8] sm:$0xf] }
 0x18c   :  { %v5331_v11 = vor.u32 %v6169_v1, %v5328_v2  ;;  %v6237_v62 = vld [vmem:[#allocation8 + $0x144] sm:$0xf0]  ;;  %v5454_v2 = vld [vmem:[#allocation8 + $0x30] sm:$0xf]  ;;  %v5488_v45 = vld [vmem:[#allocation8 + $0x78] sm:$0xf0] }
 0x18d   :  { %3077 = vmatpush.bf16.msrb.mxu1 %v5139_v8  ;;  %3090 = vmatpush.bf16.msrb.mxu2 %v5267_v9  ;;  %v6101_v8 = vld [vmem:[#allocation5 + $0x90c] sm:$0xf]  ;;  %v5056_v9 = vld [vmem:[#allocation5 + $0x918] sm:$0xf0] }
 0x18e   :  { %v5059_v19 = vor.u32 %v6101_v8, %v5056_v9  ;;  %v5582_v9 = vld [vmem:[#allocation8 + $0x130] sm:$0xf]  ;;  %v6217_v18 = vld [vmem:[#allocation8 + $0xa4] sm:$0xf0] }
 0x18f   :  { %3103 = vmatpush.bf16.msrb.mxu3 %v5395_v12  ;;  %3065 = vmatpush.bf16.msrb.mxu0 %v4995_v42  ;;  %v2839_v10 = vpop.f32.mrf.mxu2  ;;  %v5184_v12 = vld [vmem:[#allocation5 + $0xa18] sm:$0xf0]  ;;  %v4931_v42 = vor.u32 %v6069_v4, %v4928_v7  ;;  %v5591_v7 = vor.u32 %v6237_v62, %v5590_v61  ;;  %v6197_v36 = vld [vmem:[#allocation8 + $0x4] sm:$0xf0]  ;;  %v6208_v62 = vld [vmem:[#allocation8 + $0x64] sm:$0xf] }
 0x190   :  { %v5187_v15 = vor.u32 %v6133_v38, %v5184_v12  ;;  %v6235_v10 = vld [vmem:[#allocation8 + $0x134] sm:$0xf0]  ;;  %v5446_v12 = vld [vmem:[#allocation8 + $0x20] sm:$0xf] }
 0x191   :  { %3078 = vmatpush.bf16.msrb.mxu1 %v5123_v44  ;;  %3091 = vmatpush.bf16.msrb.mxu2 %v5251_v14  ;;  %v2852_v59 = vpop.f32.mrf.mxu3  ;;  %v5550_v44 = vld [vmem:[#allocation8 + $0xf0] sm:$0xf]  ;;  %v6227_v14 = vld [vmem:[#allocation8 + $0xf4] sm:$0xf0] }
 0x192   :  { %v5551_v23 = vor.u32 %v6227_v14, %v5550_v44  ;;  %v5510_v59 = vld [vmem:[#allocation8 + $0xa0] sm:$0xf]  ;;  %v6233_v14 = vld [vmem:[#allocation8 + $0x124] sm:$0xf0] }
 0x193   :  { %3104 = vmatpush.bf16.msrb.mxu3 %v5379_v22  ;;  %3066 = vmatpush.bf16.msrb.mxu0 %v4979_v28  ;;  %v5487_v22 = vor.u32 %v6211_v41, %v5486_v56  ;;  %v5542_v28 = vld [vmem:[#allocation8 + $0xe0] sm:$0xf]  ;;  %v5583_v41 = vor.u32 %v6235_v10, %v5582_v9  ;;  %v6206_v10 = vld [vmem:[#allocation8 + $0x54] sm:$0xf] }
 0x194   :  { %v5574_v44 = vld [vmem:[#allocation8 + $0x120] sm:$0xf] }
 0x195   :  { %3079 = vmatpush.bf16.msrb.mxu1 %v5107_v31  ;;  %3092 = vmatpush.bf16.msrb.mxu2 %v5235_v32  ;;  %v6225_v31 = vld [vmem:[#allocation8 + $0xe4] sm:$0xf0]  ;;  %v5615_v32 = vor.u32 %v6243_v21, %v5614_v17  ;;  %v5502_v21 = vld [vmem:[#allocation8 + $0x90] sm:$0xf]  ;;  %v5575_v24 = vor.u32 %v6233_v14, %v5574_v44  ;;  %v6204_v44 = vld [vmem:[#allocation8 + $0x44] sm:$0xf] }
 0x196   :  { %v5464_v14 = vld [vmem:[#allocation8 + $0x48] sm:$0xf0] }
 0x197   :  { %3105 = vmatpush.bf16.msrb.mxu3 %v5363_v39  ;;  %3067 = vmatpush.bf16.msrb.mxu0 %v4963_v48  ;;  %v5543_v39 = vor.u32 %v6225_v31, %v5542_v28  ;;  %v5471_v48 = vor.u32 %v6207_v43, %v5470_v57  ;;  %v5566_v28 = vld [vmem:[#allocation8 + $0x110] sm:$0xf]  ;;  %v6231_v31 = vld [vmem:[#allocation8 + $0x114] sm:$0xf0]  ;;  %v6213_v57 = vld [vmem:[#allocation8 + $0x84] sm:$0xf0] }
 0x198   :  { %v6210_v43 = vld [vmem:[#allocation8 + $0x74] sm:$0xf] }
 0x199   :  { %3080 = vmatpush.bf16.msrb.mxu1 %v5091_v51  ;;  %3093 = vmatpush.bf16.msrb.mxu2 %v5219_v52  ;;  %v6239_v51 = vld [vmem:[#allocation8 + $0x154] sm:$0xf0]  ;;  %v6680_v52 = vld [vmem:[#allocation7] sm:$0xf] }
 0x19a   :  { %v5599_v58 = vor.u32 %v6239_v51, %v5598_v50  ;;  %v5567_v50 = vor.u32 %v6231_v31, %v5566_v28  ;;  %v5431_v51 = vor.u32 %v6197_v36, %v5430_v35  ;;  %v5456_v28 = vld [vmem:[#allocation8 + $0x38] sm:$0xf0] }
 0x19b   :  { %3106 = vmatpush.bf16.msrb.mxu3 %v5347_v60  ;;  %3068 = vmatpush.bf16.msrb.mxu0 %v4947_v3  ;;  %v6203_v3 = vld [vmem:[#allocation8 + $0x34] sm:$0xf0] }
 0x19c   :  { %v5455_v8 = vor.u32 %v6203_v3, %v5454_v2  ;;  %v5544_v2 = vld [vmem:[#allocation8 + $0xe8] sm:$0xf0] }
 0x19d   :  { %3081 = vmatpush.bf16.msrb.mxu1 %v5075_v5  ;;  %3094 = vmatpush.bf16.msrb.mxu2 %v5203_v6  ;;  %v5518_v5 = vld [vmem:[#allocation8 + $0xb0] sm:$0xf]  ;;  %v6219_v6 = vld [vmem:[#allocation8 + $0xb4] sm:$0xf0] }
 0x19e   :  { %v5519_v38 = vor.u32 %v6219_v6, %v5518_v5 }
 0x19f   :  { %3107 = vmatpush.bf16.msrb.mxu3 %v5331_v11  ;;  %3069 = vmatpush.bf16.msrb.mxu0 %v4931_v42  ;;  %v6683_v60 = vpop.f32.mrf.mxu0 }
 0x1a1   :  { %3082 = vmatpush.bf16.msrb.mxu1 %v5059_v19  ;;  %3095 = vmatpush.bf16.msrb.mxu2 %v5187_v15  ;;  %v6686_v4 = vpop.f32.mrf.mxu1 }
 0x1a2   :  { %3070 = vmatmul.bf16.vlgmr.msrb.gmra.mxu0 %v6604_v25  ;;  %v522_v25 = vperm.slane %v6680_v52, 2 }
 0x1a3   :  { %3108 = vmatpush.bf16.msrb.mxu3 %v5315_v20  ;;  %3512 = vmatpush.bf16.msra.mxu0 %v5487_v22  ;;  %v5438_v20 = vld [vmem:[#allocation8 + $0x10] sm:$0xf]  ;;  %v6199_v22 = vld [vmem:[#allocation8 + $0x14] sm:$0xf0] }
 0x1a4   :  { %3083 = vmatmul.bf16.vlgmr.msrb.gmra.mxu1 %v6608_v30  ;;  %3096 = vmatmul.bf16.vlgmr.msrb.gmra.mxu2 %v6606_v29  ;;  %v6205_v30 = vld [vmem:[#allocation8 + $0x44] sm:$0xf0]  ;;  %v2812_v0 = vadd.f32 %v6668_v27, %v522_v25  ;;  %v5439_v26 = vor.u32 %v6199_v22, %v5438_v20  ;;  %v5558_v25 = vld [vmem:[#allocation8 + $0x100] sm:$0xf] }
 0x1a5   :  { %3525 = vmatpush.bf16.msra.mxu1 %v5551_v23  ;;  %3538 = vmatpush.bf16.msra.mxu2 %v5615_v32  ;;  %v6221_v29 = vld [vmem:[#allocation8 + $0xc4] sm:$0xf0]  ;;  %v6215_v23 = vld [vmem:[#allocation8 + $0x94] sm:$0xf0] }
 0x1a6   :  { %3109 = vmatmul.bf16.vlgmr.msrb.gmra.mxu3 %v6610_v33  ;;  %v5463_v33 = vor.u32 %v6205_v30, %v5462_v54  ;;  %v5527_v1 = vor.u32 %v6221_v29, %v5526_v55  ;;  %v2825_v11 = vadd.f32 %v6670_v16, %v2812_v0  ;;  %v6201_v27 = vld [vmem:[#allocation8 + $0x24] sm:$0xf0]  ;;  %v5511_v16 = vor.u32 %v6217_v18, %v5510_v59  ;;  %v6242_v29 = vld [vmem:[#allocation8 + $0x174] sm:$0xf]  ;;  %v5480_v0 = vld [vmem:[#allocation8 + $0x68] sm:$0xf0] }
 0x1a7   :  { %3513 = vmatpush.bf16.msra.mxu0 %v5479_v34  ;;  %v6689_v13 = vpop.f32.mrf.mxu2  ;;  %v5447_v42 = vor.u32 %v6201_v27, %v5446_v12  ;;  %v2865_v19 = vpop.f32.mrf.mxu0  ;;  %v5503_v34 = vor.u32 %v6215_v23, %v5502_v21  ;;  %v5491_v55 = vor.u32 %v6210_v43, %v5488_v45  ;;  %v5536_v12 = vld [vmem:[#allocation8 + $0xd8] sm:$0xf0]  ;;  %v6238_v18 = vld [vmem:[#allocation8 + $0x154] sm:$0xf]  ;;  %v6236_v21 = vld [vmem:[#allocation8 + $0x144] sm:$0xf] }
 0x1a8   :  { %v2838_v15 = vadd.f32 %v6672_v37, %v2825_v11  ;;  %v5494_v37 = vld [vmem:[#allocation8 + $0x80] sm:$0xf]  ;;  %v5472_v11 = vld [vmem:[#allocation8 + $0x58] sm:$0xf0]  ;;  %v6220_v19 = vld [vmem:[#allocation8 + $0xc4] sm:$0xf] }
 0x1a9   :  { %3526 = vmatpush.bf16.msra.mxu1 %v5543_v39  ;;  %3539 = vmatpush.bf16.msra.mxu2 %v5607_v47  ;;  %v6691_v56 = vpop.f32.mrf.mxu3  ;;  %v2878_v17 = vpop.f32.mrf.mxu1  ;;  %v6226_v47 = vld [vmem:[#allocation8 + $0xf4] sm:$0xf]  ;;  %v5495_v30 = vor.u32 %v6213_v57, %v5494_v37  ;;  %v5475_v59 = vor.u32 %v6206_v10, %v5472_v11  ;;  %v5592_v23 = vld [vmem:[#allocation8 + $0x148] sm:$0xf0]  ;;  %v6200_v57 = vld [vmem:[#allocation8 + $0x24] sm:$0xf] }
 0x1aa   :  { %v2851_v32 = vadd.f32 %v6674_v46, %v2838_v15  ;;  %v3114_v46 = vmax.f32 %v6641_v40, 0.0  ;;  %v5528_v15 = vld [vmem:[#allocation8 + $0xc8] sm:$0xf0]  ;;  %v5467_v17 = vor.u32 %v6204_v44, %v5464_v14  ;;  %v5595_v35 = vor.u32 %v6236_v21, %v5592_v23  ;;  %v6234_v37 = vld [vmem:[#allocation8 + $0x134] sm:$0xf] }
 0x1ab   :  { %3514 = vmatpush.bf16.msra.mxu0 %v5471_v48  ;;  %v5552_v48 = vld [vmem:[#allocation8 + $0xf8] sm:$0xf0]  ;;  %v5448_v43 = vld [vmem:[#allocation8 + $0x28] sm:$0xf0]  ;;  %v6257_v10 = vld [vmem:[#allocation8 + $0x1e4] sm:$0xf0] }
 0x1ac   :  { %v2864_v54 = vadd.f32 %v6683_v60, %v2851_v32  ;;  %v5555_v61 = vor.u32 %v6226_v47, %v5552_v48  ;;  %v6698_v6 = vpack.c.bf16 %v3114_v46, %v3114_v46  ;;  %v5483_v60 = vor.u32 %v6208_v62, %v5480_v0  ;;  %v6218_v32 = vld [vmem:[#allocation8 + $0xb4] sm:$0xf]  ;;  %v5512_v47 = vld [vmem:[#allocation8 + $0xa8] sm:$0xf0]  ;;  %v5440_v62 = vld [vmem:[#allocation8 + $0x18] sm:$0xf0] }
 0x1ad   :  { %3527 = vmatpush.bf16.msra.mxu1 %v5535_v53  ;;  %3540 = vmatpush.bf16.msra.mxu2 %v5599_v58  ;;  %v6229_v53 = vld [vmem:[#allocation8 + $0x104] sm:$0xf0]  ;;  %v5616_v58 = vld [vmem:[#allocation8 + $0x178] sm:$0xf0]  ;;  %v6228_v14 = vld [vmem:[#allocation8 + $0x104] sm:$0xf] }
 0x1ae   :  { %v5559_v3 = vor.u32 %v6229_v53, %v5558_v25  ;;  %v5619_v5 = vor.u32 %v6242_v29, %v5616_v58  ;;  %v2877_v40 = vadd.f32 %v6686_v4, %v2864_v54  ;;  %v6259_v25 = vld [vmem:[#allocation8 + $0x1f4] sm:$0xf0]  ;;  %v5451_v54 = vor.u32 %v6200_v57, %v5448_v43  ;;  %v5630_v57 = vld [vmem:[#allocation8 + $0x190] sm:$0xf] }
 0x1af   :  { %3515 = vmatpush.bf16.msra.mxu0 %v5463_v33  ;;  %v2891_v39 = vpop.f32.mrf.mxu2  ;;  %v3115_v33 = vmax.f32 %v6662_v63, 0.0  ;;  %v6247_v43 = vld [vmem:[#allocation8 + $0x194] sm:$0xf0] }
 0x1b0   :  { %v2890_v27 = vadd.f32 %v6689_v13, %v2877_v40  ;;  %v5531_v13 = vor.u32 %v6220_v19, %v5528_v15  ;;  %v5584_v39 = vld [vmem:[#allocation8 + $0x138] sm:$0xf0]  ;;  %v6230_v40 = vld [vmem:[#allocation8 + $0x114] sm:$0xf]  ;;  %v5560_v19 = vld [vmem:[#allocation8 + $0x108] sm:$0xf0] }
 0x1b1   :  { %3528 = vmatpush.bf16.msra.mxu1 %v5527_v1  ;;  %3541 = vmatpush.bf16.msra.mxu2 %v5591_v7  ;;  %v2904_v49 = vpop.f32.mrf.mxu3  ;;  %v6224_v1 = vld [vmem:[#allocation8 + $0xe4] sm:$0xf]  ;;  %v6701_v9 = vpack.c.bf16 %v3115_v33, %v3115_v33 }
 0x1b2   :  { %v6240_v7 = vld [vmem:[#allocation8 + $0x164] sm:$0xf]  ;;  %v5547_v63 = vor.u32 %v6224_v1, %v5544_v2  ;;  %v2903_v20 = vadd.f32 %v6691_v56, %v2890_v27  ;;  %v6214_v2 = vld [vmem:[#allocation8 + $0x94] sm:$0xf] }
 0x1b3   :  { %3516 = vmatpush.bf16.msra.mxu0 %v5455_v8  ;;  %v5608_v8 = vld [vmem:[#allocation8 + $0x168] sm:$0xf0]  ;;  %v6216_v49 = vld [vmem:[#allocation8 + $0xa4] sm:$0xf] }
 0x1b4   :  { %v5611_v4 = vor.u32 %v6240_v7, %v5608_v8  ;;  %v5515_v33 = vor.u32 %v6216_v49, %v5512_v47  ;;  %v5631_v47 = vor.u32 %v6247_v43, %v5630_v57 }
 0x1b5   :  { %3529 = vmatpush.bf16.msra.mxu1 %v5519_v38  ;;  %3542 = vmatpush.bf16.msra.mxu2 %v5583_v41  ;;  %v6222_v38 = vld [vmem:[#allocation8 + $0xd4] sm:$0xf]  ;;  %v5600_v41 = vld [vmem:[#allocation8 + $0x158] sm:$0xf0] }
 0x1b7   :  { %3517 = vmatpush.bf16.msra.mxu0 %v5447_v42  ;;  %v5539_v42 = vor.u32 %v6222_v38, %v5536_v12  ;;  %v6196_v38 = vld [vmem:[#allocation8 + $0x4] sm:$0xf]  ;;  %v5432_v12 = vld [vmem:[#allocation8 + $0x8] sm:$0xf0] }
 0x1b8   :  { %v5435_v44 = vor.u32 %v6196_v38, %v5432_v12 }
 0x1b9   :  { %3530 = vmatpush.bf16.msra.mxu1 %v5511_v16  ;;  %3543 = vmatpush.bf16.msra.mxu2 %v5575_v24  ;;  %v5603_v16 = vor.u32 %v6238_v18, %v5600_v41  ;;  %v5496_v18 = vld [vmem:[#allocation8 + $0x88] sm:$0xf0] }
 0x1bb   :  { %3518 = vmatpush.bf16.msra.mxu0 %v5439_v26  ;;  %v6202_v26 = vld [vmem:[#allocation8 + $0x34] sm:$0xf] }
 0x1bc   :  { %v5459_v36 = vor.u32 %v6202_v26, %v5456_v28  ;;  %v6253_v26 = vld [vmem:[#allocation8 + $0x1c4] sm:$0xf0] }
 0x1bd   :  { %3531 = vmatpush.bf16.msra.mxu1 %v5503_v34  ;;  %3544 = vmatpush.bf16.msra.mxu2 %v5567_v50  ;;  %v5520_v34 = vld [vmem:[#allocation8 + $0xb8] sm:$0xf0]  ;;  %v5587_v50 = vor.u32 %v6234_v37, %v5584_v39  ;;  %v6249_v39 = vld [vmem:[#allocation8 + $0x1a4] sm:$0xf0] }
 0x1be   :  { %v5523_v56 = vor.u32 %v6218_v32, %v5520_v34  ;;  %v5646_v34 = vld [vmem:[#allocation8 + $0x1b0] sm:$0xf] }
 0x1bf   :  { %3519 = vmatpush.bf16.msra.mxu0 %v5431_v51  ;;  %v2915_v22 = vpop.f32.mrf.mxu0  ;;  %v5678_v51 = vld [vmem:[#allocation8 + $0x1f0] sm:$0xf] }
 0x1c0   :  { %v2916_v31 = vadd.f32 %v2915_v22, %v2903_v20  ;;  %v5679_v58 = vor.u32 %v6259_v25, %v5678_v51  ;;  %v5563_v20 = vor.u32 %v6228_v14, %v5560_v19  ;;  %v5662_v22 = vld [vmem:[#allocation8 + $0x1d0] sm:$0xf]  ;;  %v6258_v25 = vld [vmem:[#allocation8 + $0x1f4] sm:$0xf] }
 0x1c1   :  { %3532 = vmatpush.bf16.msra.mxu1 %v5495_v30  ;;  %3545 = vmatpush.bf16.msra.mxu2 %v5559_v3  ;;  %v2928_v24 = vpop.f32.mrf.mxu1  ;;  %v6232_v30 = vld [vmem:[#allocation8 + $0x124] sm:$0xf]  ;;  %v5504_v3 = vld [vmem:[#allocation8 + $0x98] sm:$0xf0] }
 0x1c2   :  { %3520 = vmatmul.bf16.vlgmr.msra.gmra.mxu0 %v6698_v6  ;;  %v2929_v45 = vadd.f32 %v2928_v24, %v2916_v31  ;;  %3551 = vmatpush.bf16.msra.mxu3 %v5679_v58  ;;  %v5507_v11 = vor.u32 %v6214_v2, %v5504_v3  ;;  %v5654_v24 = vld [vmem:[#allocation8 + $0x1c0] sm:$0xf] }
 0x1c3   :  { %3564 = vmatpush.bf16.msrb.mxu0 %v5491_v55  ;;  %v5576_v55 = vld [vmem:[#allocation8 + $0x128] sm:$0xf0]  ;;  %v5655_v31 = vor.u32 %v6253_v26, %v5654_v24 }
 0x1c4   :  { %3533 = vmatmul.bf16.vlgmr.msra.gmra.mxu1 %v6701_v9 }
 0x1c5   :  { %3577 = vmatpush.bf16.msrb.mxu1 %v5555_v61  ;;  %3590 = vmatpush.bf16.msrb.mxu2 %v5619_v5  ;;  %v6198_v61 = vld [vmem:[#allocation8 + $0x14] sm:$0xf]  ;;  %v5579_v5 = vor.u32 %v6232_v30, %v5576_v55  ;;  %v6256_v30 = vld [vmem:[#allocation8 + $0x1e4] sm:$0xf]  ;;  %v5672_v55 = vld [vmem:[#allocation8 + $0x1e8] sm:$0xf0] }
 0x1c6   :  { %v5443_v8 = vor.u32 %v6198_v61, %v5440_v62  ;;  %v6254_v62 = vld [vmem:[#allocation8 + $0x1d4] sm:$0xf] }
 0x1c7   :  { %3565 = vmatpush.bf16.msrb.mxu0 %v5483_v60  ;;  %v2941_v48 = vpop.f32.mrf.mxu2  ;;  %v2917_v29 = vpop.f32.mrf.mxu0  ;;  %v5568_v60 = vld [vmem:[#allocation8 + $0x118] sm:$0xf0] }
 0x1c8   :  { %v2942_v53 = vadd.f32 %v2941_v48, %v2929_v45  ;;  %v5571_v41 = vor.u32 %v6230_v40, %v5568_v60  ;;  %v5622_v48 = vld [vmem:[#allocation8 + $0x180] sm:$0xf]  ;;  %v6252_v40 = vld [vmem:[#allocation8 + $0x1c4] sm:$0xf]  ;;  %v5656_v60 = vld [vmem:[#allocation8 + $0x1c8] sm:$0xf0] }
 0x1c9   :  { %3578 = vmatpush.bf16.msrb.mxu1 %v5547_v63  ;;  %3591 = vmatpush.bf16.msrb.mxu2 %v5611_v4  ;;  %v2954_v46 = vpop.f32.mrf.mxu3  ;;  %v2930_v0 = vpop.f32.mrf.mxu1  ;;  %v5670_v63 = vld [vmem:[#allocation8 + $0x1e0] sm:$0xf] }
 0x1ca   :  { %v2955_v1 = vadd.f32 %v2954_v46, %v2942_v53  ;;  %v5671_v4 = vor.u32 %v6257_v10, %v5670_v63  ;;  %v5680_v53 = vld [vmem:[#allocation8 + $0x1f8] sm:$0xf0]  ;;  %v523_v46 = vperm.slane %v6680_v52, 3  ;;  %v6250_v10 = vld [vmem:[#allocation8 + $0x1b4] sm:$0xf] }
 0x1cb   :  { %3566 = vmatpush.bf16.msrb.mxu0 %v5475_v59  ;;  %v6212_v59 = vld [vmem:[#allocation8 + $0x84] sm:$0xf]  ;;  %v5664_v0 = vld [vmem:[#allocation8 + $0x1d8] sm:$0xf0] }
 0x1cc   :  { %v3116_v7 = vmax.f32 %v2955_v1, 0.0  ;;  %3552 = vmatpush.bf16.msra.mxu3 %v5671_v4  ;;  %v5667_v2 = vor.u32 %v6254_v62, %v5664_v0  ;;  %v6248_v4 = vld [vmem:[#allocation8 + $0x1a4] sm:$0xf]  ;;  %v5726_v0 = vld [vmem:[#allocation11 + $0x50] sm:$0xf] }
 0x1cd   :  { %3579 = vmatpush.bf16.msrb.mxu1 %v5539_v42  ;;  %3592 = vmatpush.bf16.msrb.mxu2 %v5603_v16  ;;  %v5499_v16 = vor.u32 %v6212_v59, %v5496_v18 }
 0x1ce   :  { %v3120_v27 = vpack.c.bf16 %v3116_v7, %v3116_v7 }
 0x1cf   :  { %3567 = vmatpush.bf16.msrb.mxu0 %v5467_v17  ;;  %v2943_v42 = vpop.f32.mrf.mxu2  ;;  %v6255_v17 = vld [vmem:[#allocation8 + $0x1d4] sm:$0xf0] }
 0x1d0   :  { %3546 = vmatmul.bf16.vlgmr.msra.gmra.mxu2 %v3120_v27  ;;  %v5663_v23 = vor.u32 %v6255_v17, %v5662_v22  ;;  %v6246_v42 = vld [vmem:[#allocation8 + $0x194] sm:$0xf] }
 0x1d1   :  { %3580 = vmatpush.bf16.msrb.mxu1 %v5531_v13  ;;  %3593 = vmatpush.bf16.msrb.mxu2 %v5595_v35  ;;  %v2956_v15 = vpop.f32.mrf.mxu3  ;;  %v6251_v35 = vld [vmem:[#allocation8 + $0x1b4] sm:$0xf0] }
 0x1d2   :  { %3553 = vmatpush.bf16.msra.mxu3 %v5663_v23  ;;  %v6244_v15 = vld [vmem:[#allocation8 + $0x184] sm:$0xf] }
 0x1d3   :  { %3568 = vmatpush.bf16.msrb.mxu0 %v5459_v36  ;;  %v5647_v36 = vor.u32 %v6251_v35, %v5646_v34 }
 0x1d5   :  { %3581 = vmatpush.bf16.msrb.mxu1 %v5523_v56  ;;  %3594 = vmatpush.bf16.msrb.mxu2 %v5587_v50  ;;  %v6245_v50 = vld [vmem:[#allocation8 + $0x184] sm:$0xf0] }
 0x1d6   :  { %3554 = vmatpush.bf16.msra.mxu3 %v5655_v31  ;;  %v5623_v51 = vor.u32 %v6245_v50, %v5622_v48 }
 0x1d7   :  { %3569 = vmatpush.bf16.msrb.mxu0 %v5451_v54  ;;  %v5683_v54 = vor.u32 %v6258_v25, %v5680_v53  ;;  %v6275_v25 = vld [vmem:[#allocation11 + $0x74] sm:$0xf0]  ;;  %v6274_v53 = vld [vmem:[#allocation11 + $0x74] sm:$0xf] }
 0x1d9   :  { %3582 = vmatpush.bf16.msrb.mxu1 %v5515_v33  ;;  %3595 = vmatpush.bf16.msrb.mxu2 %v5579_v5  ;;  %v5675_v33 = vor.u32 %v6256_v30, %v5672_v55  ;;  %v5734_v30 = vld [vmem:[#allocation11 + $0x60] sm:$0xf]  ;;  %v6273_v55 = vld [vmem:[#allocation11 + $0x64] sm:$0xf0] }
 0x1da   :  { %3555 = vmatpush.bf16.msra.mxu3 %v5647_v36 }
 0x1db   :  { %3570 = vmatpush.bf16.msrb.mxu0 %v5443_v8  ;;  %v5659_v8 = vor.u32 %v6252_v40, %v5656_v60  ;;  %v5806_v40 = vld [vmem:[#allocation11 + $0xf0] sm:$0xf]  ;;  %v6291_v60 = vld [vmem:[#allocation11 + $0xf4] sm:$0xf0] }
 0x1dd   :  { %3583 = vmatpush.bf16.msrb.mxu1 %v5507_v11  ;;  %3596 = vmatpush.bf16.msrb.mxu2 %v5571_v41  ;;  %v5648_v11 = vld [vmem:[#allocation8 + $0x1b8] sm:$0xf0] }
 0x1de   :  { %v5651_v12 = vor.u32 %v6250_v10, %v5648_v11 }
 0x1df   :  { %3571 = vmatpush.bf16.msrb.mxu0 %v5435_v44  ;;  %v2967_v21 = vpop.f32.mrf.mxu0  ;;  %v5632_v44 = vld [vmem:[#allocation8 + $0x198] sm:$0xf0] }
 0x1e0   :  { %v2968_v29 = vadd.f32 %v2967_v21, %v523_v46  ;;  %v5635_v19 = vor.u32 %v6246_v42, %v5632_v44  ;;  %v5720_v42 = vld [vmem:[#allocation11 + $0x48] sm:$0xf0]  ;;  %v6289_v44 = vld [vmem:[#allocation11 + $0xe4] sm:$0xf0] }
 0x1e1   :  { %3584 = vmatpush.bf16.msrb.mxu1 %v5499_v16  ;;  %3597 = vmatpush.bf16.msrb.mxu2 %v5563_v20  ;;  %v2980_v13 = vpop.f32.mrf.mxu1  ;;  %v5624_v16 = vld [vmem:[#allocation8 + $0x188] sm:$0xf0] }
 0x1e2   :  { %3572 = vmatmul.bf16.vlgmr.msrb.gmra.mxu0 %v6698_v6  ;;  %v2981_v1 = vadd.f32 %v2980_v13, %v2968_v29  ;;  %v5627_v22 = vor.u32 %v6244_v15, %v5624_v16  ;;  %v6288_v16 = vld [vmem:[#allocation11 + $0xe4] sm:$0xf] }
 0x1e4   :  { %3585 = vmatmul.bf16.vlgmr.msrb.gmra.mxu1 %v6701_v9  ;;  %3598 = vmatmul.bf16.vlgmr.msrb.gmra.mxu2 %v3120_v27  ;;  %v5638_v9 = vld [vmem:[#allocation8 + $0x1a0] sm:$0xf]  ;;  %v5640_v27 = vld [vmem:[#allocation8 + $0x1a8] sm:$0xf0] }
 0x1e5   :  { %v5639_v56 = vor.u32 %v6249_v39, %v5638_v9  ;;  %v5643_v41 = vor.u32 %v6248_v4, %v5640_v27  ;;  %v5798_v27 = vld [vmem:[#allocation11 + $0xe0] sm:$0xf] }
 0x1e6   :  { %v5799_v15 = vor.u32 %v6289_v44, %v5798_v27  ;;  %v6281_v27 = vld [vmem:[#allocation11 + $0xa4] sm:$0xf0] }
 0x1e7   :  { %v2993_v28 = vpop.f32.mrf.mxu2  ;;  %v2969_v6 = vpop.f32.mrf.mxu0  ;;  %3556 = vmatpush.bf16.msra.mxu3 %v5639_v56  ;;  %v3186_v56 = vld [vmem:[#allocation10] sm:$0x3] }
 0x1e8   :  { %v2994_v7 = vadd.f32 %v2993_v28, %v2981_v1  ;;  %v3188_v57 = vperm.slane %v3186_v56, 0  ;;  %v6271_v1 = vld [vmem:[#allocation11 + $0x54] sm:$0xf0] }
 0x1e9   :  { %v3006_v32 = vpop.f32.mrf.mxu3  ;;  %v2982_v37 = vpop.f32.mrf.mxu1 }
 0x1ea   :  { %v3007_v38 = vadd.f32 %v3006_v32, %v2994_v7  ;;  %v5727_v7 = vor.u32 %v6271_v1, %v5726_v0  ;;  %v6285_v1 = vld [vmem:[#allocation11 + $0xc4] sm:$0xf0] }
 0x1eb   :  { %3557 = vmatpush.bf16.msra.mxu3 %v5631_v47 }
 0x1ef   :  { %v2995_v45 = vpop.f32.mrf.mxu2  ;;  %3558 = vmatpush.bf16.msra.mxu3 %v5623_v51  ;;  %v5742_v51 = vld [vmem:[#allocation11 + $0x70] sm:$0xf] }
 0x1f0   :  { %v5743_v46 = vor.u32 %v6275_v25, %v5742_v51  ;;  %v6287_v25 = vld [vmem:[#allocation11 + $0xd4] sm:$0xf0] }
 0x1f1   :  { %v3008_v49 = vpop.f32.mrf.mxu3 }
 0x1f2   :  { %3818 = vmatpush.bf16.msra.mxu0 %v5743_v46  ;;  %v5696_v46 = vld [vmem:[#allocation11 + $0x18] sm:$0xf0] }
 0x1f3   :  { %3603 = vmatpush.bf16.msrb.mxu3 %v5683_v54  ;;  %v5744_v54 = vld [vmem:[#allocation11 + $0x78] sm:$0xf0] }
 0x1f4   :  { %v5747_v29 = vor.u32 %v6274_v53, %v5744_v54  ;;  %v6262_v53 = vld [vmem:[#allocation11 + $0x14] sm:$0xf] }
 0x1f6   :  { %3844 = vmatpush.bf16.msra.mxu2 %v5747_v29  ;;  %v5792_v29 = vld [vmem:[#allocation11 + $0xd8] sm:$0xf0] }
 0x1f7   :  { %3604 = vmatpush.bf16.msrb.mxu3 %v5675_v33  ;;  %v5736_v33 = vld [vmem:[#allocation11 + $0x68] sm:$0xf0] }
 0x1fb   :  { %3605 = vmatpush.bf16.msrb.mxu3 %v5667_v2  ;;  %v6270_v2 = vld [vmem:[#allocation11 + $0x54] sm:$0xf] }
 0x1ff   :  { %v3019_v58 = vpop.f32.mrf.mxu0  ;;  %3606 = vmatpush.bf16.msrb.mxu3 %v5659_v8  ;;  %v6290_v8 = vld [vmem:[#allocation11 + $0xf4] sm:$0xf] }
 0x200   :  { %v3020_v14 = vadd.f32 %v3019_v58, %v3007_v38  ;;  %v6272_v58 = vld [vmem:[#allocation11 + $0x64] sm:$0xf]  ;;  %v5718_v38 = vld [vmem:[#allocation11 + $0x40] sm:$0xf] }
 0x201   :  { %v3032_v61 = vpop.f32.mrf.mxu1  ;;  %v5739_v62 = vor.u32 %v6272_v58, %v5736_v33  ;;  %v5686_v33 = vld [vmem:[#allocation11] sm:$0xf] }
 0x202   :  { %v3033_v20 = vadd.f32 %v3032_v61, %v3020_v14  ;;  %v5735_v61 = vor.u32 %v6273_v55, %v5734_v30  ;;  %v5699_v30 = vor.u32 %v6262_v53, %v5696_v46  ;;  %v6286_v55 = vld [vmem:[#allocation11 + $0xd4] sm:$0xf] }
 0x203   :  { %3607 = vmatpush.bf16.msrb.mxu3 %v5651_v12  ;;  %3845 = vmatpush.bf16.msra.mxu2 %v5739_v62  ;;  %v6269_v12 = vld [vmem:[#allocation11 + $0x44] sm:$0xf0]  ;;  %v5795_v58 = vor.u32 %v6286_v55, %v5792_v29  ;;  %v5782_v62 = vld [vmem:[#allocation11 + $0xc0] sm:$0xf] }
 0x204   :  { %3819 = vmatpush.bf16.msra.mxu0 %v5735_v61  ;;  %v6261_v61 = vld [vmem:[#allocation11 + $0x4] sm:$0xf0] }
 0x205   :  { %v5687_v0 = vor.u32 %v6261_v61, %v5686_v33 }
 0x207   :  { %v3045_v3 = vpop.f32.mrf.mxu2  ;;  %v3021_v52 = vpop.f32.mrf.mxu0  ;;  %3608 = vmatpush.bf16.msrb.mxu3 %v5643_v41  ;;  %v6268_v41 = vld [vmem:[#allocation11 + $0x44] sm:$0xf] }
 0x208   :  { %v3046_v17 = vadd.f32 %v3045_v3, %v3033_v20  ;;  %v5728_v3 = vld [vmem:[#allocation11 + $0x58] sm:$0xf0]  ;;  %v5807_v52 = vor.u32 %v6291_v60, %v5806_v40  ;;  %v5800_v20 = vld [vmem:[#allocation11 + $0xe8] sm:$0xf0]  ;;  %3820 = vmatpush.bf16.msra.mxu0 %v5727_v7  ;;  %v6284_v60 = vld [vmem:[#allocation11 + $0xc4] sm:$0xf] }
 0x209   :  { %v3058_v5 = vpop.f32.mrf.mxu3  ;;  %v3034_v63 = vpop.f32.mrf.mxu1  ;;  %v5731_v11 = vor.u32 %v6270_v2, %v5728_v3  ;;  %v6260_v2 = vld [vmem:[#allocation11 + $0x4] sm:$0xf]  ;;  %v5688_v3 = vld [vmem:[#allocation11 + $0x8] sm:$0xf0] }
 0x20a   :  { %v3059_v21 = vadd.f32 %v3058_v5, %v3046_v17  ;;  %v3189_v5 = vperm.slane %v3186_v56, 1  ;;  %v5808_v63 = vld [vmem:[#allocation11 + $0xf8] sm:$0xf0]  ;;  %3831 = vmatpush.bf16.msra.mxu1 %v5807_v52  ;;  %v5803_v17 = vor.u32 %v6288_v16, %v5800_v20  ;;  %v5691_v40 = vor.u32 %v6260_v2, %v5688_v3  ;;  %v5784_v7 = vld [vmem:[#allocation11 + $0xc8] sm:$0xf0] }
 0x20b   :  { %3609 = vmatpush.bf16.msrb.mxu3 %v5635_v19  ;;  %v5811_v4 = vor.u32 %v6290_v8, %v5808_v63  ;;  %3846 = vmatpush.bf16.msra.mxu2 %v5731_v11  ;;  %v5787_v52 = vor.u32 %v6284_v60, %v5784_v7  ;;  %v5774_v8 = vld [vmem:[#allocation11 + $0xb0] sm:$0xf]  ;;  %v6283_v63 = vld [vmem:[#allocation11 + $0xb4] sm:$0xf0]  ;;  %v5760_v20 = vld [vmem:[#allocation11 + $0x98] sm:$0xf0] }
 0x20c   :  { %v5775_v11 = vor.u32 %v6283_v63, %v5774_v8 }
 0x20e   :  { %3832 = vmatpush.bf16.msra.mxu1 %v5799_v15  ;;  %v6278_v15 = vld [vmem:[#allocation11 + $0x94] sm:$0xf] }
 0x20f   :  { %v3047_v59 = vpop.f32.mrf.mxu2  ;;  %3610 = vmatpush.bf16.msrb.mxu3 %v5627_v22  ;;  %v5719_v22 = vor.u32 %v6269_v12, %v5718_v38  ;;  %v5776_v38 = vld [vmem:[#allocation11 + $0xb8] sm:$0xf0] }
 0x211   :  { %v3060_v18 = vpop.f32.mrf.mxu3  ;;  %3821 = vmatpush.bf16.msra.mxu0 %v5719_v22  ;;  %v5763_v22 = vor.u32 %v6278_v15, %v5760_v20 }
 0x21f   :  { %v3071_v23 = vpop.f32.mrf.mxu0 }
 0x220   :  { %v3072_v24 = vadd.f32 %v3071_v23, %v3059_v21  ;;  %v5723_v23 = vor.u32 %v6268_v41, %v5720_v42  ;;  %v5768_v41 = vld [vmem:[#allocation11 + $0xa8] sm:$0xf0] }
 0x221   :  { %v3084_v13 = vpop.f32.mrf.mxu1 }
 0x222   :  { %v3085_v26 = vadd.f32 %v3084_v13, %v3072_v24  ;;  %v5710_v13 = vld [vmem:[#allocation11 + $0x30] sm:$0xf]  ;;  %v6267_v24 = vld [vmem:[#allocation11 + $0x34] sm:$0xf0]  ;;  %3847 = vmatpush.bf16.msra.mxu2 %v5723_v23  ;;  %v6276_v23 = vld [vmem:[#allocation11 + $0x84] sm:$0xf] }
 0x227   :  { %v3097_v28 = vpop.f32.mrf.mxu2  ;;  %v3073_v34 = vpop.f32.mrf.mxu0 }
 0x228   :  { %v3098_v31 = vadd.f32 %v3097_v28, %v3085_v26  ;;  %v6266_v26 = vld [vmem:[#allocation11 + $0x34] sm:$0xf]  ;;  %v5712_v28 = vld [vmem:[#allocation11 + $0x38] sm:$0xf0] }
 0x229   :  { %v3110_v32 = vpop.f32.mrf.mxu3  ;;  %v3086_v35 = vpop.f32.mrf.mxu1  ;;  %v5715_v34 = vor.u32 %v6266_v26, %v5712_v28 }
 0x22a   :  { %v3111_v36 = vadd.f32 %v3110_v32, %v3098_v31  ;;  %v5711_v31 = vor.u32 %v6267_v24, %v5710_v13  ;;  %v5702_v35 = vld [vmem:[#allocation11 + $0x20] sm:$0xf]  ;;  %v5752_v24 = vld [vmem:[#allocation11 + $0x88] sm:$0xf0] }
 0x22b   :  { %3848 = vmatpush.bf16.msra.mxu2 %v5715_v34  ;;  %v5755_v26 = vor.u32 %v6276_v23, %v5752_v24 }
 0x22c   :  { %v3117_v6 = vmax.f32 %v3111_v36, 0.0  ;;  %v6265_v36 = vld [vmem:[#allocation11 + $0x24] sm:$0xf0]  ;;  %3822 = vmatpush.bf16.msra.mxu0 %v5711_v31 }
 0x22d   :  { %v5703_v56 = vor.u32 %v6265_v36, %v5702_v35 }
 0x22e   :  { %v3121_v37 = vpack.c.bf16 %v3117_v6, %v3117_v6 }
 0x22f   :  { %v3099_v9 = vpop.f32.mrf.mxu2 }
 0x230   :  { %3559 = vmatmul.bf16.vlgmr.msra.gmra.mxu3 %v3121_v37  ;;  %v5704_v9 = vld [vmem:[#allocation11 + $0x28] sm:$0xf0]  ;;  %3823 = vmatpush.bf16.msra.mxu0 %v5703_v56 }
 0x231   :  { %v3112_v39 = vpop.f32.mrf.mxu3  ;;  %3857 = vmatpush.bf16.msra.mxu3 %v5811_v4  ;;  %v5766_v4 = vld [vmem:[#allocation11 + $0xa0] sm:$0xf] }
 0x232   :  { %v5767_v42 = vor.u32 %v6281_v27, %v5766_v4 }
 0x235   :  { %3858 = vmatpush.bf16.msra.mxu3 %v5803_v17  ;;  %v5750_v17 = vld [vmem:[#allocation11 + $0x80] sm:$0xf] }
 0x239   :  { %3859 = vmatpush.bf16.msra.mxu3 %v5795_v58 }
 0x23d   :  { %3860 = vmatpush.bf16.msra.mxu3 %v5787_v52 }
 0x23f   :  { %v3521_v43 = vpop.f32.mrf.mxu0 }
 0x240   :  { %v3522_v45 = vadd.f32 %v3521_v43, %v3188_v57  ;;  %3611 = vmatmul.bf16.vlgmr.msrb.gmra.mxu3 %v3121_v37  ;;  %v6264_v37 = vld [vmem:[#allocation11 + $0x24] sm:$0xf] }
 0x241   :  { %v3534_v49 = vpop.f32.mrf.mxu1  ;;  %v5707_v57 = vor.u32 %v6264_v37, %v5704_v9 }
 0x242   :  { %v3535_v47 = vadd.f32 %v3534_v49, %v3522_v45 }
 0x243   :  { %3849 = vmatpush.bf16.msra.mxu2 %v5707_v57 }
 0x247   :  { %v3523_v48 = vpop.f32.mrf.mxu0  ;;  %3850 = vmatpush.bf16.msra.mxu2 %v5699_v30 }
 0x248   :  { %v6263_v48 = vld [vmem:[#allocation11 + $0x14] sm:$0xf0] }
 0x249   :  { %v3536_v50 = vpop.f32.mrf.mxu1 }
 0x24a   :  { %v5790_v50 = vld [vmem:[#allocation11 + $0xd0] sm:$0xf] }
 0x24b   :  { %v5791_v54 = vor.u32 %v6287_v25, %v5790_v50  ;;  %3851 = vmatpush.bf16.msra.mxu2 %v5691_v40 }
 0x24d   :  { %3833 = vmatpush.bf16.msra.mxu1 %v5791_v54 }
 0x253   :  { %v3547_v10 = vpop.f32.mrf.mxu2 }
 0x254   :  { %v6710_v18 = vadd.f32 %v3547_v10, %v3535_v47  ;;  %v5694_v47 = vld [vmem:[#allocation11 + $0x10] sm:$0xf]  ;;  %v6282_v10 = vld [vmem:[#allocation11 + $0xb4] sm:$0xf] }
 0x255   :  { %v5695_v51 = vor.u32 %v6263_v48, %v5694_v47  ;;  %v5779_v12 = vor.u32 %v6282_v10, %v5776_v38 }
 0x257   :  { %3824 = vmatpush.bf16.msra.mxu0 %v5695_v51  ;;  %3861 = vmatpush.bf16.msra.mxu3 %v5779_v12 }
 0x25b   :  { %v3549_v32 = vpop.f32.mrf.mxu2  ;;  %3825 = vmatpush.bf16.msra.mxu0 %v5687_v0 }
 0x25f   :  { %v3573_v59 = vpop.f32.mrf.mxu0 }
 0x260   :  { %v3574_v14 = vadd.f32 %v3573_v59, %v3189_v5  ;;  %v5783_v5 = vor.u32 %v6285_v1, %v5782_v62  ;;  %v6280_v59 = vld [vmem:[#allocation11 + $0xa4] sm:$0xf] }
 0x261   :  { %v3586_v19 = vpop.f32.mrf.mxu1  ;;  %v5771_v44 = vor.u32 %v6280_v59, %v5768_v41 }
 0x262   :  { %v3587_v21 = vadd.f32 %v3586_v19, %v3574_v14  ;;  %3834 = vmatpush.bf16.msra.mxu1 %v5783_v5  ;;  %v5758_v14 = vld [vmem:[#allocation11 + $0x90] sm:$0xf]  ;;  %v6279_v19 = vld [vmem:[#allocation11 + $0x94] sm:$0xf0] }
 0x263   :  { %3862 = vmatpush.bf16.msra.mxu3 %v5771_v44  ;;  %v5759_v16 = vor.u32 %v6279_v19, %v5758_v14 }
 0x266   :  { %3835 = vmatpush.bf16.msra.mxu1 %v5775_v11 }
 0x267   :  { %v3575_v6 = vpop.f32.mrf.mxu0  ;;  %v3599_v43 = vpop.f32.mrf.mxu2  ;;  %3863 = vmatpush.bf16.msra.mxu3 %v5763_v22 }
 0x268   :  { %v6712_v45 = vadd.f32 %v3599_v43, %v3587_v21  ;;  %v6277_v21 = vld [vmem:[#allocation11 + $0x84] sm:$0xf0]  ;;  %v3652_v43 = vld [vmem:[#allocation13] sm:$0x3] }
 0x269   :  { %v3588_v39 = vpop.f32.mrf.mxu1  ;;  %v5751_v13 = vor.u32 %v6277_v21, %v5750_v17  ;;  %v3654_v47 = vperm.slane %v3652_v43, 0  ;;  %v3655_v51 = vperm.slane %v3652_v43, 1 }
 0x26a   :  { %3836 = vmatpush.bf16.msra.mxu1 %v5767_v42 }
 0x26b   :  { %3864 = vmatpush.bf16.msra.mxu3 %v5755_v26 }
 0x26e   :  { %3837 = vmatpush.bf16.msra.mxu1 %v5759_v16 }
 0x26f   :  { %v3601_v49 = vpop.f32.mrf.mxu2 }
 0x272   :  { %3838 = vmatpush.bf16.msra.mxu1 %v5751_v13 }
 0x2b3   :  { %v3560_v28 = vpop.f32.mrf.mxu3 }
 0x2b4   :  { %v3561_v31 = vadd.f32 %v3560_v28, %v6710_v18 }
 0x2b6   :  { %v3616_v32 = vmax.f32 %v3561_v31, 0.0 }
 0x2b8   :  { %v3618_v34 = vpack.c.bf16 %v3616_v32, %v3616_v32 }
 0x2ba   :  { %3826 = vmatmul.bf16.vlgmr.msra.gmra.mxu0 %v3618_v34  ;;  %3852 = vmatmul.bf16.vlgmr.msra.gmra.mxu2 %v3618_v34 }
 0x2bb   :  { %v3562_v35 = vpop.f32.mrf.mxu3 }
 0x2c3   :  { %v3612_v36 = vpop.f32.mrf.mxu3 }
 0x2c4   :  { %v3613_v6 = vadd.f32 %v3612_v36, %v6712_v45 }
 0x2c6   :  { %v3617_v37 = vmax.f32 %v3613_v6, 0.0 }
 0x2c8   :  { %v3619_v9 = vpack.c.bf16 %v3617_v37, %v3617_v37 }
 0x2ca   :  { %3839 = vmatmul.bf16.vlgmr.msra.gmra.mxu1 %v3619_v9  ;;  %3865 = vmatmul.bf16.vlgmr.msra.gmra.mxu3 %v3619_v9 }
 0x2cb   :  { %v3614_v39 = vpop.f32.mrf.mxu3 }
 0x337   :  { %v3827_v56 = vpop.f32.mrf.mxu0 }
 0x338   :  { %v3828_v18 = vadd.f32 %v3827_v56, %v3654_v47 }
 0x33d   :  { %v3853_v57 = vpop.f32.mrf.mxu2 }
 0x33e   :  { %v3854_v45 = vadd.f32 %v3853_v57, %v3655_v51 }
 0x33f   :  { %v3829_v49 = vpop.f32.mrf.mxu0 }
 0x345   :  { %v3855_v48 = vpop.f32.mrf.mxu2 }
 0x347   :  { %v3840_v50 = vpop.f32.mrf.mxu1 }
 0x348   :  { %v3841_v25 = vadd.f32 %v3840_v50, %v3828_v18 }
 0x34a   :  { %3870 = vst [vmem:[#allocation14] sm:$0xff] %v3841_v25 }
 0x34d   :  { %v3866_v53 = vpop.f32.mrf.mxu3 }
 0x34e   :  { %v3867_v46 = vadd.f32 %v3866_v53, %v3854_v45 }
 0x34f   :  { %v3842_v54 = vpop.f32.mrf.mxu1 }
 0x350   :  { %3871 = vst [vmem:[#allocation14 + $0x8] sm:$0xff] %v3867_v46 }
 0x351   :  { %3882 = dma.vmem_to_hbm [thread:$0]  %s3878_s6, 256, %s3880_s14, [#allocation4]  }
 0x355   :  { %v3868_v30 = vpop.f32.mrf.mxu3 }
 0x356   :  { %6505 = dma.done.wait [#allocation4], 256  }
 0x357   :  { %6506 = vsyncadd [#allocation4], 4294967040 }
 0x358   :  { %3887 = vsyncpa [#allocation3], 1 }
 0x359   :  { %3888 = vsyncpa [#allocation6], 1 }
 0x35a   :  { %3889 = vsyncpa [#allocation9], 1 }
 0x35b   :  { %3890 = vsyncpa [#allocation12], 1 }
 0x35c   :  { %3891 = vsyncpa [#allocation4], 1 }

</bundles_post_ra>
